<compile_context>
chip_gen: v7x
topology: tpu7x:2x2x1
jax: 0.10.0
libtpu: 0.0.40
codegen_flags: <defaults>
</compile_context>

<pallas_src>
import functools

import jax
import jax.numpy as jnp
import numpy as np
from jax.experimental import pallas as pl
from jax.experimental.pallas import tpu as pltpu

BN_EPS = 1e-5
# Keep every pallas_call's scoped-VMEM request small enough for all generations
# (v5e/v6e: 128 MiB physical, v7x: 64 MiB physical / 32 MiB default scoped).
VMEM_LIMIT_BYTES = 32 * 1024 * 1024


# ------------------------------- Pallas kernels -------------------------------

def _pointwise_kernel(x_ref, w_ref, b_ref, o_ref):
    # x_ref: (TT, Cin, L)  w_ref: (Cout, Cin)  b_ref: (Cout, 1)  o_ref: (TT, Cout, L)
    tt, cin = x_ref.shape[0], x_ref.shape[1]
    cout, l = o_ref.shape[1], o_ref.shape[2]
    b = b_ref[...]                                              # (Cout, 1)
    for t in range(tt):
        acc = jnp.zeros((cout, l), jnp.float32)
        for ci in range(cin):
            # (Cout, 1) * (1, L) -> (Cout, L): pure VPU FMAs, lane-dense.
            acc = acc + w_ref[:, pl.ds(ci, 1)] * x_ref[t, pl.ds(ci, 1), :]
        o_ref[t] = (acc + b).astype(o_ref.dtype)


def _layer_kernel(x0_ref, x1_ref, x2_ref, w_dw_ref, scale_ref, shift_ref,
                  w1_ref, b1_ref, mask_ref, o_ref, h_scr, *, t_offsets, T, W):
    # x*_ref : (C, L) input frames at t + t_offsets[kt] (index map clipped to [0, T-1])
    # w_dw_ref: (C, 27) depthwise taps, column k = kt*9 + kh*3 + kw
    # scale_ref/shift_ref: (C, 1) folded BatchNorm(eval) + depthwise-conv bias
    # w1_ref : (C, C) 1x1 conv weights [co, ci];  b1_ref: (C, 1) its bias
    # mask_ref: (9, L) spatial zero-padding masks, row = kh*3 + kw
    # o_ref  : (C, L) output frame;  h_scr: (C, L) f32 scratch (acc, then relu(h))
    C, L = h_scr.shape
    t = pl.program_id(0)
    x_refs = (x0_ref, x1_ref, x2_ref)

    # Temporal-tap validity factors replace explicit zero padding along T.
    tfs = []
    for off_t in t_offsets:
        if off_t == 0:
            tfs.append(None)
        else:
            src = t + off_t
            ok = jnp.logical_and(src >= 0, src <= T - 1)
            tfs.append(jnp.where(ok, jnp.float32(1.0), jnp.float32(0.0)))

    # Depthwise dilated 3x3x3 conv accumulated into the VMEM scratch.
    h_scr[...] = jnp.zeros_like(h_scr)
    for kh in range(3):
        for kw in range(3):
            dh, dw = kh - 1, kw - 1
            off = dh * W + dw                    # lane offset within fused (N, H, W)
            src_lo, dst_lo = max(0, off), max(0, -off)
            width = L - abs(off)
            k9 = kh * 3 + kw
            contrib = jnp.zeros((C, width), jnp.float32)
            for kt in range(3):
                w_col = w_dw_ref[:, pl.ds(kt * 9 + k9, 1)]          # (C, 1)
                if tfs[kt] is not None:
                    w_col = w_col * tfs[kt]
                contrib = contrib + x_refs[kt][:, pl.ds(src_lo, width)] * w_col
            if dh != 0 or dw != 0:
                contrib = contrib * mask_ref[pl.ds(k9, 1), pl.ds(dst_lo, width)]
            h_scr[:, pl.ds(dst_lo, width)] = (
                h_scr[:, pl.ds(dst_lo, width)] + contrib)

    # Folded (depthwise bias + BatchNorm eval) and ReLU.
    h_scr[...] = jnp.maximum(h_scr[...] * scale_ref[...] + shift_ref[...], 0.0)

    # Fused 1x1 conv + bias + residual add (Dropout = identity in eval mode).
    res_idx = t_offsets.index(0)            # the zero-offset tap is frame t itself
    acc = x_refs[res_idx][...] + b1_ref[...]
    for ci in range(C):
        acc = acc + w1_ref[:, pl.ds(ci, 1)] * h_scr[pl.ds(ci, 1), :]
    o_ref[...] = acc.astype(o_ref.dtype)


# ------------------------------ Pallas wrappers --------------------------------

def _choose_t_tile(T, c, l, max_bytes=1 << 20):
    """Largest T-tile that divides T, keeps in+out blocks <= max_bytes and leaves
    a grid of >= 2 steps (so pipelining works and both v7x TensorCores get work)."""
    best = 1
    for tt in range(1, T + 1):
        if T % tt:
            continue
        if 2 * tt * c * l * 4 > max_bytes:
            break
        if T // tt >= 2:
            best = tt
    return best


def pointwise_conv(x, w, b):
    """1x1x1 conv.  x: (T, Cin, L); w: (Cout, Cin); b: (Cout, 1) -> (T, Cout, L)."""
    T, cin, L = x.shape
    cout = w.shape[0]
    tt = _choose_t_tile(T, max(cin, cout), L)
    return pl.pallas_call(
        _pointwise_kernel,
        out_shape=jax.ShapeDtypeStruct((T, cout, L), jnp.float32),
        grid=(T // tt,),
        in_specs=[
            pl.BlockSpec((tt, cin, L), lambda i: (i, 0, 0)),
            pl.BlockSpec((cout, cin), lambda i: (0, 0)),
            pl.BlockSpec((cout, 1), lambda i: (0, 0)),
        ],
        out_specs=pl.BlockSpec((tt, cout, L), lambda i: (i, 0, 0)),
        compiler_params=pltpu.CompilerParams(
            dimension_semantics=("parallel",),
            vmem_limit_bytes=VMEM_LIMIT_BYTES),
    )(x, w, b)


def _tap_index_map(off, T):
    def index_map(t):
        return (jnp.clip(t + off, 0, T - 1), 0, 0)
    return index_map


def dilated_residual_layer(x, w_dw, scale, shift, w_1x1, b_1x1, mask9, *,
                           dilation, causal, W):
    """One fused residual layer.  x: (T, C, L) -> (T, C, L)."""
    T, C, L = x.shape
    base = -2 * dilation if causal else -dilation
    t_offsets = tuple(base + kt * dilation for kt in range(3))

    kern = functools.partial(_layer_kernel, t_offsets=t_offsets, T=T, W=W)

    def act_spec(off):
        return pl.BlockSpec((None, C, L), _tap_index_map(off, T))

    def const_spec(shape):
        return pl.BlockSpec(shape, lambda t: (0, 0))

    return pl.pallas_call(
        kern,
        out_shape=jax.ShapeDtypeStruct((T, C, L), x.dtype),
        grid=(T,),
        in_specs=[
            act_spec(t_offsets[0]),          # temporal tap kt = 0
            act_spec(t_offsets[1]),          # temporal tap kt = 1
            act_spec(t_offsets[2]),          # temporal tap kt = 2 (offset-0 tap doubles as residual)
            const_spec((C, 27)),             # depthwise weights
            const_spec((C, 1)),              # folded BN scale
            const_spec((C, 1)),              # folded BN shift (+ conv bias)
            const_spec((C, C)),              # 1x1 weights
            const_spec((C, 1)),              # 1x1 bias
            const_spec((9, L)),              # spatial boundary masks
        ],
        out_specs=pl.BlockSpec((None, C, L), lambda t: (t, 0, 0)),
        scratch_shapes=[pltpu.VMEM((C, L), jnp.float32)],
        compiler_params=pltpu.CompilerParams(
            dimension_semantics=("parallel",),
            vmem_limit_bytes=VMEM_LIMIT_BYTES),
    )(x, x, x, w_dw, scale, shift, w_1x1, b_1x1, mask9)


def _spatial_tap_masks(N, H, W):
    """(9, N*H*W) 0/1 masks implementing the spatial zero padding of the 3x3 taps."""
    l = np.arange(N * H * W)
    h = (l // W) % H
    w = l % W
    rows = []
    for kh in range(3):
        for kw in range(3):
            dh, dw = kh - 1, kw - 1
            ok = (h + dh >= 0) & (h + dh < H) & (w + dw >= 0) & (w + dw < W)
            rows.append(ok.astype(np.float32))
    return jnp.asarray(np.stack(rows, axis=0))


# -------------------------------- Model forward --------------------------------

def single_stage_3d_forward(x, params, causal=False):
    """x: (N, dim, T, H, W) float32 (PyTorch NCDHW) -> (N, num_classes, T, H, W)."""
    N, dim, T, H, W = x.shape
    L = N * H * W
    F = params['w_in'].shape[0]
    ncls = params['w_out'].shape[0]

    # NCDHW -> (T, C, N*H*W): channels on sublanes, fused batch+space on lanes.
    xt = jnp.transpose(x, (2, 1, 0, 3, 4)).reshape(T, dim, L).astype(jnp.float32)
    mask9 = _spatial_tap_masks(N, H, W)

    out = pointwise_conv(xt,
                         params['w_in'].reshape(F, dim).astype(jnp.float32),
                         params['b_in'].reshape(F, 1).astype(jnp.float32))

    for i, lp in enumerate(params['layers']):
        d = 2 ** i
        scale = lp['bn_gamma'] / jnp.sqrt(lp['bn_var'] + BN_EPS)           # (F,)
        shift = (lp['b_dw'] - lp['bn_mean']) * scale + lp['bn_beta']       # (F,)
        out = dilated_residual_layer(
            out,
            lp['w_dw'].reshape(F, 27).astype(jnp.float32),
            scale.reshape(F, 1).astype(jnp.float32),
            shift.reshape(F, 1).astype(jnp.float32),
            lp['w_1x1'].reshape(F, F).astype(jnp.float32),
            lp['b_1x1'].reshape(F, 1).astype(jnp.float32),
            mask9,
            dilation=d, causal=causal, W=W)

    out = pointwise_conv(out,
                         params['w_out'].reshape(ncls, F).astype(jnp.float32),
                         params['b_out'].reshape(ncls, 1).astype(jnp.float32))

    return jnp.transpose(out.reshape(T, ncls, N, H, W), (2, 1, 0, 3, 4))


# -------------------------- Pure-JAX reference (check) --------------------------

def _conv3d_ref(x, w, b, padding, dilation=(1, 1, 1), groups=1):
    out = jax.lax.conv_general_dilated(
        x, w, window_strides=(1, 1, 1), padding=padding,
        rhs_dilation=dilation,
        dimension_numbers=('NCDHW', 'OIDHW', 'NCDHW'),
        feature_group_count=groups,
        precision=jax.lax.Precision.HIGHEST)
    return out + b[None, :, None, None, None]


def reference_forward(x, params, causal=False):
    def bc(v):
        return v[None, :, None, None, None]

    out = _conv3d_ref(x, params['w_in'], params['b_in'], padding=[(0, 0)] * 3)
    C = params['w_in'].shape[0]
    for i, lp in enumerate(params['layers']):
        d = 2 ** i
        if causal:
            xi = jnp.pad(out, ((0, 0), (0, 0), (2 * d, 0), (1, 1), (1, 1)))
            pad = [(0, 0), (0, 0), (0, 0)]
        else:
            xi = out
            pad = [(d, d), (1, 1), (1, 1)]
        conv = _conv3d_ref(xi, lp['w_dw'], lp['b_dw'], padding=pad,
                           dilation=(d, 1, 1), groups=C)
        bn = ((conv - bc(lp['bn_mean'])) / jnp.sqrt(bc(lp['bn_var']) + BN_EPS)
              * bc(lp['bn_gamma']) + bc(lp['bn_beta']))
        h = jnp.maximum(bn, 0.0)
        h = _conv3d_ref(h, lp['w_1x1'], lp['b_1x1'], padding=[(0, 0)] * 3)
        out = out + h
    return _conv3d_ref(out, params['w_out'], params['b_out'], padding=[(0, 0)] * 3)


# ---------------------------------- Param init ----------------------------------

def init_params(key, num_layers, num_f_maps, dim, num_classes):
    def nrm(k, shape, scale=1.0):
        return (scale * jax.random.normal(k, shape)).astype(jnp.float32)

    ks = jax.random.split(key, 4 + num_layers)
    params = {
        'w_in':  nrm(ks[0], (num_f_maps, dim, 1, 1, 1), dim ** -0.5),
        'b_in':  nrm(ks[1], (num_f_maps,), 0.1),
        'w_out': nrm(ks[2], (num_classes, num_f_maps, 1, 1, 1), num_f_maps ** -0.5),
        'b_out': nrm(ks[3], (num_classes,), 0.1),
        'layers': [],
    }
    F = num_f_maps
    for i in range(num_layers):
        lk = jax.random.split(ks[4 + i], 8)
        params['layers'].append(dict(
            w_dw=nrm(lk[0], (F, 1, 3, 3, 3), 27 ** -0.5),
            b_dw=nrm(lk[1], (F,), 0.1),
            bn_gamma=(1.0 + nrm(lk[2], (F,), 0.1)),
            bn_beta=nrm(lk[3], (F,), 0.1),
            bn_mean=nrm(lk[4], (F,), 0.1),
            bn_var=jax.random.uniform(lk[5], (F,), jnp.float32, 0.5, 1.5),
            w_1x1=nrm(lk[6], (F, F, 1, 1, 1), F ** -0.5),
            b_1x1=nrm(lk[7], (F,), 0.1),
        ))
    return params


# ------------------------------------- Main -------------------------------------

if __name__ == "__main__":
    N, dim, T, H, W = 2, 4, 8, 8, 8
    num_layers, num_f_maps, num_classes = 3, 8, 6

    key = jax.random.PRNGKey(0)
    kp, kx = jax.random.split(key)
    params = init_params(kp, num_layers, num_f_maps, dim, num_classes)
    x = (0.5 * jax.random.normal(kx, (N, dim, T, H, W))).astype(jnp.float32)

    fwd = jax.jit(single_stage_3d_forward, static_argnames=('causal',))

    # non-causal (default) variant
    out = jax.block_until_ready(fwd(x, params, causal=False))
    assert out.shape == (N, num_classes, T, H, W)
    ref = reference_forward(x, params, causal=False)
    err = float(jnp.max(jnp.abs(out - ref)))
    assert err < 5e-3, f"non-causal mismatch: {err}"

    # causal variant (only the temporal tap offsets change)
    out_c = jax.block_until_ready(fwd(x, params, causal=True))
    ref_c = reference_forward(x, params, causal=True)
    err_c = float(jnp.max(jnp.abs(out_c - ref_c)))
    assert err_c < 5e-3, f"causal mismatch: {err_c}"

    print("KERNEL_OK")
</pallas_src>

<mosaic_0001>
module attributes {stable_mosaic.version = 11 : i64} {
  func.func @_pointwise_kernel(%arg0: i32, %arg1: memref<4x4x128xf32, #tpu.memory_space<vmem>>, %arg2: memref<8x4xf32, #tpu.memory_space<vmem>>, %arg3: memref<8x1xf32, #tpu.memory_space<vmem>>, %arg4: memref<4x8x128xf32, #tpu.memory_space<vmem>>) attributes {dimension_semantics = [#tpu.dimension_semantics<parallel>], iteration_bounds = array<i64: 2>, scalar_prefetch = 0 : i64, scratch_operands = 0 : i64, tpu.core_type = #tpu.core_type<tc>, window_params = [{transform_indices = @transform_0, window_bounds = array<i64: 4, 4, 128>}, {pipeline_mode = #tpu.pipeline_mode<synchronous>, transform_indices = @transform_1, window_bounds = array<i64: 8, 4>}, {pipeline_mode = #tpu.pipeline_mode<synchronous>, transform_indices = @transform_2, window_bounds = array<i64: 8, 1>}, {transform_indices = @transform_3, window_bounds = array<i64: 4, 8, 128>}]} {
    %c0 = arith.constant 0 : index
    %c0_0 = arith.constant 0 : index
    %0 = vector.load %arg3[%c0, %c0_0] : memref<8x1xf32, #tpu.memory_space<vmem>>, vector<8x1xf32>
    %cst = arith.constant 0.000000e+00 : f32
    %1 = vector.broadcast %cst : f32 to vector<8x128xf32>
    %c0_1 = arith.constant 0 : index
    %c0_2 = arith.constant 0 : index
    %2 = vector.load %arg2[%c0_1, %c0_2] : memref<8x4xf32, #tpu.memory_space<vmem>>, vector<8x1xf32>
    %c0_3 = arith.constant 0 : index
    %c0_4 = arith.constant 0 : index
    %c0_5 = arith.constant 0 : index
    %3 = vector.load %arg1[%c0_3, %c0_4, %c0_5] : memref<4x4x128xf32, #tpu.memory_space<vmem>>, vector<1x1x128xf32>
    %4 = vector.shape_cast %3 : vector<1x1x128xf32> to vector<1x128xf32>
    %5 = vector.broadcast %2 : vector<8x1xf32> to vector<8x128xf32>
    %6 = vector.broadcast %4 : vector<1x128xf32> to vector<8x128xf32>
    %7 = arith.mulf %5, %6 : vector<8x128xf32>
    %8 = arith.addf %1, %7 : vector<8x128xf32>
    %c0_6 = arith.constant 0 : index
    %c1 = arith.constant 1 : index
    %9 = vector.load %arg2[%c0_6, %c1] : memref<8x4xf32, #tpu.memory_space<vmem>>, vector<8x1xf32>
    %c0_7 = arith.constant 0 : index
    %c1_8 = arith.constant 1 : index
    %c0_9 = arith.constant 0 : index
    %10 = vector.load %arg1[%c0_7, %c1_8, %c0_9] : memref<4x4x128xf32, #tpu.memory_space<vmem>>, vector<1x1x128xf32>
    %11 = vector.shape_cast %10 : vector<1x1x128xf32> to vector<1x128xf32>
    %12 = vector.broadcast %9 : vector<8x1xf32> to vector<8x128xf32>
    %13 = vector.broadcast %11 : vector<1x128xf32> to vector<8x128xf32>
    %14 = arith.mulf %12, %13 : vector<8x128xf32>
    %15 = arith.addf %8, %14 : vector<8x128xf32>
    %c0_10 = arith.constant 0 : index
    %c2 = arith.constant 2 : index
    %16 = vector.load %arg2[%c0_10, %c2] : memref<8x4xf32, #tpu.memory_space<vmem>>, vector<8x1xf32>
    %c0_11 = arith.constant 0 : index
    %c2_12 = arith.constant 2 : index
    %c0_13 = arith.constant 0 : index
    %17 = vector.load %arg1[%c0_11, %c2_12, %c0_13] : memref<4x4x128xf32, #tpu.memory_space<vmem>>, vector<1x1x128xf32>
    %18 = vector.shape_cast %17 : vector<1x1x128xf32> to vector<1x128xf32>
    %19 = vector.broadcast %16 : vector<8x1xf32> to vector<8x128xf32>
    %20 = vector.broadcast %18 : vector<1x128xf32> to vector<8x128xf32>
    %21 = arith.mulf %19, %20 : vector<8x128xf32>
    %22 = arith.addf %15, %21 : vector<8x128xf32>
    %c0_14 = arith.constant 0 : index
    %c3 = arith.constant 3 : index
    %23 = vector.load %arg2[%c0_14, %c3] : memref<8x4xf32, #tpu.memory_space<vmem>>, vector<8x1xf32>
    %c0_15 = arith.constant 0 : index
    %c3_16 = arith.constant 3 : index
    %c0_17 = arith.constant 0 : index
    %24 = vector.load %arg1[%c0_15, %c3_16, %c0_17] : memref<4x4x128xf32, #tpu.memory_space<vmem>>, vector<1x1x128xf32>
    %25 = vector.shape_cast %24 : vector<1x1x128xf32> to vector<1x128xf32>
    %26 = vector.broadcast %23 : vector<8x1xf32> to vector<8x128xf32>
    %27 = vector.broadcast %25 : vector<1x128xf32> to vector<8x128xf32>
    %28 = arith.mulf %26, %27 : vector<8x128xf32>
    %29 = arith.addf %22, %28 : vector<8x128xf32>
    %30 = vector.broadcast %0 : vector<8x1xf32> to vector<8x128xf32>
    %31 = arith.addf %29, %30 : vector<8x128xf32>
    %c0_18 = arith.constant 0 : index
    %c0_19 = arith.constant 0 : index
    %c0_20 = arith.constant 0 : index
    %32 = vector.load %arg4[%c0_18, %c0_19, %c0_20] : memref<4x8x128xf32, #tpu.memory_space<vmem>>, vector<1x8x128xf32>
    %33 = vector.shape_cast %32 : vector<1x8x128xf32> to vector<8x128xf32>
    %34 = vector.shape_cast %31 : vector<8x128xf32> to vector<1x8x128xf32>
    tpu.vector_store %arg4[%c0_18, %c0_19, %c0_20], %34 {strides = array<i32>} : memref<4x8x128xf32, #tpu.memory_space<vmem>>, vector<1x8x128xf32>,
    %cst_21 = arith.constant 0.000000e+00 : f32
    %35 = vector.broadcast %cst_21 : f32 to vector<8x128xf32>
    %c0_22 = arith.constant 0 : index
    %c0_23 = arith.constant 0 : index
    %36 = vector.load %arg2[%c0_22, %c0_23] : memref<8x4xf32, #tpu.memory_space<vmem>>, vector<8x1xf32>
    %c1_24 = arith.constant 1 : index
    %c0_25 = arith.constant 0 : index
    %c0_26 = arith.constant 0 : index
    %37 = vector.load %arg1[%c1_24, %c0_25, %c0_26] : memref<4x4x128xf32, #tpu.memory_space<vmem>>, vector<1x1x128xf32>
    %38 = vector.shape_cast %37 : vector<1x1x128xf32> to vector<1x128xf32>
    %39 = vector.broadcast %36 : vector<8x1xf32> to vector<8x128xf32>
    %40 = vector.broadcast %38 : vector<1x128xf32> to vector<8x128xf32>
    %41 = arith.mulf %39, %40 : vector<8x128xf32>
    %42 = arith.addf %35, %41 : vector<8x128xf32>
    %c0_27 = arith.constant 0 : index
    %c1_28 = arith.constant 1 : index
    %43 = vector.load %arg2[%c0_27, %c1_28] : memref<8x4xf32, #tpu.memory_space<vmem>>, vector<8x1xf32>
    %c1_29 = arith.constant 1 : index
    %c1_30 = arith.constant 1 : index
    %c0_31 = arith.constant 0 : index
    %44 = vector.load %arg1[%c1_29, %c1_30, %c0_31] : memref<4x4x128xf32, #tpu.memory_space<vmem>>, vector<1x1x128xf32>
    %45 = vector.shape_cast %44 : vector<1x1x128xf32> to vector<1x128xf32>
    %46 = vector.broadcast %43 : vector<8x1xf32> to vector<8x128xf32>
    %47 = vector.broadcast %45 : vector<1x128xf32> to vector<8x128xf32>
    %48 = arith.mulf %46, %47 : vector<8x128xf32>
    %49 = arith.addf %42, %48 : vector<8x128xf32>
    %c0_32 = arith.constant 0 : index
    %c2_33 = arith.constant 2 : index
    %50 = vector.load %arg2[%c0_32, %c2_33] : memref<8x4xf32, #tpu.memory_space<vmem>>, vector<8x1xf32>
    %c1_34 = arith.constant 1 : index
    %c2_35 = arith.constant 2 : index
    %c0_36 = arith.constant 0 : index
    %51 = vector.load %arg1[%c1_34, %c2_35, %c0_36] : memref<4x4x128xf32, #tpu.memory_space<vmem>>, vector<1x1x128xf32>
    %52 = vector.shape_cast %51 : vector<1x1x128xf32> to vector<1x128xf32>
    %53 = vector.broadcast %50 : vector<8x1xf32> to vector<8x128xf32>
    %54 = vector.broadcast %52 : vector<1x128xf32> to vector<8x128xf32>
    %55 = arith.mulf %53, %54 : vector<8x128xf32>
    %56 = arith.addf %49, %55 : vector<8x128xf32>
    %c0_37 = arith.constant 0 : index
    %c3_38 = arith.constant 3 : index
    %57 = vector.load %arg2[%c0_37, %c3_38] : memref<8x4xf32, #tpu.memory_space<vmem>>, vector<8x1xf32>
    %c1_39 = arith.constant 1 : index
    %c3_40 = arith.constant 3 : index
    %c0_41 = arith.constant 0 : index
    %58 = vector.load %arg1[%c1_39, %c3_40, %c0_41] : memref<4x4x128xf32, #tpu.memory_space<vmem>>, vector<1x1x128xf32>
    %59 = vector.shape_cast %58 : vector<1x1x128xf32> to vector<1x128xf32>
    %60 = vector.broadcast %57 : vector<8x1xf32> to vector<8x128xf32>
    %61 = vector.broadcast %59 : vector<1x128xf32> to vector<8x128xf32>
    %62 = arith.mulf %60, %61 : vector<8x128xf32>
    %63 = arith.addf %56, %62 : vector<8x128xf32>
    %64 = vector.broadcast %0 : vector<8x1xf32> to vector<8x128xf32>
    %65 = arith.addf %63, %64 : vector<8x128xf32>
    %c1_42 = arith.constant 1 : index
    %c0_43 = arith.constant 0 : index
    %c0_44 = arith.constant 0 : index
    %66 = vector.load %arg4[%c1_42, %c0_43, %c0_44] : memref<4x8x128xf32, #tpu.memory_space<vmem>>, vector<1x8x128xf32>
    %67 = vector.shape_cast %66 : vector<1x8x128xf32> to vector<8x128xf32>
    %68 = vector.shape_cast %65 : vector<8x128xf32> to vector<1x8x128xf32>
    tpu.vector_store %arg4[%c1_42, %c0_43, %c0_44], %68 {strides = array<i32>} : memref<4x8x128xf32, #tpu.memory_space<vmem>>, vector<1x8x128xf32>,
    %cst_45 = arith.constant 0.000000e+00 : f32
    %69 = vector.broadcast %cst_45 : f32 to vector<8x128xf32>
    %c0_46 = arith.constant 0 : index
    %c0_47 = arith.constant 0 : index
    %70 = vector.load %arg2[%c0_46, %c0_47] : memref<8x4xf32, #tpu.memory_space<vmem>>, vector<8x1xf32>
    %c2_48 = arith.constant 2 : index
    %c0_49 = arith.constant 0 : index
    %c0_50 = arith.constant 0 : index
    %71 = vector.load %arg1[%c2_48, %c0_49, %c0_50] : memref<4x4x128xf32, #tpu.memory_space<vmem>>, vector<1x1x128xf32>
    %72 = vector.shape_cast %71 : vector<1x1x128xf32> to vector<1x128xf32>
    %73 = vector.broadcast %70 : vector<8x1xf32> to vector<8x128xf32>
    %74 = vector.broadcast %72 : vector<1x128xf32> to vector<8x128xf32>
    %75 = arith.mulf %73, %74 : vector<8x128xf32>
    %76 = arith.addf %69, %75 : vector<8x128xf32>
    %c0_51 = arith.constant 0 : index
    %c1_52 = arith.constant 1 : index
    %77 = vector.load %arg2[%c0_51, %c1_52] : memref<8x4xf32, #tpu.memory_space<vmem>>, vector<8x1xf32>
    %c2_53 = arith.constant 2 : index
    %c1_54 = arith.constant 1 : index
    %c0_55 = arith.constant 0 : index
    %78 = vector.load %arg1[%c2_53, %c1_54, %c0_55] : memref<4x4x128xf32, #tpu.memory_space<vmem>>, vector<1x1x128xf32>
    %79 = vector.shape_cast %78 : vector<1x1x128xf32> to vector<1x128xf32>
    %80 = vector.broadcast %77 : vector<8x1xf32> to vector<8x128xf32>
    %81 = vector.broadcast %79 : vector<1x128xf32> to vector<8x128xf32>
    %82 = arith.mulf %80, %81 : vector<8x128xf32>
    %83 = arith.addf %76, %82 : vector<8x128xf32>
    %c0_56 = arith.constant 0 : index
    %c2_57 = arith.constant 2 : index
    %84 = vector.load %arg2[%c0_56, %c2_57] : memref<8x4xf32, #tpu.memory_space<vmem>>, vector<8x1xf32>
    %c2_58 = arith.constant 2 : index
    %c2_59 = arith.constant 2 : index
    %c0_60 = arith.constant 0 : index
    %85 = vector.load %arg1[%c2_58, %c2_59, %c0_60] : memref<4x4x128xf32, #tpu.memory_space<vmem>>, vector<1x1x128xf32>
    %86 = vector.shape_cast %85 : vector<1x1x128xf32> to vector<1x128xf32>
    %87 = vector.broadcast %84 : vector<8x1xf32> to vector<8x128xf32>
    %88 = vector.broadcast %86 : vector<1x128xf32> to vector<8x128xf32>
    %89 = arith.mulf %87, %88 : vector<8x128xf32>
    %90 = arith.addf %83, %89 : vector<8x128xf32>
    %c0_61 = arith.constant 0 : index
    %c3_62 = arith.constant 3 : index
    %91 = vector.load %arg2[%c0_61, %c3_62] : memref<8x4xf32, #tpu.memory_space<vmem>>, vector<8x1xf32>
    %c2_63 = arith.constant 2 : index
    %c3_64 = arith.constant 3 : index
    %c0_65 = arith.constant 0 : index
    %92 = vector.load %arg1[%c2_63, %c3_64, %c0_65] : memref<4x4x128xf32, #tpu.memory_space<vmem>>, vector<1x1x128xf32>
    %93 = vector.shape_cast %92 : vector<1x1x128xf32> to vector<1x128xf32>
    %94 = vector.broadcast %91 : vector<8x1xf32> to vector<8x128xf32>
    %95 = vector.broadcast %93 : vector<1x128xf32> to vector<8x128xf32>
    %96 = arith.mulf %94, %95 : vector<8x128xf32>
    %97 = arith.addf %90, %96 : vector<8x128xf32>
    %98 = vector.broadcast %0 : vector<8x1xf32> to vector<8x128xf32>
    %99 = arith.addf %97, %98 : vector<8x128xf32>
    %c2_66 = arith.constant 2 : index
    %c0_67 = arith.constant 0 : index
    %c0_68 = arith.constant 0 : index
    %100 = vector.load %arg4[%c2_66, %c0_67, %c0_68] : memref<4x8x128xf32, #tpu.memory_space<vmem>>, vector<1x8x128xf32>
    %101 = vector.shape_cast %100 : vector<1x8x128xf32> to vector<8x128xf32>
    %102 = vector.shape_cast %99 : vector<8x128xf32> to vector<1x8x128xf32>
    tpu.vector_store %arg4[%c2_66, %c0_67, %c0_68], %102 {strides = array<i32>} : memref<4x8x128xf32, #tpu.memory_space<vmem>>, vector<1x8x128xf32>,
    %cst_69 = arith.constant 0.000000e+00 : f32
    %103 = vector.broadcast %cst_69 : f32 to vector<8x128xf32>
    %c0_70 = arith.constant 0 : index
    %c0_71 = arith.constant 0 : index
    %104 = vector.load %arg2[%c0_70, %c0_71] : memref<8x4xf32, #tpu.memory_space<vmem>>, vector<8x1xf32>
    %c3_72 = arith.constant 3 : index
    %c0_73 = arith.constant 0 : index
    %c0_74 = arith.constant 0 : index
    %105 = vector.load %arg1[%c3_72, %c0_73, %c0_74] : memref<4x4x128xf32, #tpu.memory_space<vmem>>, vector<1x1x128xf32>
    %106 = vector.shape_cast %105 : vector<1x1x128xf32> to vector<1x128xf32>
    %107 = vector.broadcast %104 : vector<8x1xf32> to vector<8x128xf32>
    %108 = vector.broadcast %106 : vector<1x128xf32> to vector<8x128xf32>
    %109 = arith.mulf %107, %108 : vector<8x128xf32>
    %110 = arith.addf %103, %109 : vector<8x128xf32>
    %c0_75 = arith.constant 0 : index
    %c1_76 = arith.constant 1 : index
    %111 = vector.load %arg2[%c0_75, %c1_76] : memref<8x4xf32, #tpu.memory_space<vmem>>, vector<8x1xf32>
    %c3_77 = arith.constant 3 : index
    %c1_78 = arith.constant 1 : index
    %c0_79 = arith.constant 0 : index
    %112 = vector.load %arg1[%c3_77, %c1_78, %c0_79] : memref<4x4x128xf32, #tpu.memory_space<vmem>>, vector<1x1x128xf32>
    %113 = vector.shape_cast %112 : vector<1x1x128xf32> to vector<1x128xf32>
    %114 = vector.broadcast %111 : vector<8x1xf32> to vector<8x128xf32>
    %115 = vector.broadcast %113 : vector<1x128xf32> to vector<8x128xf32>
    %116 = arith.mulf %114, %115 : vector<8x128xf32>
    %117 = arith.addf %110, %116 : vector<8x128xf32>
    %c0_80 = arith.constant 0 : index
    %c2_81 = arith.constant 2 : index
    %118 = vector.load %arg2[%c0_80, %c2_81] : memref<8x4xf32, #tpu.memory_space<vmem>>, vector<8x1xf32>
    %c3_82 = arith.constant 3 : index
    %c2_83 = arith.constant 2 : index
    %c0_84 = arith.constant 0 : index
    %119 = vector.load %arg1[%c3_82, %c2_83, %c0_84] : memref<4x4x128xf32, #tpu.memory_space<vmem>>, vector<1x1x128xf32>
    %120 = vector.shape_cast %119 : vector<1x1x128xf32> to vector<1x128xf32>
    %121 = vector.broadcast %118 : vector<8x1xf32> to vector<8x128xf32>
    %122 = vector.broadcast %120 : vector<1x128xf32> to vector<8x128xf32>
    %123 = arith.mulf %121, %122 : vector<8x128xf32>
    %124 = arith.addf %117, %123 : vector<8x128xf32>
    %c0_85 = arith.constant 0 : index
    %c3_86 = arith.constant 3 : index
    %125 = vector.load %arg2[%c0_85, %c3_86] : memref<8x4xf32, #tpu.memory_space<vmem>>, vector<8x1xf32>
    %c3_87 = arith.constant 3 : index
    %c3_88 = arith.constant 3 : index
    %c0_89 = arith.constant 0 : index
    %126 = vector.load %arg1[%c3_87, %c3_88, %c0_89] : memref<4x4x128xf32, #tpu.memory_space<vmem>>, vector<1x1x128xf32>
    %127 = vector.shape_cast %126 : vector<1x1x128xf32> to vector<1x128xf32>
    %128 = vector.broadcast %125 : vector<8x1xf32> to vector<8x128xf32>
    %129 = vector.broadcast %127 : vector<1x128xf32> to vector<8x128xf32>
    %130 = arith.mulf %128, %129 : vector<8x128xf32>
    %131 = arith.addf %124, %130 : vector<8x128xf32>
    %132 = vector.broadcast %0 : vector<8x1xf32> to vector<8x128xf32>
    %133 = arith.addf %131, %132 : vector<8x128xf32>
    %c3_90 = arith.constant 3 : index
    %c0_91 = arith.constant 0 : index
    %c0_92 = arith.constant 0 : index
    %134 = vector.load %arg4[%c3_90, %c0_91, %c0_92] : memref<4x8x128xf32, #tpu.memory_space<vmem>>, vector<1x8x128xf32>
    %135 = vector.shape_cast %134 : vector<1x8x128xf32> to vector<8x128xf32>
    %136 = vector.shape_cast %133 : vector<8x128xf32> to vector<1x8x128xf32>
    tpu.vector_store %arg4[%c3_90, %c0_91, %c0_92], %136 {strides = array<i32>} : memref<4x8x128xf32, #tpu.memory_space<vmem>>, vector<1x8x128xf32>,
    return
  }
  func.func @transform_0(%arg0: i32) -> (i32, i32, i32) {
    %c0_i32 = arith.constant 0 : i32
    %c0_i32_0 = arith.constant 0 : i32
    %c0_i32_1 = arith.constant 0 : i32
    return %arg0, %c0_i32, %c0_i32_0 : i32, i32, i32
  }
  func.func @transform_1(%arg0: i32) -> (i32, i32) {
    %c0_i32 = arith.constant 0 : i32
    %c0_i32_0 = arith.constant 0 : i32
    %c0_i32_1 = arith.constant 0 : i32
    return %c0_i32, %c0_i32_0 : i32, i32
  }
  func.func @transform_2(%arg0: i32) -> (i32, i32) {
    %c0_i32 = arith.constant 0 : i32
    %c0_i32_0 = arith.constant 0 : i32
    %c0_i32_1 = arith.constant 0 : i32
    return %c0_i32, %c0_i32_0 : i32, i32
  }
  func.func @transform_3(%arg0: i32) -> (i32, i32, i32) {
    %c0_i32 = arith.constant 0 : i32
    %c0_i32_0 = arith.constant 0 : i32
    %c0_i32_1 = arith.constant 0 : i32
    return %arg0, %c0_i32, %c0_i32_0 : i32, i32, i32
  }
}

module attributes {stable_mosaic.version = 11 : i64} {
  func.func @_layer_kernel(%arg0: i32, %arg1: memref<1x8x128xf32, #tpu.memory_space<vmem>>, %arg2: memref<1x8x128xf32, #tpu.memory_space<vmem>>, %arg3: memref<1x8x128xf32, #tpu.memory_space<vmem>>, %arg4: memref<8x27xf32, #tpu.memory_space<vmem>>, %arg5: memref<8x1xf32, #tpu.memory_space<vmem>>, %arg6: memref<8x1xf32, #tpu.memory_space<vmem>>, %arg7: memref<8x8xf32, #tpu.memory_space<vmem>>, %arg8: memref<8x1xf32, #tpu.memory_space<vmem>>, %arg9: memref<9x128xf32, #tpu.memory_space<vmem>>, %arg10: memref<1x8x128xf32, #tpu.memory_space<vmem>>, %arg11: memref<8x128xf32, #tpu.memory_space<vmem>>) attributes {dimension_semantics = [#tpu.dimension_semantics<parallel>], iteration_bounds = array<i64: 8>, scalar_prefetch = 0 : i64, scratch_operands = 1 : i64, tpu.core_type = #tpu.core_type<tc>, window_params = [{transform_indices = @transform_0, window_bounds = array<i64: 1, 8, 128>}, {transform_indices = @transform_1, window_bounds = array<i64: 1, 8, 128>}, {transform_indices = @transform_2, window_bounds = array<i64: 1, 8, 128>}, {pipeline_mode = #tpu.pipeline_mode<synchronous>, transform_indices = @transform_3, window_bounds = array<i64: 8, 27>}, {pipeline_mode = #tpu.pipeline_mode<synchronous>, transform_indices = @transform_4, window_bounds = array<i64: 8, 1>}, {pipeline_mode = #tpu.pipeline_mode<synchronous>, transform_indices = @transform_5, window_bounds = array<i64: 8, 1>}, {pipeline_mode = #tpu.pipeline_mode<synchronous>, transform_indices = @transform_6, window_bounds = array<i64: 8, 8>}, {pipeline_mode = #tpu.pipeline_mode<synchronous>, transform_indices = @transform_7, window_bounds = array<i64: 8, 1>}, {pipeline_mode = #tpu.pipeline_mode<synchronous>, transform_indices = @transform_8, window_bounds = array<i64: 9, 128>}, {transform_indices = @transform_9, window_bounds = array<i64: 1, 8, 128>}]} {
    %c-1_i32 = arith.constant -1 : i32
    %0 = arith.addi %arg0, %c-1_i32 : i32
    %c0_i32 = arith.constant 0 : i32
    %1 = arith.cmpi sge, %0, %c0_i32 : i32
    %c7_i32 = arith.constant 7 : i32
    %2 = arith.cmpi sle, %0, %c7_i32 : i32
    %3 = arith.andi %1, %2 : i1
    %cst = arith.constant 1.000000e+00 : f32
    %cst_0 = arith.constant 0.000000e+00 : f32
    %4 = arith.select %3, %cst, %cst_0 : f32
    %c1_i32 = arith.constant 1 : i32
    %5 = arith.addi %arg0, %c1_i32 : i32
    %c0_i32_1 = arith.constant 0 : i32
    %6 = arith.cmpi sge, %5, %c0_i32_1 : i32
    %c7_i32_2 = arith.constant 7 : i32
    %7 = arith.cmpi sle, %5, %c7_i32_2 : i32
    %8 = arith.andi %6, %7 : i1
    %cst_3 = arith.constant 1.000000e+00 : f32
    %cst_4 = arith.constant 0.000000e+00 : f32
    %9 = arith.select %8, %cst_3, %cst_4 : f32
    %cst_5 = arith.constant 0.000000e+00 : f32
    %10 = vector.broadcast %cst_5 : f32 to vector<8x128xf32>
    %c0 = arith.constant 0 : index
    %c0_6 = arith.constant 0 : index
    %11 = vector.load %arg11[%c0, %c0_6] : memref<8x128xf32, #tpu.memory_space<vmem>>, vector<8x128xf32>
    tpu.vector_store %arg11[%c0, %c0_6], %10 {strides = array<i32>} : memref<8x128xf32, #tpu.memory_space<vmem>>, vector<8x128xf32>,
    %cst_7 = arith.constant 0.000000e+00 : f32
    %12 = vector.broadcast %cst_7 : f32 to vector<8x119xf32>
    %c0_8 = arith.constant 0 : index
    %c0_9 = arith.constant 0 : index
    %13 = vector.load %arg4[%c0_8, %c0_9] : memref<8x27xf32, #tpu.memory_space<vmem>>, vector<8x1xf32>
    %14 = vector.broadcast %4 : f32 to vector<8x1xf32>
    %15 = arith.mulf %13, %14 : vector<8x1xf32>
    %c0_10 = arith.constant 0 : index
    %c0_11 = arith.constant 0 : index
    %c0_12 = arith.constant 0 : index
    %16 = vector.load %arg1[%c0_10, %c0_11, %c0_12] : memref<1x8x128xf32, #tpu.memory_space<vmem>>, vector<1x8x119xf32>
    %17 = vector.shape_cast %16 : vector<1x8x119xf32> to vector<8x119xf32>
    %18 = vector.broadcast %15 : vector<8x1xf32> to vector<8x119xf32>
    %19 = arith.mulf %17, %18 : vector<8x119xf32>
    %20 = arith.addf %12, %19 : vector<8x119xf32>
    %c0_13 = arith.constant 0 : index
    %c9 = arith.constant 9 : index
    %21 = vector.load %arg4[%c0_13, %c9] : memref<8x27xf32, #tpu.memory_space<vmem>>, vector<8x1xf32>
    %c0_14 = arith.constant 0 : index
    %c0_15 = arith.constant 0 : index
    %c0_16 = arith.constant 0 : index
    %22 = vector.load %arg2[%c0_14, %c0_15, %c0_16] : memref<1x8x128xf32, #tpu.memory_space<vmem>>, vector<1x8x119xf32>
    %23 = vector.shape_cast %22 : vector<1x8x119xf32> to vector<8x119xf32>
    %24 = vector.broadcast %21 : vector<8x1xf32> to vector<8x119xf32>
    %25 = arith.mulf %23, %24 : vector<8x119xf32>
    %26 = arith.addf %20, %25 : vector<8x119xf32>
    %c0_17 = arith.constant 0 : index
    %c18 = arith.constant 18 : index
    %27 = vector.load %arg4[%c0_17, %c18] : memref<8x27xf32, #tpu.memory_space<vmem>>, vector<8x1xf32>
    %28 = vector.broadcast %9 : f32 to vector<8x1xf32>
    %29 = arith.mulf %27, %28 : vector<8x1xf32>
    %c0_18 = arith.constant 0 : index
    %c0_19 = arith.constant 0 : index
    %c0_20 = arith.constant 0 : index
    %30 = vector.load %arg3[%c0_18, %c0_19, %c0_20] : memref<1x8x128xf32, #tpu.memory_space<vmem>>, vector<1x8x119xf32>
    %31 = vector.shape_cast %30 : vector<1x8x119xf32> to vector<8x119xf32>
    %32 = vector.broadcast %29 : vector<8x1xf32> to vector<8x119xf32>
    %33 = arith.mulf %31, %32 : vector<8x119xf32>
    %34 = arith.addf %26, %33 : vector<8x119xf32>
    %c0_21 = arith.constant 0 : index
    %c9_22 = arith.constant 9 : index
    %35 = vector.load %arg9[%c0_21, %c9_22] : memref<9x128xf32, #tpu.memory_space<vmem>>, vector<1x119xf32>
    %36 = vector.broadcast %35 : vector<1x119xf32> to vector<8x119xf32>
    %37 = arith.mulf %34, %36 : vector<8x119xf32>
    %c0_23 = arith.constant 0 : index
    %c9_24 = arith.constant 9 : index
    %38 = vector.load %arg11[%c0_23, %c9_24] : memref<8x128xf32, #tpu.memory_space<vmem>>, vector<8x119xf32>
    %39 = arith.addf %38, %37 : vector<8x119xf32>
    %c0_25 = arith.constant 0 : index
    %c9_26 = arith.constant 9 : index
    %40 = vector.load %arg11[%c0_25, %c9_26] : memref<8x128xf32, #tpu.memory_space<vmem>>, vector<8x119xf32>
    tpu.vector_store %arg11[%c0_25, %c9_26], %39 {strides = array<i32>} : memref<8x128xf32, #tpu.memory_space<vmem>>, vector<8x119xf32>,
    %cst_27 = arith.constant 0.000000e+00 : f32
    %41 = vector.broadcast %cst_27 : f32 to vector<8x120xf32>
    %c0_28 = arith.constant 0 : index
    %c1 = arith.constant 1 : index
    %42 = vector.load %arg4[%c0_28, %c1] : memref<8x27xf32, #tpu.memory_space<vmem>>, vector<8x1xf32>
    %43 = vector.broadcast %4 : f32 to vector<8x1xf32>
    %44 = arith.mulf %42, %43 : vector<8x1xf32>
    %c0_29 = arith.constant 0 : index
    %c0_30 = arith.constant 0 : index
    %c0_31 = arith.constant 0 : index
    %45 = vector.load %arg1[%c0_29, %c0_30, %c0_31] : memref<1x8x128xf32, #tpu.memory_space<vmem>>, vector<1x8x120xf32>
    %46 = vector.shape_cast %45 : vector<1x8x120xf32> to vector<8x120xf32>
    %47 = vector.broadcast %44 : vector<8x1xf32> to vector<8x120xf32>
    %48 = arith.mulf %46, %47 : vector<8x120xf32>
    %49 = arith.addf %41, %48 : vector<8x120xf32>
    %c0_32 = arith.constant 0 : index
    %c10 = arith.constant 10 : index
    %50 = vector.load %arg4[%c0_32, %c10] : memref<8x27xf32, #tpu.memory_space<vmem>>, vector<8x1xf32>
    %c0_33 = arith.constant 0 : index
    %c0_34 = arith.constant 0 : index
    %c0_35 = arith.constant 0 : index
    %51 = vector.load %arg2[%c0_33, %c0_34, %c0_35] : memref<1x8x128xf32, #tpu.memory_space<vmem>>, vector<1x8x120xf32>
    %52 = vector.shape_cast %51 : vector<1x8x120xf32> to vector<8x120xf32>
    %53 = vector.broadcast %50 : vector<8x1xf32> to vector<8x120xf32>
    %54 = arith.mulf %52, %53 : vector<8x120xf32>
    %55 = arith.addf %49, %54 : vector<8x120xf32>
    %c0_36 = arith.constant 0 : index
    %c19 = arith.constant 19 : index
    %56 = vector.load %arg4[%c0_36, %c19] : memref<8x27xf32, #tpu.memory_space<vmem>>, vector<8x1xf32>
    %57 = vector.broadcast %9 : f32 to vector<8x1xf32>
    %58 = arith.mulf %56, %57 : vector<8x1xf32>
    %c0_37 = arith.constant 0 : index
    %c0_38 = arith.constant 0 : index
    %c0_39 = arith.constant 0 : index
    %59 = vector.load %arg3[%c0_37, %c0_38, %c0_39] : memref<1x8x128xf32, #tpu.memory_space<vmem>>, vector<1x8x120xf32>
    %60 = vector.shape_cast %59 : vector<1x8x120xf32> to vector<8x120xf32>
    %61 = vector.broadcast %58 : vector<8x1xf32> to vector<8x120xf32>
    %62 = arith.mulf %60, %61 : vector<8x120xf32>
    %63 = arith.addf %55, %62 : vector<8x120xf32>
    %c1_40 = arith.constant 1 : index
    %c8 = arith.constant 8 : index
    %64 = vector.load %arg9[%c1_40, %c8] : memref<9x128xf32, #tpu.memory_space<vmem>>, vector<1x120xf32>
    %65 = vector.broadcast %64 : vector<1x120xf32> to vector<8x120xf32>
    %66 = arith.mulf %63, %65 : vector<8x120xf32>
    %c0_41 = arith.constant 0 : index
    %c8_42 = arith.constant 8 : index
    %67 = vector.load %arg11[%c0_41, %c8_42] : memref<8x128xf32, #tpu.memory_space<vmem>>, vector<8x120xf32>
    %68 = arith.addf %67, %66 : vector<8x120xf32>
    %c0_43 = arith.constant 0 : index
    %c8_44 = arith.constant 8 : index
    %69 = vector.load %arg11[%c0_43, %c8_44] : memref<8x128xf32, #tpu.memory_space<vmem>>, vector<8x120xf32>
    tpu.vector_store %arg11[%c0_43, %c8_44], %68 {strides = array<i32>} : memref<8x128xf32, #tpu.memory_space<vmem>>, vector<8x120xf32>,
    %cst_45 = arith.constant 0.000000e+00 : f32
    %70 = vector.broadcast %cst_45 : f32 to vector<8x121xf32>
    %c0_46 = arith.constant 0 : index
    %c2 = arith.constant 2 : index
    %71 = vector.load %arg4[%c0_46, %c2] : memref<8x27xf32, #tpu.memory_space<vmem>>, vector<8x1xf32>
    %72 = vector.broadcast %4 : f32 to vector<8x1xf32>
    %73 = arith.mulf %71, %72 : vector<8x1xf32>
    %c0_47 = arith.constant 0 : index
    %c0_48 = arith.constant 0 : index
    %c0_49 = arith.constant 0 : index
    %74 = vector.load %arg1[%c0_47, %c0_48, %c0_49] : memref<1x8x128xf32, #tpu.memory_space<vmem>>, vector<1x8x121xf32>
    %75 = vector.shape_cast %74 : vector<1x8x121xf32> to vector<8x121xf32>
    %76 = vector.broadcast %73 : vector<8x1xf32> to vector<8x121xf32>
    %77 = arith.mulf %75, %76 : vector<8x121xf32>
    %78 = arith.addf %70, %77 : vector<8x121xf32>
    %c0_50 = arith.constant 0 : index
    %c11 = arith.constant 11 : index
    %79 = vector.load %arg4[%c0_50, %c11] : memref<8x27xf32, #tpu.memory_space<vmem>>, vector<8x1xf32>
    %c0_51 = arith.constant 0 : index
    %c0_52 = arith.constant 0 : index
    %c0_53 = arith.constant 0 : index
    %80 = vector.load %arg2[%c0_51, %c0_52, %c0_53] : memref<1x8x128xf32, #tpu.memory_space<vmem>>, vector<1x8x121xf32>
    %81 = vector.shape_cast %80 : vector<1x8x121xf32> to vector<8x121xf32>
    %82 = vector.broadcast %79 : vector<8x1xf32> to vector<8x121xf32>
    %83 = arith.mulf %81, %82 : vector<8x121xf32>
    %84 = arith.addf %78, %83 : vector<8x121xf32>
    %c0_54 = arith.constant 0 : index
    %c20 = arith.constant 20 : index
    %85 = vector.load %arg4[%c0_54, %c20] : memref<8x27xf32, #tpu.memory_space<vmem>>, vector<8x1xf32>
    %86 = vector.broadcast %9 : f32 to vector<8x1xf32>
    %87 = arith.mulf %85, %86 : vector<8x1xf32>
    %c0_55 = arith.constant 0 : index
    %c0_56 = arith.constant 0 : index
    %c0_57 = arith.constant 0 : index
    %88 = vector.load %arg3[%c0_55, %c0_56, %c0_57] : memref<1x8x128xf32, #tpu.memory_space<vmem>>, vector<1x8x121xf32>
    %89 = vector.shape_cast %88 : vector<1x8x121xf32> to vector<8x121xf32>
    %90 = vector.broadcast %87 : vector<8x1xf32> to vector<8x121xf32>
    %91 = arith.mulf %89, %90 : vector<8x121xf32>
    %92 = arith.addf %84, %91 : vector<8x121xf32>
    %c2_58 = arith.constant 2 : index
    %c7 = arith.constant 7 : index
    %93 = vector.load %arg9[%c2_58, %c7] : memref<9x128xf32, #tpu.memory_space<vmem>>, vector<1x121xf32>
    %94 = vector.broadcast %93 : vector<1x121xf32> to vector<8x121xf32>
    %95 = arith.mulf %92, %94 : vector<8x121xf32>
    %c0_59 = arith.constant 0 : index
    %c7_60 = arith.constant 7 : index
    %96 = vector.load %arg11[%c0_59, %c7_60] : memref<8x128xf32, #tpu.memory_space<vmem>>, vector<8x121xf32>
    %97 = arith.addf %96, %95 : vector<8x121xf32>
    %c0_61 = arith.constant 0 : index
    %c7_62 = arith.constant 7 : index
    %98 = vector.load %arg11[%c0_61, %c7_62] : memref<8x128xf32, #tpu.memory_space<vmem>>, vector<8x121xf32>
    tpu.vector_store %arg11[%c0_61, %c7_62], %97 {strides = array<i32>} : memref<8x128xf32, #tpu.memory_space<vmem>>, vector<8x121xf32>,
    %cst_63 = arith.constant 0.000000e+00 : f32
    %99 = vector.broadcast %cst_63 : f32 to vector<8x127xf32>
    %c0_64 = arith.constant 0 : index
    %c3 = arith.constant 3 : index
    %100 = vector.load %arg4[%c0_64, %c3] : memref<8x27xf32, #tpu.memory_space<vmem>>, vector<8x1xf32>
    %101 = vector.broadcast %4 : f32 to vector<8x1xf32>
    %102 = arith.mulf %100, %101 : vector<8x1xf32>
    %c0_65 = arith.constant 0 : index
    %c0_66 = arith.constant 0 : index
    %c0_67 = arith.constant 0 : index
    %103 = vector.load %arg1[%c0_65, %c0_66, %c0_67] : memref<1x8x128xf32, #tpu.memory_space<vmem>>, vector<1x8x127xf32>
    %104 = vector.shape_cast %103 : vector<1x8x127xf32> to vector<8x127xf32>
    %105 = vector.broadcast %102 : vector<8x1xf32> to vector<8x127xf32>
    %106 = arith.mulf %104, %105 : vector<8x127xf32>
    %107 = arith.addf %99, %106 : vector<8x127xf32>
    %c0_68 = arith.constant 0 : index
    %c12 = arith.constant 12 : index
    %108 = vector.load %arg4[%c0_68, %c12] : memref<8x27xf32, #tpu.memory_space<vmem>>, vector<8x1xf32>
    %c0_69 = arith.constant 0 : index
    %c0_70 = arith.constant 0 : index
    %c0_71 = arith.constant 0 : index
    %109 = vector.load %arg2[%c0_69, %c0_70, %c0_71] : memref<1x8x128xf32, #tpu.memory_space<vmem>>, vector<1x8x127xf32>
    %110 = vector.shape_cast %109 : vector<1x8x127xf32> to vector<8x127xf32>
    %111 = vector.broadcast %108 : vector<8x1xf32> to vector<8x127xf32>
    %112 = arith.mulf %110, %111 : vector<8x127xf32>
    %113 = arith.addf %107, %112 : vector<8x127xf32>
    %c0_72 = arith.constant 0 : index
    %c21 = arith.constant 21 : index
    %114 = vector.load %arg4[%c0_72, %c21] : memref<8x27xf32, #tpu.memory_space<vmem>>, vector<8x1xf32>
    %115 = vector.broadcast %9 : f32 to vector<8x1xf32>
    %116 = arith.mulf %114, %115 : vector<8x1xf32>
    %c0_73 = arith.constant 0 : index
    %c0_74 = arith.constant 0 : index
    %c0_75 = arith.constant 0 : index
    %117 = vector.load %arg3[%c0_73, %c0_74, %c0_75] : memref<1x8x128xf32, #tpu.memory_space<vmem>>, vector<1x8x127xf32>
    %118 = vector.shape_cast %117 : vector<1x8x127xf32> to vector<8x127xf32>
    %119 = vector.broadcast %116 : vector<8x1xf32> to vector<8x127xf32>
    %120 = arith.mulf %118, %119 : vector<8x127xf32>
    %121 = arith.addf %113, %120 : vector<8x127xf32>
    %c3_76 = arith.constant 3 : index
    %c1_77 = arith.constant 1 : index
    %122 = vector.load %arg9[%c3_76, %c1_77] : memref<9x128xf32, #tpu.memory_space<vmem>>, vector<1x127xf32>
    %123 = vector.broadcast %122 : vector<1x127xf32> to vector<8x127xf32>
    %124 = arith.mulf %121, %123 : vector<8x127xf32>
    %c0_78 = arith.constant 0 : index
    %c1_79 = arith.constant 1 : index
    %125 = vector.load %arg11[%c0_78, %c1_79] : memref<8x128xf32, #tpu.memory_space<vmem>>, vector<8x127xf32>
    %126 = arith.addf %125, %124 : vector<8x127xf32>
    %c0_80 = arith.constant 0 : index
    %c1_81 = arith.constant 1 : index
    %127 = vector.load %arg11[%c0_80, %c1_81] : memref<8x128xf32, #tpu.memory_space<vmem>>, vector<8x127xf32>
    tpu.vector_store %arg11[%c0_80, %c1_81], %126 {strides = array<i32>} : memref<8x128xf32, #tpu.memory_space<vmem>>, vector<8x127xf32>,
    %cst_82 = arith.constant 0.000000e+00 : f32
    %128 = vector.broadcast %cst_82 : f32 to vector<8x128xf32>
    %c0_83 = arith.constant 0 : index
    %c4 = arith.constant 4 : index
    %129 = vector.load %arg4[%c0_83, %c4] : memref<8x27xf32, #tpu.memory_space<vmem>>, vector<8x1xf32>
    %130 = vector.broadcast %4 : f32 to vector<8x1xf32>
    %131 = arith.mulf %129, %130 : vector<8x1xf32>
    %c0_84 = arith.constant 0 : index
    %c0_85 = arith.constant 0 : index
    %c0_86 = arith.constant 0 : index
    %132 = vector.load %arg1[%c0_84, %c0_85, %c0_86] : memref<1x8x128xf32, #tpu.memory_space<vmem>>, vector<1x8x128xf32>
    %133 = vector.shape_cast %132 : vector<1x8x128xf32> to vector<8x128xf32>
    %134 = vector.broadcast %131 : vector<8x1xf32> to vector<8x128xf32>
    %135 = arith.mulf %133, %134 : vector<8x128xf32>
    %136 = arith.addf %128, %135 : vector<8x128xf32>
    %c0_87 = arith.constant 0 : index
    %c13 = arith.constant 13 : index
    %137 = vector.load %arg4[%c0_87, %c13] : memref<8x27xf32, #tpu.memory_space<vmem>>, vector<8x1xf32>
    %c0_88 = arith.constant 0 : index
    %c0_89 = arith.constant 0 : index
    %c0_90 = arith.constant 0 : index
    %138 = vector.load %arg2[%c0_88, %c0_89, %c0_90] : memref<1x8x128xf32, #tpu.memory_space<vmem>>, vector<1x8x128xf32>
    %139 = vector.shape_cast %138 : vector<1x8x128xf32> to vector<8x128xf32>
    %140 = vector.broadcast %137 : vector<8x1xf32> to vector<8x128xf32>
    %141 = arith.mulf %139, %140 : vector<8x128xf32>
    %142 = arith.addf %136, %141 : vector<8x128xf32>
    %c0_91 = arith.constant 0 : index
    %c22 = arith.constant 22 : index
    %143 = vector.load %arg4[%c0_91, %c22] : memref<8x27xf32, #tpu.memory_space<vmem>>, vector<8x1xf32>
    %144 = vector.broadcast %9 : f32 to vector<8x1xf32>
    %145 = arith.mulf %143, %144 : vector<8x1xf32>
    %c0_92 = arith.constant 0 : index
    %c0_93 = arith.constant 0 : index
    %c0_94 = arith.constant 0 : index
    %146 = vector.load %arg3[%c0_92, %c0_93, %c0_94] : memref<1x8x128xf32, #tpu.memory_space<vmem>>, vector<1x8x128xf32>
    %147 = vector.shape_cast %146 : vector<1x8x128xf32> to vector<8x128xf32>
    %148 = vector.broadcast %145 : vector<8x1xf32> to vector<8x128xf32>
    %149 = arith.mulf %147, %148 : vector<8x128xf32>
    %150 = arith.addf %142, %149 : vector<8x128xf32>
    %c0_95 = arith.constant 0 : index
    %c0_96 = arith.constant 0 : index
    %151 = vector.load %arg11[%c0_95, %c0_96] : memref<8x128xf32, #tpu.memory_space<vmem>>, vector<8x128xf32>
    %152 = arith.addf %151, %150 : vector<8x128xf32>
    %c0_97 = arith.constant 0 : index
    %c0_98 = arith.constant 0 : index
    %153 = vector.load %arg11[%c0_97, %c0_98] : memref<8x128xf32, #tpu.memory_space<vmem>>, vector<8x128xf32>
    tpu.vector_store %arg11[%c0_97, %c0_98], %152 {strides = array<i32>} : memref<8x128xf32, #tpu.memory_space<vmem>>, vector<8x128xf32>,
    %cst_99 = arith.constant 0.000000e+00 : f32
    %154 = vector.broadcast %cst_99 : f32 to vector<8x127xf32>
    %c0_100 = arith.constant 0 : index
    %c5 = arith.constant 5 : index
    %155 = vector.load %arg4[%c0_100, %c5] : memref<8x27xf32, #tpu.memory_space<vmem>>, vector<8x1xf32>
    %156 = vector.broadcast %4 : f32 to vector<8x1xf32>
    %157 = arith.mulf %155, %156 : vector<8x1xf32>
    %c0_101 = arith.constant 0 : index
    %c0_102 = arith.constant 0 : index
    %c1_103 = arith.constant 1 : index
    %158 = vector.load %arg1[%c0_101, %c0_102, %c1_103] : memref<1x8x128xf32, #tpu.memory_space<vmem>>, vector<1x8x127xf32>
    %159 = vector.shape_cast %158 : vector<1x8x127xf32> to vector<8x127xf32>
    %160 = vector.broadcast %157 : vector<8x1xf32> to vector<8x127xf32>
    %161 = arith.mulf %159, %160 : vector<8x127xf32>
    %162 = arith.addf %154, %161 : vector<8x127xf32>
    %c0_104 = arith.constant 0 : index
    %c14 = arith.constant 14 : index
    %163 = vector.load %arg4[%c0_104, %c14] : memref<8x27xf32, #tpu.memory_space<vmem>>, vector<8x1xf32>
    %c0_105 = arith.constant 0 : index
    %c0_106 = arith.constant 0 : index
    %c1_107 = arith.constant 1 : index
    %164 = vector.load %arg2[%c0_105, %c0_106, %c1_107] : memref<1x8x128xf32, #tpu.memory_space<vmem>>, vector<1x8x127xf32>
    %165 = vector.shape_cast %164 : vector<1x8x127xf32> to vector<8x127xf32>
    %166 = vector.broadcast %163 : vector<8x1xf32> to vector<8x127xf32>
    %167 = arith.mulf %165, %166 : vector<8x127xf32>
    %168 = arith.addf %162, %167 : vector<8x127xf32>
    %c0_108 = arith.constant 0 : index
    %c23 = arith.constant 23 : index
    %169 = vector.load %arg4[%c0_108, %c23] : memref<8x27xf32, #tpu.memory_space<vmem>>, vector<8x1xf32>
    %170 = vector.broadcast %9 : f32 to vector<8x1xf32>
    %171 = arith.mulf %169, %170 : vector<8x1xf32>
    %c0_109 = arith.constant 0 : index
    %c0_110 = arith.constant 0 : index
    %c1_111 = arith.constant 1 : index
    %172 = vector.load %arg3[%c0_109, %c0_110, %c1_111] : memref<1x8x128xf32, #tpu.memory_space<vmem>>, vector<1x8x127xf32>
    %173 = vector.shape_cast %172 : vector<1x8x127xf32> to vector<8x127xf32>
    %174 = vector.broadcast %171 : vector<8x1xf32> to vector<8x127xf32>
    %175 = arith.mulf %173, %174 : vector<8x127xf32>
    %176 = arith.addf %168, %175 : vector<8x127xf32>
    %c5_112 = arith.constant 5 : index
    %c0_113 = arith.constant 0 : index
    %177 = vector.load %arg9[%c5_112, %c0_113] : memref<9x128xf32, #tpu.memory_space<vmem>>, vector<1x127xf32>
    %178 = vector.broadcast %177 : vector<1x127xf32> to vector<8x127xf32>
    %179 = arith.mulf %176, %178 : vector<8x127xf32>
    %c0_114 = arith.constant 0 : index
    %c0_115 = arith.constant 0 : index
    %180 = vector.load %arg11[%c0_114, %c0_115] : memref<8x128xf32, #tpu.memory_space<vmem>>, vector<8x127xf32>
    %181 = arith.addf %180, %179 : vector<8x127xf32>
    %c0_116 = arith.constant 0 : index
    %c0_117 = arith.constant 0 : index
    %182 = vector.load %arg11[%c0_116, %c0_117] : memref<8x128xf32, #tpu.memory_space<vmem>>, vector<8x127xf32>
    tpu.vector_store %arg11[%c0_116, %c0_117], %181 {strides = array<i32>} : memref<8x128xf32, #tpu.memory_space<vmem>>, vector<8x127xf32>,
    %cst_118 = arith.constant 0.000000e+00 : f32
    %183 = vector.broadcast %cst_118 : f32 to vector<8x121xf32>
    %c0_119 = arith.constant 0 : index
    %c6 = arith.constant 6 : index
    %184 = vector.load %arg4[%c0_119, %c6] : memref<8x27xf32, #tpu.memory_space<vmem>>, vector<8x1xf32>
    %185 = vector.broadcast %4 : f32 to vector<8x1xf32>
    %186 = arith.mulf %184, %185 : vector<8x1xf32>
    %c0_120 = arith.constant 0 : index
    %c0_121 = arith.constant 0 : index
    %c7_122 = arith.constant 7 : index
    %187 = vector.load %arg1[%c0_120, %c0_121, %c7_122] : memref<1x8x128xf32, #tpu.memory_space<vmem>>, vector<1x8x121xf32>
    %188 = vector.shape_cast %187 : vector<1x8x121xf32> to vector<8x121xf32>
    %189 = vector.broadcast %186 : vector<8x1xf32> to vector<8x121xf32>
    %190 = arith.mulf %188, %189 : vector<8x121xf32>
    %191 = arith.addf %183, %190 : vector<8x121xf32>
    %c0_123 = arith.constant 0 : index
    %c15 = arith.constant 15 : index
    %192 = vector.load %arg4[%c0_123, %c15] : memref<8x27xf32, #tpu.memory_space<vmem>>, vector<8x1xf32>
    %c0_124 = arith.constant 0 : index
    %c0_125 = arith.constant 0 : index
    %c7_126 = arith.constant 7 : index
    %193 = vector.load %arg2[%c0_124, %c0_125, %c7_126] : memref<1x8x128xf32, #tpu.memory_space<vmem>>, vector<1x8x121xf32>
    %194 = vector.shape_cast %193 : vector<1x8x121xf32> to vector<8x121xf32>
    %195 = vector.broadcast %192 : vector<8x1xf32> to vector<8x121xf32>
    %196 = arith.mulf %194, %195 : vector<8x121xf32>
    %197 = arith.addf %191, %196 : vector<8x121xf32>
    %c0_127 = arith.constant 0 : index
    %c24 = arith.constant 24 : index
    %198 = vector.load %arg4[%c0_127, %c24] : memref<8x27xf32, #tpu.memory_space<vmem>>, vector<8x1xf32>
    %199 = vector.broadcast %9 : f32 to vector<8x1xf32>
    %200 = arith.mulf %198, %199 : vector<8x1xf32>
    %c0_128 = arith.constant 0 : index
    %c0_129 = arith.constant 0 : index
    %c7_130 = arith.constant 7 : index
    %201 = vector.load %arg3[%c0_128, %c0_129, %c7_130] : memref<1x8x128xf32, #tpu.memory_space<vmem>>, vector<1x8x121xf32>
    %202 = vector.shape_cast %201 : vector<1x8x121xf32> to vector<8x121xf32>
    %203 = vector.broadcast %200 : vector<8x1xf32> to vector<8x121xf32>
    %204 = arith.mulf %202, %203 : vector<8x121xf32>
    %205 = arith.addf %197, %204 : vector<8x121xf32>
    %c6_131 = arith.constant 6 : index
    %c0_132 = arith.constant 0 : index
    %206 = vector.load %arg9[%c6_131, %c0_132] : memref<9x128xf32, #tpu.memory_space<vmem>>, vector<1x121xf32>
    %207 = vector.broadcast %206 : vector<1x121xf32> to vector<8x121xf32>
    %208 = arith.mulf %205, %207 : vector<8x121xf32>
    %c0_133 = arith.constant 0 : index
    %c0_134 = arith.constant 0 : index
    %209 = vector.load %arg11[%c0_133, %c0_134] : memref<8x128xf32, #tpu.memory_space<vmem>>, vector<8x121xf32>
    %210 = arith.addf %209, %208 : vector<8x121xf32>
    %c0_135 = arith.constant 0 : index
    %c0_136 = arith.constant 0 : index
    %211 = vector.load %arg11[%c0_135, %c0_136] : memref<8x128xf32, #tpu.memory_space<vmem>>, vector<8x121xf32>
    tpu.vector_store %arg11[%c0_135, %c0_136], %210 {strides = array<i32>} : memref<8x128xf32, #tpu.memory_space<vmem>>, vector<8x121xf32>,
    %cst_137 = arith.constant 0.000000e+00 : f32
    %212 = vector.broadcast %cst_137 : f32 to vector<8x120xf32>
    %c0_138 = arith.constant 0 : index
    %c7_139 = arith.constant 7 : index
    %213 = vector.load %arg4[%c0_138, %c7_139] : memref<8x27xf32, #tpu.memory_space<vmem>>, vector<8x1xf32>
    %214 = vector.broadcast %4 : f32 to vector<8x1xf32>
    %215 = arith.mulf %213, %214 : vector<8x1xf32>
    %c0_140 = arith.constant 0 : index
    %c0_141 = arith.constant 0 : index
    %c8_142 = arith.constant 8 : index
    %216 = vector.load %arg1[%c0_140, %c0_141, %c8_142] : memref<1x8x128xf32, #tpu.memory_space<vmem>>, vector<1x8x120xf32>
    %217 = vector.shape_cast %216 : vector<1x8x120xf32> to vector<8x120xf32>
    %218 = vector.broadcast %215 : vector<8x1xf32> to vector<8x120xf32>
    %219 = arith.mulf %217, %218 : vector<8x120xf32>
    %220 = arith.addf %212, %219 : vector<8x120xf32>
    %c0_143 = arith.constant 0 : index
    %c16 = arith.constant 16 : index
    %221 = vector.load %arg4[%c0_143, %c16] : memref<8x27xf32, #tpu.memory_space<vmem>>, vector<8x1xf32>
    %c0_144 = arith.constant 0 : index
    %c0_145 = arith.constant 0 : index
    %c8_146 = arith.constant 8 : index
    %222 = vector.load %arg2[%c0_144, %c0_145, %c8_146] : memref<1x8x128xf32, #tpu.memory_space<vmem>>, vector<1x8x120xf32>
    %223 = vector.shape_cast %222 : vector<1x8x120xf32> to vector<8x120xf32>
    %224 = vector.broadcast %221 : vector<8x1xf32> to vector<8x120xf32>
    %225 = arith.mulf %223, %224 : vector<8x120xf32>
    %226 = arith.addf %220, %225 : vector<8x120xf32>
    %c0_147 = arith.constant 0 : index
    %c25 = arith.constant 25 : index
    %227 = vector.load %arg4[%c0_147, %c25] : memref<8x27xf32, #tpu.memory_space<vmem>>, vector<8x1xf32>
    %228 = vector.broadcast %9 : f32 to vector<8x1xf32>
    %229 = arith.mulf %227, %228 : vector<8x1xf32>
    %c0_148 = arith.constant 0 : index
    %c0_149 = arith.constant 0 : index
    %c8_150 = arith.constant 8 : index
    %230 = vector.load %arg3[%c0_148, %c0_149, %c8_150] : memref<1x8x128xf32, #tpu.memory_space<vmem>>, vector<1x8x120xf32>
    %231 = vector.shape_cast %230 : vector<1x8x120xf32> to vector<8x120xf32>
    %232 = vector.broadcast %229 : vector<8x1xf32> to vector<8x120xf32>
    %233 = arith.mulf %231, %232 : vector<8x120xf32>
    %234 = arith.addf %226, %233 : vector<8x120xf32>
    %c7_151 = arith.constant 7 : index
    %c0_152 = arith.constant 0 : index
    %235 = vector.load %arg9[%c7_151, %c0_152] : memref<9x128xf32, #tpu.memory_space<vmem>>, vector<1x120xf32>
    %236 = vector.broadcast %235 : vector<1x120xf32> to vector<8x120xf32>
    %237 = arith.mulf %234, %236 : vector<8x120xf32>
    %c0_153 = arith.constant 0 : index
    %c0_154 = arith.constant 0 : index
    %238 = vector.load %arg11[%c0_153, %c0_154] : memref<8x128xf32, #tpu.memory_space<vmem>>, vector<8x120xf32>
    %239 = arith.addf %238, %237 : vector<8x120xf32>
    %c0_155 = arith.constant 0 : index
    %c0_156 = arith.constant 0 : index
    %240 = vector.load %arg11[%c0_155, %c0_156] : memref<8x128xf32, #tpu.memory_space<vmem>>, vector<8x120xf32>
    tpu.vector_store %arg11[%c0_155, %c0_156], %239 {strides = array<i32>} : memref<8x128xf32, #tpu.memory_space<vmem>>, vector<8x120xf32>,
    %cst_157 = arith.constant 0.000000e+00 : f32
    %241 = vector.broadcast %cst_157 : f32 to vector<8x119xf32>
    %c0_158 = arith.constant 0 : index
    %c8_159 = arith.constant 8 : index
    %242 = vector.load %arg4[%c0_158, %c8_159] : memref<8x27xf32, #tpu.memory_space<vmem>>, vector<8x1xf32>
    %243 = vector.broadcast %4 : f32 to vector<8x1xf32>
    %244 = arith.mulf %242, %243 : vector<8x1xf32>
    %c0_160 = arith.constant 0 : index
    %c0_161 = arith.constant 0 : index
    %c9_162 = arith.constant 9 : index
    %245 = vector.load %arg1[%c0_160, %c0_161, %c9_162] : memref<1x8x128xf32, #tpu.memory_space<vmem>>, vector<1x8x119xf32>
    %246 = vector.shape_cast %245 : vector<1x8x119xf32> to vector<8x119xf32>
    %247 = vector.broadcast %244 : vector<8x1xf32> to vector<8x119xf32>
    %248 = arith.mulf %246, %247 : vector<8x119xf32>
    %249 = arith.addf %241, %248 : vector<8x119xf32>
    %c0_163 = arith.constant 0 : index
    %c17 = arith.constant 17 : index
    %250 = vector.load %arg4[%c0_163, %c17] : memref<8x27xf32, #tpu.memory_space<vmem>>, vector<8x1xf32>
    %c0_164 = arith.constant 0 : index
    %c0_165 = arith.constant 0 : index
    %c9_166 = arith.constant 9 : index
    %251 = vector.load %arg2[%c0_164, %c0_165, %c9_166] : memref<1x8x128xf32, #tpu.memory_space<vmem>>, vector<1x8x119xf32>
    %252 = vector.shape_cast %251 : vector<1x8x119xf32> to vector<8x119xf32>
    %253 = vector.broadcast %250 : vector<8x1xf32> to vector<8x119xf32>
    %254 = arith.mulf %252, %253 : vector<8x119xf32>
    %255 = arith.addf %249, %254 : vector<8x119xf32>
    %c0_167 = arith.constant 0 : index
    %c26 = arith.constant 26 : index
    %256 = vector.load %arg4[%c0_167, %c26] : memref<8x27xf32, #tpu.memory_space<vmem>>, vector<8x1xf32>
    %257 = vector.broadcast %9 : f32 to vector<8x1xf32>
    %258 = arith.mulf %256, %257 : vector<8x1xf32>
    %c0_168 = arith.constant 0 : index
    %c0_169 = arith.constant 0 : index
    %c9_170 = arith.constant 9 : index
    %259 = vector.load %arg3[%c0_168, %c0_169, %c9_170] : memref<1x8x128xf32, #tpu.memory_space<vmem>>, vector<1x8x119xf32>
    %260 = vector.shape_cast %259 : vector<1x8x119xf32> to vector<8x119xf32>
    %261 = vector.broadcast %258 : vector<8x1xf32> to vector<8x119xf32>
    %262 = arith.mulf %260, %261 : vector<8x119xf32>
    %263 = arith.addf %255, %262 : vector<8x119xf32>
    %c8_171 = arith.constant 8 : index
    %c0_172 = arith.constant 0 : index
    %264 = vector.load %arg9[%c8_171, %c0_172] : memref<9x128xf32, #tpu.memory_space<vmem>>, vector<1x119xf32>
    %265 = vector.broadcast %264 : vector<1x119xf32> to vector<8x119xf32>
    %266 = arith.mulf %263, %265 : vector<8x119xf32>
    %c0_173 = arith.constant 0 : index
    %c0_174 = arith.constant 0 : index
    %267 = vector.load %arg11[%c0_173, %c0_174] : memref<8x128xf32, #tpu.memory_space<vmem>>, vector<8x119xf32>
    %268 = arith.addf %267, %266 : vector<8x119xf32>
    %c0_175 = arith.constant 0 : index
    %c0_176 = arith.constant 0 : index
    %269 = vector.load %arg11[%c0_175, %c0_176] : memref<8x128xf32, #tpu.memory_space<vmem>>, vector<8x119xf32>
    tpu.vector_store %arg11[%c0_175, %c0_176], %268 {strides = array<i32>} : memref<8x128xf32, #tpu.memory_space<vmem>>, vector<8x119xf32>,
    %c0_177 = arith.constant 0 : index
    %c0_178 = arith.constant 0 : index
    %270 = vector.load %arg11[%c0_177, %c0_178] : memref<8x128xf32, #tpu.memory_space<vmem>>, vector<8x128xf32>
    %c0_179 = arith.constant 0 : index
    %c0_180 = arith.constant 0 : index
    %271 = vector.load %arg5[%c0_179, %c0_180] : memref<8x1xf32, #tpu.memory_space<vmem>>, vector<8x1xf32>
    %272 = vector.broadcast %271 : vector<8x1xf32> to vector<8x128xf32>
    %273 = arith.mulf %270, %272 : vector<8x128xf32>
    %c0_181 = arith.constant 0 : index
    %c0_182 = arith.constant 0 : index
    %274 = vector.load %arg6[%c0_181, %c0_182] : memref<8x1xf32, #tpu.memory_space<vmem>>, vector<8x1xf32>
    %275 = vector.broadcast %274 : vector<8x1xf32> to vector<8x128xf32>
    %276 = arith.addf %273, %275 : vector<8x128xf32>
    %cst_183 = arith.constant 0.000000e+00 : f32
    %277 = vector.broadcast %cst_183 : f32 to vector<8x128xf32>
    %278 = arith.maximumf %276, %277 : vector<8x128xf32>
    %c0_184 = arith.constant 0 : index
    %c0_185 = arith.constant 0 : index
    %279 = vector.load %arg11[%c0_184, %c0_185] : memref<8x128xf32, #tpu.memory_space<vmem>>, vector<8x128xf32>
    tpu.vector_store %arg11[%c0_184, %c0_185], %278 {strides = array<i32>} : memref<8x128xf32, #tpu.memory_space<vmem>>, vector<8x128xf32>,
    %c0_186 = arith.constant 0 : index
    %c0_187 = arith.constant 0 : index
    %c0_188 = arith.constant 0 : index
    %280 = vector.load %arg2[%c0_186, %c0_187, %c0_188] : memref<1x8x128xf32, #tpu.memory_space<vmem>>, vector<1x8x128xf32>
    %281 = vector.shape_cast %280 : vector<1x8x128xf32> to vector<8x128xf32>
    %c0_189 = arith.constant 0 : index
    %c0_190 = arith.constant 0 : index
    %282 = vector.load %arg8[%c0_189, %c0_190] : memref<8x1xf32, #tpu.memory_space<vmem>>, vector<8x1xf32>
    %283 = vector.broadcast %282 : vector<8x1xf32> to vector<8x128xf32>
    %284 = arith.addf %281, %283 : vector<8x128xf32>
    %c0_191 = arith.constant 0 : index
    %c0_192 = arith.constant 0 : index
    %285 = vector.load %arg7[%c0_191, %c0_192] : memref<8x8xf32, #tpu.memory_space<vmem>>, vector<8x1xf32>
    %c0_193 = arith.constant 0 : index
    %c0_194 = arith.constant 0 : index
    %286 = vector.load %arg11[%c0_193, %c0_194] : memref<8x128xf32, #tpu.memory_space<vmem>>, vector<1x128xf32>
    %287 = vector.broadcast %285 : vector<8x1xf32> to vector<8x128xf32>
    %288 = vector.broadcast %286 : vector<1x128xf32> to vector<8x128xf32>
    %289 = arith.mulf %287, %288 : vector<8x128xf32>
    %290 = arith.addf %284, %289 : vector<8x128xf32>
    %c0_195 = arith.constant 0 : index
    %c1_196 = arith.constant 1 : index
    %291 = vector.load %arg7[%c0_195, %c1_196] : memref<8x8xf32, #tpu.memory_space<vmem>>, vector<8x1xf32>
    %c1_197 = arith.constant 1 : index
    %c0_198 = arith.constant 0 : index
    %292 = vector.load %arg11[%c1_197, %c0_198] : memref<8x128xf32, #tpu.memory_space<vmem>>, vector<1x128xf32>
    %293 = vector.broadcast %291 : vector<8x1xf32> to vector<8x128xf32>
    %294 = vector.broadcast %292 : vector<1x128xf32> to vector<8x128xf32>
    %295 = arith.mulf %293, %294 : vector<8x128xf32>
    %296 = arith.addf %290, %295 : vector<8x128xf32>
    %c0_199 = arith.constant 0 : index
    %c2_200 = arith.constant 2 : index
    %297 = vector.load %arg7[%c0_199, %c2_200] : memref<8x8xf32, #tpu.memory_space<vmem>>, vector<8x1xf32>
    %c2_201 = arith.constant 2 : index
    %c0_202 = arith.constant 0 : index
    %298 = vector.load %arg11[%c2_201, %c0_202] : memref<8x128xf32, #tpu.memory_space<vmem>>, vector<1x128xf32>
    %299 = vector.broadcast %297 : vector<8x1xf32> to vector<8x128xf32>
    %300 = vector.broadcast %298 : vector<1x128xf32> to vector<8x128xf32>
    %301 = arith.mulf %299, %300 : vector<8x128xf32>
    %302 = arith.addf %296, %301 : vector<8x128xf32>
    %c0_203 = arith.constant 0 : index
    %c3_204 = arith.constant 3 : index
    %303 = vector.load %arg7[%c0_203, %c3_204] : memref<8x8xf32, #tpu.memory_space<vmem>>, vector<8x1xf32>
    %c3_205 = arith.constant 3 : index
    %c0_206 = arith.constant 0 : index
    %304 = vector.load %arg11[%c3_205, %c0_206] : memref<8x128xf32, #tpu.memory_space<vmem>>, vector<1x128xf32>
    %305 = vector.broadcast %303 : vector<8x1xf32> to vector<8x128xf32>
    %306 = vector.broadcast %304 : vector<1x128xf32> to vector<8x128xf32>
    %307 = arith.mulf %305, %306 : vector<8x128xf32>
    %308 = arith.addf %302, %307 : vector<8x128xf32>
    %c0_207 = arith.constant 0 : index
    %c4_208 = arith.constant 4 : index
    %309 = vector.load %arg7[%c0_207, %c4_208] : memref<8x8xf32, #tpu.memory_space<vmem>>, vector<8x1xf32>
    %c4_209 = arith.constant 4 : index
    %c0_210 = arith.constant 0 : index
    %310 = vector.load %arg11[%c4_209, %c0_210] : memref<8x128xf32, #tpu.memory_space<vmem>>, vector<1x128xf32>
    %311 = vector.broadcast %309 : vector<8x1xf32> to vector<8x128xf32>
    %312 = vector.broadcast %310 : vector<1x128xf32> to vector<8x128xf32>
    %313 = arith.mulf %311, %312 : vector<8x128xf32>
    %314 = arith.addf %308, %313 : vector<8x128xf32>
    %c0_211 = arith.constant 0 : index
    %c5_212 = arith.constant 5 : index
    %315 = vector.load %arg7[%c0_211, %c5_212] : memref<8x8xf32, #tpu.memory_space<vmem>>, vector<8x1xf32>
    %c5_213 = arith.constant 5 : index
    %c0_214 = arith.constant 0 : index
    %316 = vector.load %arg11[%c5_213, %c0_214] : memref<8x128xf32, #tpu.memory_space<vmem>>, vector<1x128xf32>
    %317 = vector.broadcast %315 : vector<8x1xf32> to vector<8x128xf32>
    %318 = vector.broadcast %316 : vector<1x128xf32> to vector<8x128xf32>
    %319 = arith.mulf %317, %318 : vector<8x128xf32>
    %320 = arith.addf %314, %319 : vector<8x128xf32>
    %c0_215 = arith.constant 0 : index
    %c6_216 = arith.constant 6 : index
    %321 = vector.load %arg7[%c0_215, %c6_216] : memref<8x8xf32, #tpu.memory_space<vmem>>, vector<8x1xf32>
    %c6_217 = arith.constant 6 : index
    %c0_218 = arith.constant 0 : index
    %322 = vector.load %arg11[%c6_217, %c0_218] : memref<8x128xf32, #tpu.memory_space<vmem>>, vector<1x128xf32>
    %323 = vector.broadcast %321 : vector<8x1xf32> to vector<8x128xf32>
    %324 = vector.broadcast %322 : vector<1x128xf32> to vector<8x128xf32>
    %325 = arith.mulf %323, %324 : vector<8x128xf32>
    %326 = arith.addf %320, %325 : vector<8x128xf32>
    %c0_219 = arith.constant 0 : index
    %c7_220 = arith.constant 7 : index
    %327 = vector.load %arg7[%c0_219, %c7_220] : memref<8x8xf32, #tpu.memory_space<vmem>>, vector<8x1xf32>
    %c7_221 = arith.constant 7 : index
    %c0_222 = arith.constant 0 : index
    %328 = vector.load %arg11[%c7_221, %c0_222] : memref<8x128xf32, #tpu.memory_space<vmem>>, vector<1x128xf32>
    %329 = vector.broadcast %327 : vector<8x1xf32> to vector<8x128xf32>
    %330 = vector.broadcast %328 : vector<1x128xf32> to vector<8x128xf32>
    %331 = arith.mulf %329, %330 : vector<8x128xf32>
    %332 = arith.addf %326, %331 : vector<8x128xf32>
    %c0_223 = arith.constant 0 : index
    %c0_224 = arith.constant 0 : index
    %c0_225 = arith.constant 0 : index
    %333 = vector.load %arg10[%c0_223, %c0_224, %c0_225] : memref<1x8x128xf32, #tpu.memory_space<vmem>>, vector<1x8x128xf32>
    %334 = vector.shape_cast %333 : vector<1x8x128xf32> to vector<8x128xf32>
    %335 = vector.shape_cast %332 : vector<8x128xf32> to vector<1x8x128xf32>
    tpu.vector_store %arg10[%c0_223, %c0_224, %c0_225], %335 {strides = array<i32>} : memref<1x8x128xf32, #tpu.memory_space<vmem>>, vector<1x8x128xf32>,
    return
  }
  func.func @transform_0(%arg0: i32) -> (i32, i32, i32) {
    %c-1_i32 = arith.constant -1 : i32
    %0 = arith.addi %arg0, %c-1_i32 : i32
    %c0_i32 = arith.constant 0 : i32
    %c7_i32 = arith.constant 7 : i32
    %1 = arith.maxsi %c0_i32, %0 : i32
    %2 = arith.minsi %c7_i32, %1 : i32
    %c0_i32_0 = arith.constant 0 : i32
    %c0_i32_1 = arith.constant 0 : i32
    %c0_i32_2 = arith.constant 0 : i32
    return %2, %c0_i32_0, %c0_i32_1 : i32, i32, i32
  }
  func.func @transform_1(%arg0: i32) -> (i32, i32, i32) {
    %c0_i32 = arith.constant 0 : i32
    %0 = arith.addi %arg0, %c0_i32 : i32
    %c0_i32_0 = arith.constant 0 : i32
    %c7_i32 = arith.constant 7 : i32
    %1 = arith.maxsi %c0_i32_0, %0 : i32
    %2 = arith.minsi %c7_i32, %1 : i32
    %c0_i32_1 = arith.constant 0 : i32
    %c0_i32_2 = arith.constant 0 : i32
    %c0_i32_3 = arith.constant 0 : i32
    return %2, %c0_i32_1, %c0_i32_2 : i32, i32, i32
  }
  func.func @transform_2(%arg0: i32) -> (i32, i32, i32) {
    %c1_i32 = arith.constant 1 : i32
    %0 = arith.addi %arg0, %c1_i32 : i32
    %c0_i32 = arith.constant 0 : i32
    %c7_i32 = arith.constant 7 : i32
    %1 = arith.maxsi %c0_i32, %0 : i32
    %2 = arith.minsi %c7_i32, %1 : i32
    %c0_i32_0 = arith.constant 0 : i32
    %c0_i32_1 = arith.constant 0 : i32
    %c0_i32_2 = arith.constant 0 : i32
    return %2, %c0_i32_0, %c0_i32_1 : i32, i32, i32
  }
  func.func @transform_3(%arg0: i32) -> (i32, i32) {
    %c0_i32 = arith.constant 0 : i32
    %c0_i32_0 = arith.constant 0 : i32
    %c0_i32_1 = arith.constant 0 : i32
    return %c0_i32, %c0_i32_0 : i32, i32
  }
  func.func @transform_4(%arg0: i32) -> (i32, i32) {
    %c0_i32 = arith.constant 0 : i32
    %c0_i32_0 = arith.constant 0 : i32
    %c0_i32_1 = arith.constant 0 : i32
    return %c0_i32, %c0_i32_0 : i32, i32
  }
  func.func @transform_5(%arg0: i32) -> (i32, i32) {
    %c0_i32 = arith.constant 0 : i32
    %c0_i32_0 = arith.constant 0 : i32
    %c0_i32_1 = arith.constant 0 : i32
    return %c0_i32, %c0_i32_0 : i32, i32
  }
  func.func @transform_6(%arg0: i32) -> (i32, i32) {
    %c0_i32 = arith.constant 0 : i32
    %c0_i32_0 = arith.constant 0 : i32
    %c0_i32_1 = arith.constant 0 : i32
    return %c0_i32, %c0_i32_0 : i32, i32
  }
  func.func @transform_7(%arg0: i32) -> (i32, i32) {
    %c0_i32 = arith.constant 0 : i32
    %c0_i32_0 = arith.constant 0 : i32
    %c0_i32_1 = arith.constant 0 : i32
    return %c0_i32, %c0_i32_0 : i32, i32
  }
  func.func @transform_8(%arg0: i32) -> (i32, i32) {
    %c0_i32 = arith.constant 0 : i32
    %c0_i32_0 = arith.constant 0 : i32
    %c0_i32_1 = arith.constant 0 : i32
    return %c0_i32, %c0_i32_0 : i32, i32
  }
  func.func @transform_9(%arg0: i32) -> (i32, i32, i32) {
    %c0_i32 = arith.constant 0 : i32
    %c0_i32_0 = arith.constant 0 : i32
    %c0_i32_1 = arith.constant 0 : i32
    return %arg0, %c0_i32, %c0_i32_0 : i32, i32, i32
  }
}

module attributes {stable_mosaic.version = 11 : i64} {
  func.func @_layer_kernel(%arg0: i32, %arg1: memref<1x8x128xf32, #tpu.memory_space<vmem>>, %arg2: memref<1x8x128xf32, #tpu.memory_space<vmem>>, %arg3: memref<1x8x128xf32, #tpu.memory_space<vmem>>, %arg4: memref<8x27xf32, #tpu.memory_space<vmem>>, %arg5: memref<8x1xf32, #tpu.memory_space<vmem>>, %arg6: memref<8x1xf32, #tpu.memory_space<vmem>>, %arg7: memref<8x8xf32, #tpu.memory_space<vmem>>, %arg8: memref<8x1xf32, #tpu.memory_space<vmem>>, %arg9: memref<9x128xf32, #tpu.memory_space<vmem>>, %arg10: memref<1x8x128xf32, #tpu.memory_space<vmem>>, %arg11: memref<8x128xf32, #tpu.memory_space<vmem>>) attributes {dimension_semantics = [#tpu.dimension_semantics<parallel>], iteration_bounds = array<i64: 8>, scalar_prefetch = 0 : i64, scratch_operands = 1 : i64, tpu.core_type = #tpu.core_type<tc>, window_params = [{transform_indices = @transform_0, window_bounds = array<i64: 1, 8, 128>}, {transform_indices = @transform_1, window_bounds = array<i64: 1, 8, 128>}, {transform_indices = @transform_2, window_bounds = array<i64: 1, 8, 128>}, {pipeline_mode = #tpu.pipeline_mode<synchronous>, transform_indices = @transform_3, window_bounds = array<i64: 8, 27>}, {pipeline_mode = #tpu.pipeline_mode<synchronous>, transform_indices = @transform_4, window_bounds = array<i64: 8, 1>}, {pipeline_mode = #tpu.pipeline_mode<synchronous>, transform_indices = @transform_5, window_bounds = array<i64: 8, 1>}, {pipeline_mode = #tpu.pipeline_mode<synchronous>, transform_indices = @transform_6, window_bounds = array<i64: 8, 8>}, {pipeline_mode = #tpu.pipeline_mode<synchronous>, transform_indices = @transform_7, window_bounds = array<i64: 8, 1>}, {pipeline_mode = #tpu.pipeline_mode<synchronous>, transform_indices = @transform_8, window_bounds = array<i64: 9, 128>}, {transform_indices = @transform_9, window_bounds = array<i64: 1, 8, 128>}]} {
    %c-2_i32 = arith.constant -2 : i32
    %0 = arith.addi %arg0, %c-2_i32 : i32
    %c0_i32 = arith.constant 0 : i32
    %1 = arith.cmpi sge, %0, %c0_i32 : i32
    %c7_i32 = arith.constant 7 : i32
    %2 = arith.cmpi sle, %0, %c7_i32 : i32
    %3 = arith.andi %1, %2 : i1
    %cst = arith.constant 1.000000e+00 : f32
    %cst_0 = arith.constant 0.000000e+00 : f32
    %4 = arith.select %3, %cst, %cst_0 : f32
    %c2_i32 = arith.constant 2 : i32
    %5 = arith.addi %arg0, %c2_i32 : i32
    %c0_i32_1 = arith.constant 0 : i32
    %6 = arith.cmpi sge, %5, %c0_i32_1 : i32
    %c7_i32_2 = arith.constant 7 : i32
    %7 = arith.cmpi sle, %5, %c7_i32_2 : i32
    %8 = arith.andi %6, %7 : i1
    %cst_3 = arith.constant 1.000000e+00 : f32
    %cst_4 = arith.constant 0.000000e+00 : f32
    %9 = arith.select %8, %cst_3, %cst_4 : f32
    %cst_5 = arith.constant 0.000000e+00 : f32
    %10 = vector.broadcast %cst_5 : f32 to vector<8x128xf32>
    %c0 = arith.constant 0 : index
    %c0_6 = arith.constant 0 : index
    %11 = vector.load %arg11[%c0, %c0_6] : memref<8x128xf32, #tpu.memory_space<vmem>>, vector<8x128xf32>
    tpu.vector_store %arg11[%c0, %c0_6], %10 {strides = array<i32>} : memref<8x128xf32, #tpu.memory_space<vmem>>, vector<8x128xf32>,
    %cst_7 = arith.constant 0.000000e+00 : f32
    %12 = vector.broadcast %cst_7 : f32 to vector<8x119xf32>
    %c0_8 = arith.constant 0 : index
    %c0_9 = arith.constant 0 : index
    %13 = vector.load %arg4[%c0_8, %c0_9] : memref<8x27xf32, #tpu.memory_space<vmem>>, vector<8x1xf32>
    %14 = vector.broadcast %4 : f32 to vector<8x1xf32>
    %15 = arith.mulf %13, %14 : vector<8x1xf32>
    %c0_10 = arith.constant 0 : index
    %c0_11 = arith.constant 0 : index
    %c0_12 = arith.constant 0 : index
    %16 = vector.load %arg1[%c0_10, %c0_11, %c0_12] : memref<1x8x128xf32, #tpu.memory_space<vmem>>, vector<1x8x119xf32>
    %17 = vector.shape_cast %16 : vector<1x8x119xf32> to vector<8x119xf32>
    %18 = vector.broadcast %15 : vector<8x1xf32> to vector<8x119xf32>
    %19 = arith.mulf %17, %18 : vector<8x119xf32>
    %20 = arith.addf %12, %19 : vector<8x119xf32>
    %c0_13 = arith.constant 0 : index
    %c9 = arith.constant 9 : index
    %21 = vector.load %arg4[%c0_13, %c9] : memref<8x27xf32, #tpu.memory_space<vmem>>, vector<8x1xf32>
    %c0_14 = arith.constant 0 : index
    %c0_15 = arith.constant 0 : index
    %c0_16 = arith.constant 0 : index
    %22 = vector.load %arg2[%c0_14, %c0_15, %c0_16] : memref<1x8x128xf32, #tpu.memory_space<vmem>>, vector<1x8x119xf32>
    %23 = vector.shape_cast %22 : vector<1x8x119xf32> to vector<8x119xf32>
    %24 = vector.broadcast %21 : vector<8x1xf32> to vector<8x119xf32>
    %25 = arith.mulf %23, %24 : vector<8x119xf32>
    %26 = arith.addf %20, %25 : vector<8x119xf32>
    %c0_17 = arith.constant 0 : index
    %c18 = arith.constant 18 : index
    %27 = vector.load %arg4[%c0_17, %c18] : memref<8x27xf32, #tpu.memory_space<vmem>>, vector<8x1xf32>
    %28 = vector.broadcast %9 : f32 to vector<8x1xf32>
    %29 = arith.mulf %27, %28 : vector<8x1xf32>
    %c0_18 = arith.constant 0 : index
    %c0_19 = arith.constant 0 : index
    %c0_20 = arith.constant 0 : index
    %30 = vector.load %arg3[%c0_18, %c0_19, %c0_20] : memref<1x8x128xf32, #tpu.memory_space<vmem>>, vector<1x8x119xf32>
    %31 = vector.shape_cast %30 : vector<1x8x119xf32> to vector<8x119xf32>
    %32 = vector.broadcast %29 : vector<8x1xf32> to vector<8x119xf32>
    %33 = arith.mulf %31, %32 : vector<8x119xf32>
    %34 = arith.addf %26, %33 : vector<8x119xf32>
    %c0_21 = arith.constant 0 : index
    %c9_22 = arith.constant 9 : index
    %35 = vector.load %arg9[%c0_21, %c9_22] : memref<9x128xf32, #tpu.memory_space<vmem>>, vector<1x119xf32>
    %36 = vector.broadcast %35 : vector<1x119xf32> to vector<8x119xf32>
    %37 = arith.mulf %34, %36 : vector<8x119xf32>
    %c0_23 = arith.constant 0 : index
    %c9_24 = arith.constant 9 : index
    %38 = vector.load %arg11[%c0_23, %c9_24] : memref<8x128xf32, #tpu.memory_space<vmem>>, vector<8x119xf32>
    %39 = arith.addf %38, %37 : vector<8x119xf32>
    %c0_25 = arith.constant 0 : index
    %c9_26 = arith.constant 9 : index
    %40 = vector.load %arg11[%c0_25, %c9_26] : memref<8x128xf32, #tpu.memory_space<vmem>>, vector<8x119xf32>
    tpu.vector_store %arg11[%c0_25, %c9_26], %39 {strides = array<i32>} : memref<8x128xf32, #tpu.memory_space<vmem>>, vector<8x119xf32>,
    %cst_27 = arith.constant 0.000000e+00 : f32
    %41 = vector.broadcast %cst_27 : f32 to vector<8x120xf32>
    %c0_28 = arith.constant 0 : index
    %c1 = arith.constant 1 : index
    %42 = vector.load %arg4[%c0_28, %c1] : memref<8x27xf32, #tpu.memory_space<vmem>>, vector<8x1xf32>
    %43 = vector.broadcast %4 : f32 to vector<8x1xf32>
    %44 = arith.mulf %42, %43 : vector<8x1xf32>
    %c0_29 = arith.constant 0 : index
    %c0_30 = arith.constant 0 : index
    %c0_31 = arith.constant 0 : index
    %45 = vector.load %arg1[%c0_29, %c0_30, %c0_31] : memref<1x8x128xf32, #tpu.memory_space<vmem>>, vector<1x8x120xf32>
    %46 = vector.shape_cast %45 : vector<1x8x120xf32> to vector<8x120xf32>
    %47 = vector.broadcast %44 : vector<8x1xf32> to vector<8x120xf32>
    %48 = arith.mulf %46, %47 : vector<8x120xf32>
    %49 = arith.addf %41, %48 : vector<8x120xf32>
    %c0_32 = arith.constant 0 : index
    %c10 = arith.constant 10 : index
    %50 = vector.load %arg4[%c0_32, %c10] : memref<8x27xf32, #tpu.memory_space<vmem>>, vector<8x1xf32>
    %c0_33 = arith.constant 0 : index
    %c0_34 = arith.constant 0 : index
    %c0_35 = arith.constant 0 : index
    %51 = vector.load %arg2[%c0_33, %c0_34, %c0_35] : memref<1x8x128xf32, #tpu.memory_space<vmem>>, vector<1x8x120xf32>
    %52 = vector.shape_cast %51 : vector<1x8x120xf32> to vector<8x120xf32>
    %53 = vector.broadcast %50 : vector<8x1xf32> to vector<8x120xf32>
    %54 = arith.mulf %52, %53 : vector<8x120xf32>
    %55 = arith.addf %49, %54 : vector<8x120xf32>
    %c0_36 = arith.constant 0 : index
    %c19 = arith.constant 19 : index
    %56 = vector.load %arg4[%c0_36, %c19] : memref<8x27xf32, #tpu.memory_space<vmem>>, vector<8x1xf32>
    %57 = vector.broadcast %9 : f32 to vector<8x1xf32>
    %58 = arith.mulf %56, %57 : vector<8x1xf32>
    %c0_37 = arith.constant 0 : index
    %c0_38 = arith.constant 0 : index
    %c0_39 = arith.constant 0 : index
    %59 = vector.load %arg3[%c0_37, %c0_38, %c0_39] : memref<1x8x128xf32, #tpu.memory_space<vmem>>, vector<1x8x120xf32>
    %60 = vector.shape_cast %59 : vector<1x8x120xf32> to vector<8x120xf32>
    %61 = vector.broadcast %58 : vector<8x1xf32> to vector<8x120xf32>
    %62 = arith.mulf %60, %61 : vector<8x120xf32>
    %63 = arith.addf %55, %62 : vector<8x120xf32>
    %c1_40 = arith.constant 1 : index
    %c8 = arith.constant 8 : index
    %64 = vector.load %arg9[%c1_40, %c8] : memref<9x128xf32, #tpu.memory_space<vmem>>, vector<1x120xf32>
    %65 = vector.broadcast %64 : vector<1x120xf32> to vector<8x120xf32>
    %66 = arith.mulf %63, %65 : vector<8x120xf32>
    %c0_41 = arith.constant 0 : index
    %c8_42 = arith.constant 8 : index
    %67 = vector.load %arg11[%c0_41, %c8_42] : memref<8x128xf32, #tpu.memory_space<vmem>>, vector<8x120xf32>
    %68 = arith.addf %67, %66 : vector<8x120xf32>
    %c0_43 = arith.constant 0 : index
    %c8_44 = arith.constant 8 : index
    %69 = vector.load %arg11[%c0_43, %c8_44] : memref<8x128xf32, #tpu.memory_space<vmem>>, vector<8x120xf32>
    tpu.vector_store %arg11[%c0_43, %c8_44], %68 {strides = array<i32>} : memref<8x128xf32, #tpu.memory_space<vmem>>, vector<8x120xf32>,
    %cst_45 = arith.constant 0.000000e+00 : f32
    %70 = vector.broadcast %cst_45 : f32 to vector<8x121xf32>
    %c0_46 = arith.constant 0 : index
    %c2 = arith.constant 2 : index
    %71 = vector.load %arg4[%c0_46, %c2] : memref<8x27xf32, #tpu.memory_space<vmem>>, vector<8x1xf32>
    %72 = vector.broadcast %4 : f32 to vector<8x1xf32>
    %73 = arith.mulf %71, %72 : vector<8x1xf32>
    %c0_47 = arith.constant 0 : index
    %c0_48 = arith.constant 0 : index
    %c0_49 = arith.constant 0 : index
    %74 = vector.load %arg1[%c0_47, %c0_48, %c0_49] : memref<1x8x128xf32, #tpu.memory_space<vmem>>, vector<1x8x121xf32>
    %75 = vector.shape_cast %74 : vector<1x8x121xf32> to vector<8x121xf32>
    %76 = vector.broadcast %73 : vector<8x1xf32> to vector<8x121xf32>
    %77 = arith.mulf %75, %76 : vector<8x121xf32>
    %78 = arith.addf %70, %77 : vector<8x121xf32>
    %c0_50 = arith.constant 0 : index
    %c11 = arith.constant 11 : index
    %79 = vector.load %arg4[%c0_50, %c11] : memref<8x27xf32, #tpu.memory_space<vmem>>, vector<8x1xf32>
    %c0_51 = arith.constant 0 : index
    %c0_52 = arith.constant 0 : index
    %c0_53 = arith.constant 0 : index
    %80 = vector.load %arg2[%c0_51, %c0_52, %c0_53] : memref<1x8x128xf32, #tpu.memory_space<vmem>>, vector<1x8x121xf32>
    %81 = vector.shape_cast %80 : vector<1x8x121xf32> to vector<8x121xf32>
    %82 = vector.broadcast %79 : vector<8x1xf32> to vector<8x121xf32>
    %83 = arith.mulf %81, %82 : vector<8x121xf32>
    %84 = arith.addf %78, %83 : vector<8x121xf32>
    %c0_54 = arith.constant 0 : index
    %c20 = arith.constant 20 : index
    %85 = vector.load %arg4[%c0_54, %c20] : memref<8x27xf32, #tpu.memory_space<vmem>>, vector<8x1xf32>
    %86 = vector.broadcast %9 : f32 to vector<8x1xf32>
    %87 = arith.mulf %85, %86 : vector<8x1xf32>
    %c0_55 = arith.constant 0 : index
    %c0_56 = arith.constant 0 : index
    %c0_57 = arith.constant 0 : index
    %88 = vector.load %arg3[%c0_55, %c0_56, %c0_57] : memref<1x8x128xf32, #tpu.memory_space<vmem>>, vector<1x8x121xf32>
    %89 = vector.shape_cast %88 : vector<1x8x121xf32> to vector<8x121xf32>
    %90 = vector.broadcast %87 : vector<8x1xf32> to vector<8x121xf32>
    %91 = arith.mulf %89, %90 : vector<8x121xf32>
    %92 = arith.addf %84, %91 : vector<8x121xf32>
    %c2_58 = arith.constant 2 : index
    %c7 = arith.constant 7 : index
    %93 = vector.load %arg9[%c2_58, %c7] : memref<9x128xf32, #tpu.memory_space<vmem>>, vector<1x121xf32>
    %94 = vector.broadcast %93 : vector<1x121xf32> to vector<8x121xf32>
    %95 = arith.mulf %92, %94 : vector<8x121xf32>
    %c0_59 = arith.constant 0 : index
    %c7_60 = arith.constant 7 : index
    %96 = vector.load %arg11[%c0_59, %c7_60] : memref<8x128xf32, #tpu.memory_space<vmem>>, vector<8x121xf32>
    %97 = arith.addf %96, %95 : vector<8x121xf32>
    %c0_61 = arith.constant 0 : index
    %c7_62 = arith.constant 7 : index
    %98 = vector.load %arg11[%c0_61, %c7_62] : memref<8x128xf32, #tpu.memory_space<vmem>>, vector<8x121xf32>
    tpu.vector_store %arg11[%c0_61, %c7_62], %97 {strides = array<i32>} : memref<8x128xf32, #tpu.memory_space<vmem>>, vector<8x121xf32>,
    %cst_63 = arith.constant 0.000000e+00 : f32
    %99 = vector.broadcast %cst_63 : f32 to vector<8x127xf32>
    %c0_64 = arith.constant 0 : index
    %c3 = arith.constant 3 : index
    %100 = vector.load %arg4[%c0_64, %c3] : memref<8x27xf32, #tpu.memory_space<vmem>>, vector<8x1xf32>
    %101 = vector.broadcast %4 : f32 to vector<8x1xf32>
    %102 = arith.mulf %100, %101 : vector<8x1xf32>
    %c0_65 = arith.constant 0 : index
    %c0_66 = arith.constant 0 : index
    %c0_67 = arith.constant 0 : index
    %103 = vector.load %arg1[%c0_65, %c0_66, %c0_67] : memref<1x8x128xf32, #tpu.memory_space<vmem>>, vector<1x8x127xf32>
    %104 = vector.shape_cast %103 : vector<1x8x127xf32> to vector<8x127xf32>
    %105 = vector.broadcast %102 : vector<8x1xf32> to vector<8x127xf32>
    %106 = arith.mulf %104, %105 : vector<8x127xf32>
    %107 = arith.addf %99, %106 : vector<8x127xf32>
    %c0_68 = arith.constant 0 : index
    %c12 = arith.constant 12 : index
    %108 = vector.load %arg4[%c0_68, %c12] : memref<8x27xf32, #tpu.memory_space<vmem>>, vector<8x1xf32>
    %c0_69 = arith.constant 0 : index
    %c0_70 = arith.constant 0 : index
    %c0_71 = arith.constant 0 : index
    %109 = vector.load %arg2[%c0_69, %c0_70, %c0_71] : memref<1x8x128xf32, #tpu.memory_space<vmem>>, vector<1x8x127xf32>
    %110 = vector.shape_cast %109 : vector<1x8x127xf32> to vector<8x127xf32>
    %111 = vector.broadcast %108 : vector<8x1xf32> to vector<8x127xf32>
    %112 = arith.mulf %110, %111 : vector<8x127xf32>
    %113 = arith.addf %107, %112 : vector<8x127xf32>
    %c0_72 = arith.constant 0 : index
    %c21 = arith.constant 21 : index
    %114 = vector.load %arg4[%c0_72, %c21] : memref<8x27xf32, #tpu.memory_space<vmem>>, vector<8x1xf32>
    %115 = vector.broadcast %9 : f32 to vector<8x1xf32>
    %116 = arith.mulf %114, %115 : vector<8x1xf32>
    %c0_73 = arith.constant 0 : index
    %c0_74 = arith.constant 0 : index
    %c0_75 = arith.constant 0 : index
    %117 = vector.load %arg3[%c0_73, %c0_74, %c0_75] : memref<1x8x128xf32, #tpu.memory_space<vmem>>, vector<1x8x127xf32>
    %118 = vector.shape_cast %117 : vector<1x8x127xf32> to vector<8x127xf32>
    %119 = vector.broadcast %116 : vector<8x1xf32> to vector<8x127xf32>
    %120 = arith.mulf %118, %119 : vector<8x127xf32>
    %121 = arith.addf %113, %120 : vector<8x127xf32>
    %c3_76 = arith.constant 3 : index
    %c1_77 = arith.constant 1 : index
    %122 = vector.load %arg9[%c3_76, %c1_77] : memref<9x128xf32, #tpu.memory_space<vmem>>, vector<1x127xf32>
    %123 = vector.broadcast %122 : vector<1x127xf32> to vector<8x127xf32>
    %124 = arith.mulf %121, %123 : vector<8x127xf32>
    %c0_78 = arith.constant 0 : index
    %c1_79 = arith.constant 1 : index
    %125 = vector.load %arg11[%c0_78, %c1_79] : memref<8x128xf32, #tpu.memory_space<vmem>>, vector<8x127xf32>
    %126 = arith.addf %125, %124 : vector<8x127xf32>
    %c0_80 = arith.constant 0 : index
    %c1_81 = arith.constant 1 : index
    %127 = vector.load %arg11[%c0_80, %c1_81] : memref<8x128xf32, #tpu.memory_space<vmem>>, vector<8x127xf32>
    tpu.vector_store %arg11[%c0_80, %c1_81], %126 {strides = array<i32>} : memref<8x128xf32, #tpu.memory_space<vmem>>, vector<8x127xf32>,
    %cst_82 = arith.constant 0.000000e+00 : f32
    %128 = vector.broadcast %cst_82 : f32 to vector<8x128xf32>
    %c0_83 = arith.constant 0 : index
    %c4 = arith.constant 4 : index
    %129 = vector.load %arg4[%c0_83, %c4] : memref<8x27xf32, #tpu.memory_space<vmem>>, vector<8x1xf32>
    %130 = vector.broadcast %4 : f32 to vector<8x1xf32>
    %131 = arith.mulf %129, %130 : vector<8x1xf32>
    %c0_84 = arith.constant 0 : index
    %c0_85 = arith.constant 0 : index
    %c0_86 = arith.constant 0 : index
    %132 = vector.load %arg1[%c0_84, %c0_85, %c0_86] : memref<1x8x128xf32, #tpu.memory_space<vmem>>, vector<1x8x128xf32>
    %133 = vector.shape_cast %132 : vector<1x8x128xf32> to vector<8x128xf32>
    %134 = vector.broadcast %131 : vector<8x1xf32> to vector<8x128xf32>
    %135 = arith.mulf %133, %134 : vector<8x128xf32>
    %136 = arith.addf %128, %135 : vector<8x128xf32>
    %c0_87 = arith.constant 0 : index
    %c13 = arith.constant 13 : index
    %137 = vector.load %arg4[%c0_87, %c13] : memref<8x27xf32, #tpu.memory_space<vmem>>, vector<8x1xf32>
    %c0_88 = arith.constant 0 : index
    %c0_89 = arith.constant 0 : index
    %c0_90 = arith.constant 0 : index
    %138 = vector.load %arg2[%c0_88, %c0_89, %c0_90] : memref<1x8x128xf32, #tpu.memory_space<vmem>>, vector<1x8x128xf32>
    %139 = vector.shape_cast %138 : vector<1x8x128xf32> to vector<8x128xf32>
    %140 = vector.broadcast %137 : vector<8x1xf32> to vector<8x128xf32>
    %141 = arith.mulf %139, %140 : vector<8x128xf32>
    %142 = arith.addf %136, %141 : vector<8x128xf32>
    %c0_91 = arith.constant 0 : index
    %c22 = arith.constant 22 : index
    %143 = vector.load %arg4[%c0_91, %c22] : memref<8x27xf32, #tpu.memory_space<vmem>>, vector<8x1xf32>
    %144 = vector.broadcast %9 : f32 to vector<8x1xf32>
    %145 = arith.mulf %143, %144 : vector<8x1xf32>
    %c0_92 = arith.constant 0 : index
    %c0_93 = arith.constant 0 : index
    %c0_94 = arith.constant 0 : index
    %146 = vector.load %arg3[%c0_92, %c0_93, %c0_94] : memref<1x8x128xf32, #tpu.memory_space<vmem>>, vector<1x8x128xf32>
    %147 = vector.shape_cast %146 : vector<1x8x128xf32> to vector<8x128xf32>
    %148 = vector.broadcast %145 : vector<8x1xf32> to vector<8x128xf32>
    %149 = arith.mulf %147, %148 : vector<8x128xf32>
    %150 = arith.addf %142, %149 : vector<8x128xf32>
    %c0_95 = arith.constant 0 : index
    %c0_96 = arith.constant 0 : index
    %151 = vector.load %arg11[%c0_95, %c0_96] : memref<8x128xf32, #tpu.memory_space<vmem>>, vector<8x128xf32>
    %152 = arith.addf %151, %150 : vector<8x128xf32>
    %c0_97 = arith.constant 0 : index
    %c0_98 = arith.constant 0 : index
    %153 = vector.load %arg11[%c0_97, %c0_98] : memref<8x128xf32, #tpu.memory_space<vmem>>, vector<8x128xf32>
    tpu.vector_store %arg11[%c0_97, %c0_98], %152 {strides = array<i32>} : memref<8x128xf32, #tpu.memory_space<vmem>>, vector<8x128xf32>,
    %cst_99 = arith.constant 0.000000e+00 : f32
    %154 = vector.broadcast %cst_99 : f32 to vector<8x127xf32>
    %c0_100 = arith.constant 0 : index
    %c5 = arith.constant 5 : index
    %155 = vector.load %arg4[%c0_100, %c5] : memref<8x27xf32, #tpu.memory_space<vmem>>, vector<8x1xf32>
    %156 = vector.broadcast %4 : f32 to vector<8x1xf32>
    %157 = arith.mulf %155, %156 : vector<8x1xf32>
    %c0_101 = arith.constant 0 : index
    %c0_102 = arith.constant 0 : index
    %c1_103 = arith.constant 1 : index
    %158 = vector.load %arg1[%c0_101, %c0_102, %c1_103] : memref<1x8x128xf32, #tpu.memory_space<vmem>>, vector<1x8x127xf32>
    %159 = vector.shape_cast %158 : vector<1x8x127xf32> to vector<8x127xf32>
    %160 = vector.broadcast %157 : vector<8x1xf32> to vector<8x127xf32>
    %161 = arith.mulf %159, %160 : vector<8x127xf32>
    %162 = arith.addf %154, %161 : vector<8x127xf32>
    %c0_104 = arith.constant 0 : index
    %c14 = arith.constant 14 : index
    %163 = vector.load %arg4[%c0_104, %c14] : memref<8x27xf32, #tpu.memory_space<vmem>>, vector<8x1xf32>
    %c0_105 = arith.constant 0 : index
    %c0_106 = arith.constant 0 : index
    %c1_107 = arith.constant 1 : index
    %164 = vector.load %arg2[%c0_105, %c0_106, %c1_107] : memref<1x8x128xf32, #tpu.memory_space<vmem>>, vector<1x8x127xf32>
    %165 = vector.shape_cast %164 : vector<1x8x127xf32> to vector<8x127xf32>
    %166 = vector.broadcast %163 : vector<8x1xf32> to vector<8x127xf32>
    %167 = arith.mulf %165, %166 : vector<8x127xf32>
    %168 = arith.addf %162, %167 : vector<8x127xf32>
    %c0_108 = arith.constant 0 : index
    %c23 = arith.constant 23 : index
    %169 = vector.load %arg4[%c0_108, %c23] : memref<8x27xf32, #tpu.memory_space<vmem>>, vector<8x1xf32>
    %170 = vector.broadcast %9 : f32 to vector<8x1xf32>
    %171 = arith.mulf %169, %170 : vector<8x1xf32>
    %c0_109 = arith.constant 0 : index
    %c0_110 = arith.constant 0 : index
    %c1_111 = arith.constant 1 : index
    %172 = vector.load %arg3[%c0_109, %c0_110, %c1_111] : memref<1x8x128xf32, #tpu.memory_space<vmem>>, vector<1x8x127xf32>
    %173 = vector.shape_cast %172 : vector<1x8x127xf32> to vector<8x127xf32>
    %174 = vector.broadcast %171 : vector<8x1xf32> to vector<8x127xf32>
    %175 = arith.mulf %173, %174 : vector<8x127xf32>
    %176 = arith.addf %168, %175 : vector<8x127xf32>
    %c5_112 = arith.constant 5 : index
    %c0_113 = arith.constant 0 : index
    %177 = vector.load %arg9[%c5_112, %c0_113] : memref<9x128xf32, #tpu.memory_space<vmem>>, vector<1x127xf32>
    %178 = vector.broadcast %177 : vector<1x127xf32> to vector<8x127xf32>
    %179 = arith.mulf %176, %178 : vector<8x127xf32>
    %c0_114 = arith.constant 0 : index
    %c0_115 = arith.constant 0 : index
    %180 = vector.load %arg11[%c0_114, %c0_115] : memref<8x128xf32, #tpu.memory_space<vmem>>, vector<8x127xf32>
    %181 = arith.addf %180, %179 : vector<8x127xf32>
    %c0_116 = arith.constant 0 : index
    %c0_117 = arith.constant 0 : index
    %182 = vector.load %arg11[%c0_116, %c0_117] : memref<8x128xf32, #tpu.memory_space<vmem>>, vector<8x127xf32>
    tpu.vector_store %arg11[%c0_116, %c0_117], %181 {strides = array<i32>} : memref<8x128xf32, #tpu.memory_space<vmem>>, vector<8x127xf32>,
    %cst_118 = arith.constant 0.000000e+00 : f32
    %183 = vector.broadcast %cst_118 : f32 to vector<8x121xf32>
    %c0_119 = arith.constant 0 : index
    %c6 = arith.constant 6 : index
    %184 = vector.load %arg4[%c0_119, %c6] : memref<8x27xf32, #tpu.memory_space<vmem>>, vector<8x1xf32>
    %185 = vector.broadcast %4 : f32 to vector<8x1xf32>
    %186 = arith.mulf %184, %185 : vector<8x1xf32>
    %c0_120 = arith.constant 0 : index
    %c0_121 = arith.constant 0 : index
    %c7_122 = arith.constant 7 : index
    %187 = vector.load %arg1[%c0_120, %c0_121, %c7_122] : memref<1x8x128xf32, #tpu.memory_space<vmem>>, vector<1x8x121xf32>
    %188 = vector.shape_cast %187 : vector<1x8x121xf32> to vector<8x121xf32>
    %189 = vector.broadcast %186 : vector<8x1xf32> to vector<8x121xf32>
    %190 = arith.mulf %188, %189 : vector<8x121xf32>
    %191 = arith.addf %183, %190 : vector<8x121xf32>
    %c0_123 = arith.constant 0 : index
    %c15 = arith.constant 15 : index
    %192 = vector.load %arg4[%c0_123, %c15] : memref<8x27xf32, #tpu.memory_space<vmem>>, vector<8x1xf32>
    %c0_124 = arith.constant 0 : index
    %c0_125 = arith.constant 0 : index
    %c7_126 = arith.constant 7 : index
    %193 = vector.load %arg2[%c0_124, %c0_125, %c7_126] : memref<1x8x128xf32, #tpu.memory_space<vmem>>, vector<1x8x121xf32>
    %194 = vector.shape_cast %193 : vector<1x8x121xf32> to vector<8x121xf32>
    %195 = vector.broadcast %192 : vector<8x1xf32> to vector<8x121xf32>
    %196 = arith.mulf %194, %195 : vector<8x121xf32>
    %197 = arith.addf %191, %196 : vector<8x121xf32>
    %c0_127 = arith.constant 0 : index
    %c24 = arith.constant 24 : index
    %198 = vector.load %arg4[%c0_127, %c24] : memref<8x27xf32, #tpu.memory_space<vmem>>, vector<8x1xf32>
    %199 = vector.broadcast %9 : f32 to vector<8x1xf32>
    %200 = arith.mulf %198, %199 : vector<8x1xf32>
    %c0_128 = arith.constant 0 : index
    %c0_129 = arith.constant 0 : index
    %c7_130 = arith.constant 7 : index
    %201 = vector.load %arg3[%c0_128, %c0_129, %c7_130] : memref<1x8x128xf32, #tpu.memory_space<vmem>>, vector<1x8x121xf32>
    %202 = vector.shape_cast %201 : vector<1x8x121xf32> to vector<8x121xf32>
    %203 = vector.broadcast %200 : vector<8x1xf32> to vector<8x121xf32>
    %204 = arith.mulf %202, %203 : vector<8x121xf32>
    %205 = arith.addf %197, %204 : vector<8x121xf32>
    %c6_131 = arith.constant 6 : index
    %c0_132 = arith.constant 0 : index
    %206 = vector.load %arg9[%c6_131, %c0_132] : memref<9x128xf32, #tpu.memory_space<vmem>>, vector<1x121xf32>
    %207 = vector.broadcast %206 : vector<1x121xf32> to vector<8x121xf32>
    %208 = arith.mulf %205, %207 : vector<8x121xf32>
    %c0_133 = arith.constant 0 : index
    %c0_134 = arith.constant 0 : index
    %209 = vector.load %arg11[%c0_133, %c0_134] : memref<8x128xf32, #tpu.memory_space<vmem>>, vector<8x121xf32>
    %210 = arith.addf %209, %208 : vector<8x121xf32>
    %c0_135 = arith.constant 0 : index
    %c0_136 = arith.constant 0 : index
    %211 = vector.load %arg11[%c0_135, %c0_136] : memref<8x128xf32, #tpu.memory_space<vmem>>, vector<8x121xf32>
    tpu.vector_store %arg11[%c0_135, %c0_136], %210 {strides = array<i32>} : memref<8x128xf32, #tpu.memory_space<vmem>>, vector<8x121xf32>,
    %cst_137 = arith.constant 0.000000e+00 : f32
    %212 = vector.broadcast %cst_137 : f32 to vector<8x120xf32>
    %c0_138 = arith.constant 0 : index
    %c7_139 = arith.constant 7 : index
    %213 = vector.load %arg4[%c0_138, %c7_139] : memref<8x27xf32, #tpu.memory_space<vmem>>, vector<8x1xf32>
    %214 = vector.broadcast %4 : f32 to vector<8x1xf32>
    %215 = arith.mulf %213, %214 : vector<8x1xf32>
    %c0_140 = arith.constant 0 : index
    %c0_141 = arith.constant 0 : index
    %c8_142 = arith.constant 8 : index
    %216 = vector.load %arg1[%c0_140, %c0_141, %c8_142] : memref<1x8x128xf32, #tpu.memory_space<vmem>>, vector<1x8x120xf32>
    %217 = vector.shape_cast %216 : vector<1x8x120xf32> to vector<8x120xf32>
    %218 = vector.broadcast %215 : vector<8x1xf32> to vector<8x120xf32>
    %219 = arith.mulf %217, %218 : vector<8x120xf32>
    %220 = arith.addf %212, %219 : vector<8x120xf32>
    %c0_143 = arith.constant 0 : index
    %c16 = arith.constant 16 : index
    %221 = vector.load %arg4[%c0_143, %c16] : memref<8x27xf32, #tpu.memory_space<vmem>>, vector<8x1xf32>
    %c0_144 = arith.constant 0 : index
    %c0_145 = arith.constant 0 : index
    %c8_146 = arith.constant 8 : index
    %222 = vector.load %arg2[%c0_144, %c0_145, %c8_146] : memref<1x8x128xf32, #tpu.memory_space<vmem>>, vector<1x8x120xf32>
    %223 = vector.shape_cast %222 : vector<1x8x120xf32> to vector<8x120xf32>
    %224 = vector.broadcast %221 : vector<8x1xf32> to vector<8x120xf32>
    %225 = arith.mulf %223, %224 : vector<8x120xf32>
    %226 = arith.addf %220, %225 : vector<8x120xf32>
    %c0_147 = arith.constant 0 : index
    %c25 = arith.constant 25 : index
    %227 = vector.load %arg4[%c0_147, %c25] : memref<8x27xf32, #tpu.memory_space<vmem>>, vector<8x1xf32>
    %228 = vector.broadcast %9 : f32 to vector<8x1xf32>
    %229 = arith.mulf %227, %228 : vector<8x1xf32>
    %c0_148 = arith.constant 0 : index
    %c0_149 = arith.constant 0 : index
    %c8_150 = arith.constant 8 : index
    %230 = vector.load %arg3[%c0_148, %c0_149, %c8_150] : memref<1x8x128xf32, #tpu.memory_space<vmem>>, vector<1x8x120xf32>
    %231 = vector.shape_cast %230 : vector<1x8x120xf32> to vector<8x120xf32>
    %232 = vector.broadcast %229 : vector<8x1xf32> to vector<8x120xf32>
    %233 = arith.mulf %231, %232 : vector<8x120xf32>
    %234 = arith.addf %226, %233 : vector<8x120xf32>
    %c7_151 = arith.constant 7 : index
    %c0_152 = arith.constant 0 : index
    %235 = vector.load %arg9[%c7_151, %c0_152] : memref<9x128xf32, #tpu.memory_space<vmem>>, vector<1x120xf32>
    %236 = vector.broadcast %235 : vector<1x120xf32> to vector<8x120xf32>
    %237 = arith.mulf %234, %236 : vector<8x120xf32>
    %c0_153 = arith.constant 0 : index
    %c0_154 = arith.constant 0 : index
    %238 = vector.load %arg11[%c0_153, %c0_154] : memref<8x128xf32, #tpu.memory_space<vmem>>, vector<8x120xf32>
    %239 = arith.addf %238, %237 : vector<8x120xf32>
    %c0_155 = arith.constant 0 : index
    %c0_156 = arith.constant 0 : index
    %240 = vector.load %arg11[%c0_155, %c0_156] : memref<8x128xf32, #tpu.memory_space<vmem>>, vector<8x120xf32>
    tpu.vector_store %arg11[%c0_155, %c0_156], %239 {strides = array<i32>} : memref<8x128xf32, #tpu.memory_space<vmem>>, vector<8x120xf32>,
    %cst_157 = arith.constant 0.000000e+00 : f32
    %241 = vector.broadcast %cst_157 : f32 to vector<8x119xf32>
    %c0_158 = arith.constant 0 : index
    %c8_159 = arith.constant 8 : index
    %242 = vector.load %arg4[%c0_158, %c8_159] : memref<8x27xf32, #tpu.memory_space<vmem>>, vector<8x1xf32>
    %243 = vector.broadcast %4 : f32 to vector<8x1xf32>
    %244 = arith.mulf %242, %243 : vector<8x1xf32>
    %c0_160 = arith.constant 0 : index
    %c0_161 = arith.constant 0 : index
    %c9_162 = arith.constant 9 : index
    %245 = vector.load %arg1[%c0_160, %c0_161, %c9_162] : memref<1x8x128xf32, #tpu.memory_space<vmem>>, vector<1x8x119xf32>
    %246 = vector.shape_cast %245 : vector<1x8x119xf32> to vector<8x119xf32>
    %247 = vector.broadcast %244 : vector<8x1xf32> to vector<8x119xf32>
    %248 = arith.mulf %246, %247 : vector<8x119xf32>
    %249 = arith.addf %241, %248 : vector<8x119xf32>
    %c0_163 = arith.constant 0 : index
    %c17 = arith.constant 17 : index
    %250 = vector.load %arg4[%c0_163, %c17] : memref<8x27xf32, #tpu.memory_space<vmem>>, vector<8x1xf32>
    %c0_164 = arith.constant 0 : index
    %c0_165 = arith.constant 0 : index
    %c9_166 = arith.constant 9 : index
    %251 = vector.load %arg2[%c0_164, %c0_165, %c9_166] : memref<1x8x128xf32, #tpu.memory_space<vmem>>, vector<1x8x119xf32>
    %252 = vector.shape_cast %251 : vector<1x8x119xf32> to vector<8x119xf32>
    %253 = vector.broadcast %250 : vector<8x1xf32> to vector<8x119xf32>
    %254 = arith.mulf %252, %253 : vector<8x119xf32>
    %255 = arith.addf %249, %254 : vector<8x119xf32>
    %c0_167 = arith.constant 0 : index
    %c26 = arith.constant 26 : index
    %256 = vector.load %arg4[%c0_167, %c26] : memref<8x27xf32, #tpu.memory_space<vmem>>, vector<8x1xf32>
    %257 = vector.broadcast %9 : f32 to vector<8x1xf32>
    %258 = arith.mulf %256, %257 : vector<8x1xf32>
    %c0_168 = arith.constant 0 : index
    %c0_169 = arith.constant 0 : index
    %c9_170 = arith.constant 9 : index
    %259 = vector.load %arg3[%c0_168, %c0_169, %c9_170] : memref<1x8x128xf32, #tpu.memory_space<vmem>>, vector<1x8x119xf32>
    %260 = vector.shape_cast %259 : vector<1x8x119xf32> to vector<8x119xf32>
    %261 = vector.broadcast %258 : vector<8x1xf32> to vector<8x119xf32>
    %262 = arith.mulf %260, %261 : vector<8x119xf32>
    %263 = arith.addf %255, %262 : vector<8x119xf32>
    %c8_171 = arith.constant 8 : index
    %c0_172 = arith.constant 0 : index
    %264 = vector.load %arg9[%c8_171, %c0_172] : memref<9x128xf32, #tpu.memory_space<vmem>>, vector<1x119xf32>
    %265 = vector.broadcast %264 : vector<1x119xf32> to vector<8x119xf32>
    %266 = arith.mulf %263, %265 : vector<8x119xf32>
    %c0_173 = arith.constant 0 : index
    %c0_174 = arith.constant 0 : index
    %267 = vector.load %arg11[%c0_173, %c0_174] : memref<8x128xf32, #tpu.memory_space<vmem>>, vector<8x119xf32>
    %268 = arith.addf %267, %266 : vector<8x119xf32>
    %c0_175 = arith.constant 0 : index
    %c0_176 = arith.constant 0 : index
    %269 = vector.load %arg11[%c0_175, %c0_176] : memref<8x128xf32, #tpu.memory_space<vmem>>, vector<8x119xf32>
    tpu.vector_store %arg11[%c0_175, %c0_176], %268 {strides = array<i32>} : memref<8x128xf32, #tpu.memory_space<vmem>>, vector<8x119xf32>,
    %c0_177 = arith.constant 0 : index
    %c0_178 = arith.constant 0 : index
    %270 = vector.load %arg11[%c0_177, %c0_178] : memref<8x128xf32, #tpu.memory_space<vmem>>, vector<8x128xf32>
    %c0_179 = arith.constant 0 : index
    %c0_180 = arith.constant 0 : index
    %271 = vector.load %arg5[%c0_179, %c0_180] : memref<8x1xf32, #tpu.memory_space<vmem>>, vector<8x1xf32>
    %272 = vector.broadcast %271 : vector<8x1xf32> to vector<8x128xf32>
    %273 = arith.mulf %270, %272 : vector<8x128xf32>
    %c0_181 = arith.constant 0 : index
    %c0_182 = arith.constant 0 : index
    %274 = vector.load %arg6[%c0_181, %c0_182] : memref<8x1xf32, #tpu.memory_space<vmem>>, vector<8x1xf32>
    %275 = vector.broadcast %274 : vector<8x1xf32> to vector<8x128xf32>
    %276 = arith.addf %273, %275 : vector<8x128xf32>
    %cst_183 = arith.constant 0.000000e+00 : f32
    %277 = vector.broadcast %cst_183 : f32 to vector<8x128xf32>
    %278 = arith.maximumf %276, %277 : vector<8x128xf32>
    %c0_184 = arith.constant 0 : index
    %c0_185 = arith.constant 0 : index
    %279 = vector.load %arg11[%c0_184, %c0_185] : memref<8x128xf32, #tpu.memory_space<vmem>>, vector<8x128xf32>
    tpu.vector_store %arg11[%c0_184, %c0_185], %278 {strides = array<i32>} : memref<8x128xf32, #tpu.memory_space<vmem>>, vector<8x128xf32>,
    %c0_186 = arith.constant 0 : index
    %c0_187 = arith.constant 0 : index
    %c0_188 = arith.constant 0 : index
    %280 = vector.load %arg2[%c0_186, %c0_187, %c0_188] : memref<1x8x128xf32, #tpu.memory_space<vmem>>, vector<1x8x128xf32>
    %281 = vector.shape_cast %280 : vector<1x8x128xf32> to vector<8x128xf32>
    %c0_189 = arith.constant 0 : index
    %c0_190 = arith.constant 0 : index
    %282 = vector.load %arg8[%c0_189, %c0_190] : memref<8x1xf32, #tpu.memory_space<vmem>>, vector<8x1xf32>
    %283 = vector.broadcast %282 : vector<8x1xf32> to vector<8x128xf32>
    %284 = arith.addf %281, %283 : vector<8x128xf32>
    %c0_191 = arith.constant 0 : index
    %c0_192 = arith.constant 0 : index
    %285 = vector.load %arg7[%c0_191, %c0_192] : memref<8x8xf32, #tpu.memory_space<vmem>>, vector<8x1xf32>
    %c0_193 = arith.constant 0 : index
    %c0_194 = arith.constant 0 : index
    %286 = vector.load %arg11[%c0_193, %c0_194] : memref<8x128xf32, #tpu.memory_space<vmem>>, vector<1x128xf32>
    %287 = vector.broadcast %285 : vector<8x1xf32> to vector<8x128xf32>
    %288 = vector.broadcast %286 : vector<1x128xf32> to vector<8x128xf32>
    %289 = arith.mulf %287, %288 : vector<8x128xf32>
    %290 = arith.addf %284, %289 : vector<8x128xf32>
    %c0_195 = arith.constant 0 : index
    %c1_196 = arith.constant 1 : index
    %291 = vector.load %arg7[%c0_195, %c1_196] : memref<8x8xf32, #tpu.memory_space<vmem>>, vector<8x1xf32>
    %c1_197 = arith.constant 1 : index
    %c0_198 = arith.constant 0 : index
    %292 = vector.load %arg11[%c1_197, %c0_198] : memref<8x128xf32, #tpu.memory_space<vmem>>, vector<1x128xf32>
    %293 = vector.broadcast %291 : vector<8x1xf32> to vector<8x128xf32>
    %294 = vector.broadcast %292 : vector<1x128xf32> to vector<8x128xf32>
    %295 = arith.mulf %293, %294 : vector<8x128xf32>
    %296 = arith.addf %290, %295 : vector<8x128xf32>
    %c0_199 = arith.constant 0 : index
    %c2_200 = arith.constant 2 : index
    %297 = vector.load %arg7[%c0_199, %c2_200] : memref<8x8xf32, #tpu.memory_space<vmem>>, vector<8x1xf32>
    %c2_201 = arith.constant 2 : index
    %c0_202 = arith.constant 0 : index
    %298 = vector.load %arg11[%c2_201, %c0_202] : memref<8x128xf32, #tpu.memory_space<vmem>>, vector<1x128xf32>
    %299 = vector.broadcast %297 : vector<8x1xf32> to vector<8x128xf32>
    %300 = vector.broadcast %298 : vector<1x128xf32> to vector<8x128xf32>
    %301 = arith.mulf %299, %300 : vector<8x128xf32>
    %302 = arith.addf %296, %301 : vector<8x128xf32>
    %c0_203 = arith.constant 0 : index
    %c3_204 = arith.constant 3 : index
    %303 = vector.load %arg7[%c0_203, %c3_204] : memref<8x8xf32, #tpu.memory_space<vmem>>, vector<8x1xf32>
    %c3_205 = arith.constant 3 : index
    %c0_206 = arith.constant 0 : index
    %304 = vector.load %arg11[%c3_205, %c0_206] : memref<8x128xf32, #tpu.memory_space<vmem>>, vector<1x128xf32>
    %305 = vector.broadcast %303 : vector<8x1xf32> to vector<8x128xf32>
    %306 = vector.broadcast %304 : vector<1x128xf32> to vector<8x128xf32>
    %307 = arith.mulf %305, %306 : vector<8x128xf32>
    %308 = arith.addf %302, %307 : vector<8x128xf32>
    %c0_207 = arith.constant 0 : index
    %c4_208 = arith.constant 4 : index
    %309 = vector.load %arg7[%c0_207, %c4_208] : memref<8x8xf32, #tpu.memory_space<vmem>>, vector<8x1xf32>
    %c4_209 = arith.constant 4 : index
    %c0_210 = arith.constant 0 : index
    %310 = vector.load %arg11[%c4_209, %c0_210] : memref<8x128xf32, #tpu.memory_space<vmem>>, vector<1x128xf32>
    %311 = vector.broadcast %309 : vector<8x1xf32> to vector<8x128xf32>
    %312 = vector.broadcast %310 : vector<1x128xf32> to vector<8x128xf32>
    %313 = arith.mulf %311, %312 : vector<8x128xf32>
    %314 = arith.addf %308, %313 : vector<8x128xf32>
    %c0_211 = arith.constant 0 : index
    %c5_212 = arith.constant 5 : index
    %315 = vector.load %arg7[%c0_211, %c5_212] : memref<8x8xf32, #tpu.memory_space<vmem>>, vector<8x1xf32>
    %c5_213 = arith.constant 5 : index
    %c0_214 = arith.constant 0 : index
    %316 = vector.load %arg11[%c5_213, %c0_214] : memref<8x128xf32, #tpu.memory_space<vmem>>, vector<1x128xf32>
    %317 = vector.broadcast %315 : vector<8x1xf32> to vector<8x128xf32>
    %318 = vector.broadcast %316 : vector<1x128xf32> to vector<8x128xf32>
    %319 = arith.mulf %317, %318 : vector<8x128xf32>
    %320 = arith.addf %314, %319 : vector<8x128xf32>
    %c0_215 = arith.constant 0 : index
    %c6_216 = arith.constant 6 : index
    %321 = vector.load %arg7[%c0_215, %c6_216] : memref<8x8xf32, #tpu.memory_space<vmem>>, vector<8x1xf32>
    %c6_217 = arith.constant 6 : index
    %c0_218 = arith.constant 0 : index
    %322 = vector.load %arg11[%c6_217, %c0_218] : memref<8x128xf32, #tpu.memory_space<vmem>>, vector<1x128xf32>
    %323 = vector.broadcast %321 : vector<8x1xf32> to vector<8x128xf32>
    %324 = vector.broadcast %322 : vector<1x128xf32> to vector<8x128xf32>
    %325 = arith.mulf %323, %324 : vector<8x128xf32>
    %326 = arith.addf %320, %325 : vector<8x128xf32>
    %c0_219 = arith.constant 0 : index
    %c7_220 = arith.constant 7 : index
    %327 = vector.load %arg7[%c0_219, %c7_220] : memref<8x8xf32, #tpu.memory_space<vmem>>, vector<8x1xf32>
    %c7_221 = arith.constant 7 : index
    %c0_222 = arith.constant 0 : index
    %328 = vector.load %arg11[%c7_221, %c0_222] : memref<8x128xf32, #tpu.memory_space<vmem>>, vector<1x128xf32>
    %329 = vector.broadcast %327 : vector<8x1xf32> to vector<8x128xf32>
    %330 = vector.broadcast %328 : vector<1x128xf32> to vector<8x128xf32>
    %331 = arith.mulf %329, %330 : vector<8x128xf32>
    %332 = arith.addf %326, %331 : vector<8x128xf32>
    %c0_223 = arith.constant 0 : index
    %c0_224 = arith.constant 0 : index
    %c0_225 = arith.constant 0 : index
    %333 = vector.load %arg10[%c0_223, %c0_224, %c0_225] : memref<1x8x128xf32, #tpu.memory_space<vmem>>, vector<1x8x128xf32>
    %334 = vector.shape_cast %333 : vector<1x8x128xf32> to vector<8x128xf32>
    %335 = vector.shape_cast %332 : vector<8x128xf32> to vector<1x8x128xf32>
    tpu.vector_store %arg10[%c0_223, %c0_224, %c0_225], %335 {strides = array<i32>} : memref<1x8x128xf32, #tpu.memory_space<vmem>>, vector<1x8x128xf32>,
    return
  }
  func.func @transform_0(%arg0: i32) -> (i32, i32, i32) {
    %c-2_i32 = arith.constant -2 : i32
    %0 = arith.addi %arg0, %c-2_i32 : i32
    %c0_i32 = arith.constant 0 : i32
    %c7_i32 = arith.constant 7 : i32
    %1 = arith.maxsi %c0_i32, %0 : i32
    %2 = arith.minsi %c7_i32, %1 : i32
    %c0_i32_0 = arith.constant 0 : i32
    %c0_i32_1 = arith.constant 0 : i32
    %c0_i32_2 = arith.constant 0 : i32
    return %2, %c0_i32_0, %c0_i32_1 : i32, i32, i32
  }
  func.func @transform_1(%arg0: i32) -> (i32, i32, i32) {
    %c0_i32 = arith.constant 0 : i32
    %0 = arith.addi %arg0, %c0_i32 : i32
    %c0_i32_0 = arith.constant 0 : i32
    %c7_i32 = arith.constant 7 : i32
    %1 = arith.maxsi %c0_i32_0, %0 : i32
    %2 = arith.minsi %c7_i32, %1 : i32
    %c0_i32_1 = arith.constant 0 : i32
    %c0_i32_2 = arith.constant 0 : i32
    %c0_i32_3 = arith.constant 0 : i32
    return %2, %c0_i32_1, %c0_i32_2 : i32, i32, i32
  }
  func.func @transform_2(%arg0: i32) -> (i32, i32, i32) {
    %c2_i32 = arith.constant 2 : i32
    %0 = arith.addi %arg0, %c2_i32 : i32
    %c0_i32 = arith.constant 0 : i32
    %c7_i32 = arith.constant 7 : i32
    %1 = arith.maxsi %c0_i32, %0 : i32
    %2 = arith.minsi %c7_i32, %1 : i32
    %c0_i32_0 = arith.constant 0 : i32
    %c0_i32_1 = arith.constant 0 : i32
    %c0_i32_2 = arith.constant 0 : i32
    return %2, %c0_i32_0, %c0_i32_1 : i32, i32, i32
  }
  func.func @transform_3(%arg0: i32) -> (i32, i32) {
    %c0_i32 = arith.constant 0 : i32
    %c0_i32_0 = arith.constant 0 : i32
    %c0_i32_1 = arith.constant 0 : i32
    return %c0_i32, %c0_i32_0 : i32, i32
  }
  func.func @transform_4(%arg0: i32) -> (i32, i32) {
    %c0_i32 = arith.constant 0 : i32
    %c0_i32_0 = arith.constant 0 : i32
    %c0_i32_1 = arith.constant 0 : i32
    return %c0_i32, %c0_i32_0 : i32, i32
  }
  func.func @transform_5(%arg0: i32) -> (i32, i32) {
    %c0_i32 = arith.constant 0 : i32
    %c0_i32_0 = arith.constant 0 : i32
    %c0_i32_1 = arith.constant 0 : i32
    return %c0_i32, %c0_i32_0 : i32, i32
  }
  func.func @transform_6(%arg0: i32) -> (i32, i32) {
    %c0_i32 = arith.constant 0 : i32
    %c0_i32_0 = arith.constant 0 : i32
    %c0_i32_1 = arith.constant 0 : i32
    return %c0_i32, %c0_i32_0 : i32, i32
  }
  func.func @transform_7(%arg0: i32) -> (i32, i32) {
    %c0_i32 = arith.constant 0 : i32
    %c0_i32_0 = arith.constant 0 : i32
    %c0_i32_1 = arith.constant 0 : i32
    return %c0_i32, %c0_i32_0 : i32, i32
  }
  func.func @transform_8(%arg0: i32) -> (i32, i32) {
    %c0_i32 = arith.constant 0 : i32
    %c0_i32_0 = arith.constant 0 : i32
    %c0_i32_1 = arith.constant 0 : i32
    return %c0_i32, %c0_i32_0 : i32, i32
  }
  func.func @transform_9(%arg0: i32) -> (i32, i32, i32) {
    %c0_i32 = arith.constant 0 : i32
    %c0_i32_0 = arith.constant 0 : i32
    %c0_i32_1 = arith.constant 0 : i32
    return %arg0, %c0_i32, %c0_i32_0 : i32, i32, i32
  }
}

module attributes {stable_mosaic.version = 11 : i64} {
  func.func @_layer_kernel(%arg0: i32, %arg1: memref<1x8x128xf32, #tpu.memory_space<vmem>>, %arg2: memref<1x8x128xf32, #tpu.memory_space<vmem>>, %arg3: memref<1x8x128xf32, #tpu.memory_space<vmem>>, %arg4: memref<8x27xf32, #tpu.memory_space<vmem>>, %arg5: memref<8x1xf32, #tpu.memory_space<vmem>>, %arg6: memref<8x1xf32, #tpu.memory_space<vmem>>, %arg7: memref<8x8xf32, #tpu.memory_space<vmem>>, %arg8: memref<8x1xf32, #tpu.memory_space<vmem>>, %arg9: memref<9x128xf32, #tpu.memory_space<vmem>>, %arg10: memref<1x8x128xf32, #tpu.memory_space<vmem>>, %arg11: memref<8x128xf32, #tpu.memory_space<vmem>>) attributes {dimension_semantics = [#tpu.dimension_semantics<parallel>], iteration_bounds = array<i64: 8>, scalar_prefetch = 0 : i64, scratch_operands = 1 : i64, tpu.core_type = #tpu.core_type<tc>, window_params = [{transform_indices = @transform_0, window_bounds = array<i64: 1, 8, 128>}, {transform_indices = @transform_1, window_bounds = array<i64: 1, 8, 128>}, {transform_indices = @transform_2, window_bounds = array<i64: 1, 8, 128>}, {pipeline_mode = #tpu.pipeline_mode<synchronous>, transform_indices = @transform_3, window_bounds = array<i64: 8, 27>}, {pipeline_mode = #tpu.pipeline_mode<synchronous>, transform_indices = @transform_4, window_bounds = array<i64: 8, 1>}, {pipeline_mode = #tpu.pipeline_mode<synchronous>, transform_indices = @transform_5, window_bounds = array<i64: 8, 1>}, {pipeline_mode = #tpu.pipeline_mode<synchronous>, transform_indices = @transform_6, window_bounds = array<i64: 8, 8>}, {pipeline_mode = #tpu.pipeline_mode<synchronous>, transform_indices = @transform_7, window_bounds = array<i64: 8, 1>}, {pipeline_mode = #tpu.pipeline_mode<synchronous>, transform_indices = @transform_8, window_bounds = array<i64: 9, 128>}, {transform_indices = @transform_9, window_bounds = array<i64: 1, 8, 128>}]} {
    %c-4_i32 = arith.constant -4 : i32
    %0 = arith.addi %arg0, %c-4_i32 : i32
    %c0_i32 = arith.constant 0 : i32
    %1 = arith.cmpi sge, %0, %c0_i32 : i32
    %c7_i32 = arith.constant 7 : i32
    %2 = arith.cmpi sle, %0, %c7_i32 : i32
    %3 = arith.andi %1, %2 : i1
    %cst = arith.constant 1.000000e+00 : f32
    %cst_0 = arith.constant 0.000000e+00 : f32
    %4 = arith.select %3, %cst, %cst_0 : f32
    %c4_i32 = arith.constant 4 : i32
    %5 = arith.addi %arg0, %c4_i32 : i32
    %c0_i32_1 = arith.constant 0 : i32
    %6 = arith.cmpi sge, %5, %c0_i32_1 : i32
    %c7_i32_2 = arith.constant 7 : i32
    %7 = arith.cmpi sle, %5, %c7_i32_2 : i32
    %8 = arith.andi %6, %7 : i1
    %cst_3 = arith.constant 1.000000e+00 : f32
    %cst_4 = arith.constant 0.000000e+00 : f32
    %9 = arith.select %8, %cst_3, %cst_4 : f32
    %cst_5 = arith.constant 0.000000e+00 : f32
    %10 = vector.broadcast %cst_5 : f32 to vector<8x128xf32>
    %c0 = arith.constant 0 : index
    %c0_6 = arith.constant 0 : index
    %11 = vector.load %arg11[%c0, %c0_6] : memref<8x128xf32, #tpu.memory_space<vmem>>, vector<8x128xf32>
    tpu.vector_store %arg11[%c0, %c0_6], %10 {strides = array<i32>} : memref<8x128xf32, #tpu.memory_space<vmem>>, vector<8x128xf32>,
    %cst_7 = arith.constant 0.000000e+00 : f32
    %12 = vector.broadcast %cst_7 : f32 to vector<8x119xf32>
    %c0_8 = arith.constant 0 : index
    %c0_9 = arith.constant 0 : index
    %13 = vector.load %arg4[%c0_8, %c0_9] : memref<8x27xf32, #tpu.memory_space<vmem>>, vector<8x1xf32>
    %14 = vector.broadcast %4 : f32 to vector<8x1xf32>
    %15 = arith.mulf %13, %14 : vector<8x1xf32>
    %c0_10 = arith.constant 0 : index
    %c0_11 = arith.constant 0 : index
    %c0_12 = arith.constant 0 : index
    %16 = vector.load %arg1[%c0_10, %c0_11, %c0_12] : memref<1x8x128xf32, #tpu.memory_space<vmem>>, vector<1x8x119xf32>
    %17 = vector.shape_cast %16 : vector<1x8x119xf32> to vector<8x119xf32>
    %18 = vector.broadcast %15 : vector<8x1xf32> to vector<8x119xf32>
    %19 = arith.mulf %17, %18 : vector<8x119xf32>
    %20 = arith.addf %12, %19 : vector<8x119xf32>
    %c0_13 = arith.constant 0 : index
    %c9 = arith.constant 9 : index
    %21 = vector.load %arg4[%c0_13, %c9] : memref<8x27xf32, #tpu.memory_space<vmem>>, vector<8x1xf32>
    %c0_14 = arith.constant 0 : index
    %c0_15 = arith.constant 0 : index
    %c0_16 = arith.constant 0 : index
    %22 = vector.load %arg2[%c0_14, %c0_15, %c0_16] : memref<1x8x128xf32, #tpu.memory_space<vmem>>, vector<1x8x119xf32>
    %23 = vector.shape_cast %22 : vector<1x8x119xf32> to vector<8x119xf32>
    %24 = vector.broadcast %21 : vector<8x1xf32> to vector<8x119xf32>
    %25 = arith.mulf %23, %24 : vector<8x119xf32>
    %26 = arith.addf %20, %25 : vector<8x119xf32>
    %c0_17 = arith.constant 0 : index
    %c18 = arith.constant 18 : index
    %27 = vector.load %arg4[%c0_17, %c18] : memref<8x27xf32, #tpu.memory_space<vmem>>, vector<8x1xf32>
    %28 = vector.broadcast %9 : f32 to vector<8x1xf32>
    %29 = arith.mulf %27, %28 : vector<8x1xf32>
    %c0_18 = arith.constant 0 : index
    %c0_19 = arith.constant 0 : index
    %c0_20 = arith.constant 0 : index
    %30 = vector.load %arg3[%c0_18, %c0_19, %c0_20] : memref<1x8x128xf32, #tpu.memory_space<vmem>>, vector<1x8x119xf32>
    %31 = vector.shape_cast %30 : vector<1x8x119xf32> to vector<8x119xf32>
    %32 = vector.broadcast %29 : vector<8x1xf32> to vector<8x119xf32>
    %33 = arith.mulf %31, %32 : vector<8x119xf32>
    %34 = arith.addf %26, %33 : vector<8x119xf32>
    %c0_21 = arith.constant 0 : index
    %c9_22 = arith.constant 9 : index
    %35 = vector.load %arg9[%c0_21, %c9_22] : memref<9x128xf32, #tpu.memory_space<vmem>>, vector<1x119xf32>
    %36 = vector.broadcast %35 : vector<1x119xf32> to vector<8x119xf32>
    %37 = arith.mulf %34, %36 : vector<8x119xf32>
    %c0_23 = arith.constant 0 : index
    %c9_24 = arith.constant 9 : index
    %38 = vector.load %arg11[%c0_23, %c9_24] : memref<8x128xf32, #tpu.memory_space<vmem>>, vector<8x119xf32>
    %39 = arith.addf %38, %37 : vector<8x119xf32>
    %c0_25 = arith.constant 0 : index
    %c9_26 = arith.constant 9 : index
    %40 = vector.load %arg11[%c0_25, %c9_26] : memref<8x128xf32, #tpu.memory_space<vmem>>, vector<8x119xf32>
    tpu.vector_store %arg11[%c0_25, %c9_26], %39 {strides = array<i32>} : memref<8x128xf32, #tpu.memory_space<vmem>>, vector<8x119xf32>,
    %cst_27 = arith.constant 0.000000e+00 : f32
    %41 = vector.broadcast %cst_27 : f32 to vector<8x120xf32>
    %c0_28 = arith.constant 0 : index
    %c1 = arith.constant 1 : index
    %42 = vector.load %arg4[%c0_28, %c1] : memref<8x27xf32, #tpu.memory_space<vmem>>, vector<8x1xf32>
    %43 = vector.broadcast %4 : f32 to vector<8x1xf32>
    %44 = arith.mulf %42, %43 : vector<8x1xf32>
    %c0_29 = arith.constant 0 : index
    %c0_30 = arith.constant 0 : index
    %c0_31 = arith.constant 0 : index
    %45 = vector.load %arg1[%c0_29, %c0_30, %c0_31] : memref<1x8x128xf32, #tpu.memory_space<vmem>>, vector<1x8x120xf32>
    %46 = vector.shape_cast %45 : vector<1x8x120xf32> to vector<8x120xf32>
    %47 = vector.broadcast %44 : vector<8x1xf32> to vector<8x120xf32>
    %48 = arith.mulf %46, %47 : vector<8x120xf32>
    %49 = arith.addf %41, %48 : vector<8x120xf32>
    %c0_32 = arith.constant 0 : index
    %c10 = arith.constant 10 : index
    %50 = vector.load %arg4[%c0_32, %c10] : memref<8x27xf32, #tpu.memory_space<vmem>>, vector<8x1xf32>
    %c0_33 = arith.constant 0 : index
    %c0_34 = arith.constant 0 : index
    %c0_35 = arith.constant 0 : index
    %51 = vector.load %arg2[%c0_33, %c0_34, %c0_35] : memref<1x8x128xf32, #tpu.memory_space<vmem>>, vector<1x8x120xf32>
    %52 = vector.shape_cast %51 : vector<1x8x120xf32> to vector<8x120xf32>
    %53 = vector.broadcast %50 : vector<8x1xf32> to vector<8x120xf32>
    %54 = arith.mulf %52, %53 : vector<8x120xf32>
    %55 = arith.addf %49, %54 : vector<8x120xf32>
    %c0_36 = arith.constant 0 : index
    %c19 = arith.constant 19 : index
    %56 = vector.load %arg4[%c0_36, %c19] : memref<8x27xf32, #tpu.memory_space<vmem>>, vector<8x1xf32>
    %57 = vector.broadcast %9 : f32 to vector<8x1xf32>
    %58 = arith.mulf %56, %57 : vector<8x1xf32>
    %c0_37 = arith.constant 0 : index
    %c0_38 = arith.constant 0 : index
    %c0_39 = arith.constant 0 : index
    %59 = vector.load %arg3[%c0_37, %c0_38, %c0_39] : memref<1x8x128xf32, #tpu.memory_space<vmem>>, vector<1x8x120xf32>
    %60 = vector.shape_cast %59 : vector<1x8x120xf32> to vector<8x120xf32>
    %61 = vector.broadcast %58 : vector<8x1xf32> to vector<8x120xf32>
    %62 = arith.mulf %60, %61 : vector<8x120xf32>
    %63 = arith.addf %55, %62 : vector<8x120xf32>
    %c1_40 = arith.constant 1 : index
    %c8 = arith.constant 8 : index
    %64 = vector.load %arg9[%c1_40, %c8] : memref<9x128xf32, #tpu.memory_space<vmem>>, vector<1x120xf32>
    %65 = vector.broadcast %64 : vector<1x120xf32> to vector<8x120xf32>
    %66 = arith.mulf %63, %65 : vector<8x120xf32>
    %c0_41 = arith.constant 0 : index
    %c8_42 = arith.constant 8 : index
    %67 = vector.load %arg11[%c0_41, %c8_42] : memref<8x128xf32, #tpu.memory_space<vmem>>, vector<8x120xf32>
    %68 = arith.addf %67, %66 : vector<8x120xf32>
    %c0_43 = arith.constant 0 : index
    %c8_44 = arith.constant 8 : index
    %69 = vector.load %arg11[%c0_43, %c8_44] : memref<8x128xf32, #tpu.memory_space<vmem>>, vector<8x120xf32>
    tpu.vector_store %arg11[%c0_43, %c8_44], %68 {strides = array<i32>} : memref<8x128xf32, #tpu.memory_space<vmem>>, vector<8x120xf32>,
    %cst_45 = arith.constant 0.000000e+00 : f32
    %70 = vector.broadcast %cst_45 : f32 to vector<8x121xf32>
    %c0_46 = arith.constant 0 : index
    %c2 = arith.constant 2 : index
    %71 = vector.load %arg4[%c0_46, %c2] : memref<8x27xf32, #tpu.memory_space<vmem>>, vector<8x1xf32>
    %72 = vector.broadcast %4 : f32 to vector<8x1xf32>
    %73 = arith.mulf %71, %72 : vector<8x1xf32>
    %c0_47 = arith.constant 0 : index
    %c0_48 = arith.constant 0 : index
    %c0_49 = arith.constant 0 : index
    %74 = vector.load %arg1[%c0_47, %c0_48, %c0_49] : memref<1x8x128xf32, #tpu.memory_space<vmem>>, vector<1x8x121xf32>
    %75 = vector.shape_cast %74 : vector<1x8x121xf32> to vector<8x121xf32>
    %76 = vector.broadcast %73 : vector<8x1xf32> to vector<8x121xf32>
    %77 = arith.mulf %75, %76 : vector<8x121xf32>
    %78 = arith.addf %70, %77 : vector<8x121xf32>
    %c0_50 = arith.constant 0 : index
    %c11 = arith.constant 11 : index
    %79 = vector.load %arg4[%c0_50, %c11] : memref<8x27xf32, #tpu.memory_space<vmem>>, vector<8x1xf32>
    %c0_51 = arith.constant 0 : index
    %c0_52 = arith.constant 0 : index
    %c0_53 = arith.constant 0 : index
    %80 = vector.load %arg2[%c0_51, %c0_52, %c0_53] : memref<1x8x128xf32, #tpu.memory_space<vmem>>, vector<1x8x121xf32>
    %81 = vector.shape_cast %80 : vector<1x8x121xf32> to vector<8x121xf32>
    %82 = vector.broadcast %79 : vector<8x1xf32> to vector<8x121xf32>
    %83 = arith.mulf %81, %82 : vector<8x121xf32>
    %84 = arith.addf %78, %83 : vector<8x121xf32>
    %c0_54 = arith.constant 0 : index
    %c20 = arith.constant 20 : index
    %85 = vector.load %arg4[%c0_54, %c20] : memref<8x27xf32, #tpu.memory_space<vmem>>, vector<8x1xf32>
    %86 = vector.broadcast %9 : f32 to vector<8x1xf32>
    %87 = arith.mulf %85, %86 : vector<8x1xf32>
    %c0_55 = arith.constant 0 : index
    %c0_56 = arith.constant 0 : index
    %c0_57 = arith.constant 0 : index
    %88 = vector.load %arg3[%c0_55, %c0_56, %c0_57] : memref<1x8x128xf32, #tpu.memory_space<vmem>>, vector<1x8x121xf32>
    %89 = vector.shape_cast %88 : vector<1x8x121xf32> to vector<8x121xf32>
    %90 = vector.broadcast %87 : vector<8x1xf32> to vector<8x121xf32>
    %91 = arith.mulf %89, %90 : vector<8x121xf32>
    %92 = arith.addf %84, %91 : vector<8x121xf32>
    %c2_58 = arith.constant 2 : index
    %c7 = arith.constant 7 : index
    %93 = vector.load %arg9[%c2_58, %c7] : memref<9x128xf32, #tpu.memory_space<vmem>>, vector<1x121xf32>
    %94 = vector.broadcast %93 : vector<1x121xf32> to vector<8x121xf32>
    %95 = arith.mulf %92, %94 : vector<8x121xf32>
    %c0_59 = arith.constant 0 : index
    %c7_60 = arith.constant 7 : index
    %96 = vector.load %arg11[%c0_59, %c7_60] : memref<8x128xf32, #tpu.memory_space<vmem>>, vector<8x121xf32>
    %97 = arith.addf %96, %95 : vector<8x121xf32>
    %c0_61 = arith.constant 0 : index
    %c7_62 = arith.constant 7 : index
    %98 = vector.load %arg11[%c0_61, %c7_62] : memref<8x128xf32, #tpu.memory_space<vmem>>, vector<8x121xf32>
    tpu.vector_store %arg11[%c0_61, %c7_62], %97 {strides = array<i32>} : memref<8x128xf32, #tpu.memory_space<vmem>>, vector<8x121xf32>,
    %cst_63 = arith.constant 0.000000e+00 : f32
    %99 = vector.broadcast %cst_63 : f32 to vector<8x127xf32>
    %c0_64 = arith.constant 0 : index
    %c3 = arith.constant 3 : index
    %100 = vector.load %arg4[%c0_64, %c3] : memref<8x27xf32, #tpu.memory_space<vmem>>, vector<8x1xf32>
    %101 = vector.broadcast %4 : f32 to vector<8x1xf32>
    %102 = arith.mulf %100, %101 : vector<8x1xf32>
    %c0_65 = arith.constant 0 : index
    %c0_66 = arith.constant 0 : index
    %c0_67 = arith.constant 0 : index
    %103 = vector.load %arg1[%c0_65, %c0_66, %c0_67] : memref<1x8x128xf32, #tpu.memory_space<vmem>>, vector<1x8x127xf32>
    %104 = vector.shape_cast %103 : vector<1x8x127xf32> to vector<8x127xf32>
    %105 = vector.broadcast %102 : vector<8x1xf32> to vector<8x127xf32>
    %106 = arith.mulf %104, %105 : vector<8x127xf32>
    %107 = arith.addf %99, %106 : vector<8x127xf32>
    %c0_68 = arith.constant 0 : index
    %c12 = arith.constant 12 : index
    %108 = vector.load %arg4[%c0_68, %c12] : memref<8x27xf32, #tpu.memory_space<vmem>>, vector<8x1xf32>
    %c0_69 = arith.constant 0 : index
    %c0_70 = arith.constant 0 : index
    %c0_71 = arith.constant 0 : index
    %109 = vector.load %arg2[%c0_69, %c0_70, %c0_71] : memref<1x8x128xf32, #tpu.memory_space<vmem>>, vector<1x8x127xf32>
    %110 = vector.shape_cast %109 : vector<1x8x127xf32> to vector<8x127xf32>
    %111 = vector.broadcast %108 : vector<8x1xf32> to vector<8x127xf32>
    %112 = arith.mulf %110, %111 : vector<8x127xf32>
    %113 = arith.addf %107, %112 : vector<8x127xf32>
    %c0_72 = arith.constant 0 : index
    %c21 = arith.constant 21 : index
    %114 = vector.load %arg4[%c0_72, %c21] : memref<8x27xf32, #tpu.memory_space<vmem>>, vector<8x1xf32>
    %115 = vector.broadcast %9 : f32 to vector<8x1xf32>
    %116 = arith.mulf %114, %115 : vector<8x1xf32>
    %c0_73 = arith.constant 0 : index
    %c0_74 = arith.constant 0 : index
    %c0_75 = arith.constant 0 : index
    %117 = vector.load %arg3[%c0_73, %c0_74, %c0_75] : memref<1x8x128xf32, #tpu.memory_space<vmem>>, vector<1x8x127xf32>
    %118 = vector.shape_cast %117 : vector<1x8x127xf32> to vector<8x127xf32>
    %119 = vector.broadcast %116 : vector<8x1xf32> to vector<8x127xf32>
    %120 = arith.mulf %118, %119 : vector<8x127xf32>
    %121 = arith.addf %113, %120 : vector<8x127xf32>
    %c3_76 = arith.constant 3 : index
    %c1_77 = arith.constant 1 : index
    %122 = vector.load %arg9[%c3_76, %c1_77] : memref<9x128xf32, #tpu.memory_space<vmem>>, vector<1x127xf32>
    %123 = vector.broadcast %122 : vector<1x127xf32> to vector<8x127xf32>
    %124 = arith.mulf %121, %123 : vector<8x127xf32>
    %c0_78 = arith.constant 0 : index
    %c1_79 = arith.constant 1 : index
    %125 = vector.load %arg11[%c0_78, %c1_79] : memref<8x128xf32, #tpu.memory_space<vmem>>, vector<8x127xf32>
    %126 = arith.addf %125, %124 : vector<8x127xf32>
    %c0_80 = arith.constant 0 : index
    %c1_81 = arith.constant 1 : index
    %127 = vector.load %arg11[%c0_80, %c1_81] : memref<8x128xf32, #tpu.memory_space<vmem>>, vector<8x127xf32>
    tpu.vector_store %arg11[%c0_80, %c1_81], %126 {strides = array<i32>} : memref<8x128xf32, #tpu.memory_space<vmem>>, vector<8x127xf32>,
    %cst_82 = arith.constant 0.000000e+00 : f32
    %128 = vector.broadcast %cst_82 : f32 to vector<8x128xf32>
    %c0_83 = arith.constant 0 : index
    %c4 = arith.constant 4 : index
    %129 = vector.load %arg4[%c0_83, %c4] : memref<8x27xf32, #tpu.memory_space<vmem>>, vector<8x1xf32>
    %130 = vector.broadcast %4 : f32 to vector<8x1xf32>
    %131 = arith.mulf %129, %130 : vector<8x1xf32>
    %c0_84 = arith.constant 0 : index
    %c0_85 = arith.constant 0 : index
    %c0_86 = arith.constant 0 : index
    %132 = vector.load %arg1[%c0_84, %c0_85, %c0_86] : memref<1x8x128xf32, #tpu.memory_space<vmem>>, vector<1x8x128xf32>
    %133 = vector.shape_cast %132 : vector<1x8x128xf32> to vector<8x128xf32>
    %134 = vector.broadcast %131 : vector<8x1xf32> to vector<8x128xf32>
    %135 = arith.mulf %133, %134 : vector<8x128xf32>
    %136 = arith.addf %128, %135 : vector<8x128xf32>
    %c0_87 = arith.constant 0 : index
    %c13 = arith.constant 13 : index
    %137 = vector.load %arg4[%c0_87, %c13] : memref<8x27xf32, #tpu.memory_space<vmem>>, vector<8x1xf32>
    %c0_88 = arith.constant 0 : index
    %c0_89 = arith.constant 0 : index
    %c0_90 = arith.constant 0 : index
    %138 = vector.load %arg2[%c0_88, %c0_89, %c0_90] : memref<1x8x128xf32, #tpu.memory_space<vmem>>, vector<1x8x128xf32>
    %139 = vector.shape_cast %138 : vector<1x8x128xf32> to vector<8x128xf32>
    %140 = vector.broadcast %137 : vector<8x1xf32> to vector<8x128xf32>
    %141 = arith.mulf %139, %140 : vector<8x128xf32>
    %142 = arith.addf %136, %141 : vector<8x128xf32>
    %c0_91 = arith.constant 0 : index
    %c22 = arith.constant 22 : index
    %143 = vector.load %arg4[%c0_91, %c22] : memref<8x27xf32, #tpu.memory_space<vmem>>, vector<8x1xf32>
    %144 = vector.broadcast %9 : f32 to vector<8x1xf32>
    %145 = arith.mulf %143, %144 : vector<8x1xf32>
    %c0_92 = arith.constant 0 : index
    %c0_93 = arith.constant 0 : index
    %c0_94 = arith.constant 0 : index
    %146 = vector.load %arg3[%c0_92, %c0_93, %c0_94] : memref<1x8x128xf32, #tpu.memory_space<vmem>>, vector<1x8x128xf32>
    %147 = vector.shape_cast %146 : vector<1x8x128xf32> to vector<8x128xf32>
    %148 = vector.broadcast %145 : vector<8x1xf32> to vector<8x128xf32>
    %149 = arith.mulf %147, %148 : vector<8x128xf32>
    %150 = arith.addf %142, %149 : vector<8x128xf32>
    %c0_95 = arith.constant 0 : index
    %c0_96 = arith.constant 0 : index
    %151 = vector.load %arg11[%c0_95, %c0_96] : memref<8x128xf32, #tpu.memory_space<vmem>>, vector<8x128xf32>
    %152 = arith.addf %151, %150 : vector<8x128xf32>
    %c0_97 = arith.constant 0 : index
    %c0_98 = arith.constant 0 : index
    %153 = vector.load %arg11[%c0_97, %c0_98] : memref<8x128xf32, #tpu.memory_space<vmem>>, vector<8x128xf32>
    tpu.vector_store %arg11[%c0_97, %c0_98], %152 {strides = array<i32>} : memref<8x128xf32, #tpu.memory_space<vmem>>, vector<8x128xf32>,
    %cst_99 = arith.constant 0.000000e+00 : f32
    %154 = vector.broadcast %cst_99 : f32 to vector<8x127xf32>
    %c0_100 = arith.constant 0 : index
    %c5 = arith.constant 5 : index
    %155 = vector.load %arg4[%c0_100, %c5] : memref<8x27xf32, #tpu.memory_space<vmem>>, vector<8x1xf32>
    %156 = vector.broadcast %4 : f32 to vector<8x1xf32>
    %157 = arith.mulf %155, %156 : vector<8x1xf32>
    %c0_101 = arith.constant 0 : index
    %c0_102 = arith.constant 0 : index
    %c1_103 = arith.constant 1 : index
    %158 = vector.load %arg1[%c0_101, %c0_102, %c1_103] : memref<1x8x128xf32, #tpu.memory_space<vmem>>, vector<1x8x127xf32>
    %159 = vector.shape_cast %158 : vector<1x8x127xf32> to vector<8x127xf32>
    %160 = vector.broadcast %157 : vector<8x1xf32> to vector<8x127xf32>
    %161 = arith.mulf %159, %160 : vector<8x127xf32>
    %162 = arith.addf %154, %161 : vector<8x127xf32>
    %c0_104 = arith.constant 0 : index
    %c14 = arith.constant 14 : index
    %163 = vector.load %arg4[%c0_104, %c14] : memref<8x27xf32, #tpu.memory_space<vmem>>, vector<8x1xf32>
    %c0_105 = arith.constant 0 : index
    %c0_106 = arith.constant 0 : index
    %c1_107 = arith.constant 1 : index
    %164 = vector.load %arg2[%c0_105, %c0_106, %c1_107] : memref<1x8x128xf32, #tpu.memory_space<vmem>>, vector<1x8x127xf32>
    %165 = vector.shape_cast %164 : vector<1x8x127xf32> to vector<8x127xf32>
    %166 = vector.broadcast %163 : vector<8x1xf32> to vector<8x127xf32>
    %167 = arith.mulf %165, %166 : vector<8x127xf32>
    %168 = arith.addf %162, %167 : vector<8x127xf32>
    %c0_108 = arith.constant 0 : index
    %c23 = arith.constant 23 : index
    %169 = vector.load %arg4[%c0_108, %c23] : memref<8x27xf32, #tpu.memory_space<vmem>>, vector<8x1xf32>
    %170 = vector.broadcast %9 : f32 to vector<8x1xf32>
    %171 = arith.mulf %169, %170 : vector<8x1xf32>
    %c0_109 = arith.constant 0 : index
    %c0_110 = arith.constant 0 : index
    %c1_111 = arith.constant 1 : index
    %172 = vector.load %arg3[%c0_109, %c0_110, %c1_111] : memref<1x8x128xf32, #tpu.memory_space<vmem>>, vector<1x8x127xf32>
    %173 = vector.shape_cast %172 : vector<1x8x127xf32> to vector<8x127xf32>
    %174 = vector.broadcast %171 : vector<8x1xf32> to vector<8x127xf32>
    %175 = arith.mulf %173, %174 : vector<8x127xf32>
    %176 = arith.addf %168, %175 : vector<8x127xf32>
    %c5_112 = arith.constant 5 : index
    %c0_113 = arith.constant 0 : index
    %177 = vector.load %arg9[%c5_112, %c0_113] : memref<9x128xf32, #tpu.memory_space<vmem>>, vector<1x127xf32>
    %178 = vector.broadcast %177 : vector<1x127xf32> to vector<8x127xf32>
    %179 = arith.mulf %176, %178 : vector<8x127xf32>
    %c0_114 = arith.constant 0 : index
    %c0_115 = arith.constant 0 : index
    %180 = vector.load %arg11[%c0_114, %c0_115] : memref<8x128xf32, #tpu.memory_space<vmem>>, vector<8x127xf32>
    %181 = arith.addf %180, %179 : vector<8x127xf32>
    %c0_116 = arith.constant 0 : index
    %c0_117 = arith.constant 0 : index
    %182 = vector.load %arg11[%c0_116, %c0_117] : memref<8x128xf32, #tpu.memory_space<vmem>>, vector<8x127xf32>
    tpu.vector_store %arg11[%c0_116, %c0_117], %181 {strides = array<i32>} : memref<8x128xf32, #tpu.memory_space<vmem>>, vector<8x127xf32>,
    %cst_118 = arith.constant 0.000000e+00 : f32
    %183 = vector.broadcast %cst_118 : f32 to vector<8x121xf32>
    %c0_119 = arith.constant 0 : index
    %c6 = arith.constant 6 : index
    %184 = vector.load %arg4[%c0_119, %c6] : memref<8x27xf32, #tpu.memory_space<vmem>>, vector<8x1xf32>
    %185 = vector.broadcast %4 : f32 to vector<8x1xf32>
    %186 = arith.mulf %184, %185 : vector<8x1xf32>
    %c0_120 = arith.constant 0 : index
    %c0_121 = arith.constant 0 : index
    %c7_122 = arith.constant 7 : index
    %187 = vector.load %arg1[%c0_120, %c0_121, %c7_122] : memref<1x8x128xf32, #tpu.memory_space<vmem>>, vector<1x8x121xf32>
    %188 = vector.shape_cast %187 : vector<1x8x121xf32> to vector<8x121xf32>
    %189 = vector.broadcast %186 : vector<8x1xf32> to vector<8x121xf32>
    %190 = arith.mulf %188, %189 : vector<8x121xf32>
    %191 = arith.addf %183, %190 : vector<8x121xf32>
    %c0_123 = arith.constant 0 : index
    %c15 = arith.constant 15 : index
    %192 = vector.load %arg4[%c0_123, %c15] : memref<8x27xf32, #tpu.memory_space<vmem>>, vector<8x1xf32>
    %c0_124 = arith.constant 0 : index
    %c0_125 = arith.constant 0 : index
    %c7_126 = arith.constant 7 : index
    %193 = vector.load %arg2[%c0_124, %c0_125, %c7_126] : memref<1x8x128xf32, #tpu.memory_space<vmem>>, vector<1x8x121xf32>
    %194 = vector.shape_cast %193 : vector<1x8x121xf32> to vector<8x121xf32>
    %195 = vector.broadcast %192 : vector<8x1xf32> to vector<8x121xf32>
    %196 = arith.mulf %194, %195 : vector<8x121xf32>
    %197 = arith.addf %191, %196 : vector<8x121xf32>
    %c0_127 = arith.constant 0 : index
    %c24 = arith.constant 24 : index
    %198 = vector.load %arg4[%c0_127, %c24] : memref<8x27xf32, #tpu.memory_space<vmem>>, vector<8x1xf32>
    %199 = vector.broadcast %9 : f32 to vector<8x1xf32>
    %200 = arith.mulf %198, %199 : vector<8x1xf32>
    %c0_128 = arith.constant 0 : index
    %c0_129 = arith.constant 0 : index
    %c7_130 = arith.constant 7 : index
    %201 = vector.load %arg3[%c0_128, %c0_129, %c7_130] : memref<1x8x128xf32, #tpu.memory_space<vmem>>, vector<1x8x121xf32>
    %202 = vector.shape_cast %201 : vector<1x8x121xf32> to vector<8x121xf32>
    %203 = vector.broadcast %200 : vector<8x1xf32> to vector<8x121xf32>
    %204 = arith.mulf %202, %203 : vector<8x121xf32>
    %205 = arith.addf %197, %204 : vector<8x121xf32>
    %c6_131 = arith.constant 6 : index
    %c0_132 = arith.constant 0 : index
    %206 = vector.load %arg9[%c6_131, %c0_132] : memref<9x128xf32, #tpu.memory_space<vmem>>, vector<1x121xf32>
    %207 = vector.broadcast %206 : vector<1x121xf32> to vector<8x121xf32>
    %208 = arith.mulf %205, %207 : vector<8x121xf32>
    %c0_133 = arith.constant 0 : index
    %c0_134 = arith.constant 0 : index
    %209 = vector.load %arg11[%c0_133, %c0_134] : memref<8x128xf32, #tpu.memory_space<vmem>>, vector<8x121xf32>
    %210 = arith.addf %209, %208 : vector<8x121xf32>
    %c0_135 = arith.constant 0 : index
    %c0_136 = arith.constant 0 : index
    %211 = vector.load %arg11[%c0_135, %c0_136] : memref<8x128xf32, #tpu.memory_space<vmem>>, vector<8x121xf32>
    tpu.vector_store %arg11[%c0_135, %c0_136], %210 {strides = array<i32>} : memref<8x128xf32, #tpu.memory_space<vmem>>, vector<8x121xf32>,
    %cst_137 = arith.constant 0.000000e+00 : f32
    %212 = vector.broadcast %cst_137 : f32 to vector<8x120xf32>
    %c0_138 = arith.constant 0 : index
    %c7_139 = arith.constant 7 : index
    %213 = vector.load %arg4[%c0_138, %c7_139] : memref<8x27xf32, #tpu.memory_space<vmem>>, vector<8x1xf32>
    %214 = vector.broadcast %4 : f32 to vector<8x1xf32>
    %215 = arith.mulf %213, %214 : vector<8x1xf32>
    %c0_140 = arith.constant 0 : index
    %c0_141 = arith.constant 0 : index
    %c8_142 = arith.constant 8 : index
    %216 = vector.load %arg1[%c0_140, %c0_141, %c8_142] : memref<1x8x128xf32, #tpu.memory_space<vmem>>, vector<1x8x120xf32>
    %217 = vector.shape_cast %216 : vector<1x8x120xf32> to vector<8x120xf32>
    %218 = vector.broadcast %215 : vector<8x1xf32> to vector<8x120xf32>
    %219 = arith.mulf %217, %218 : vector<8x120xf32>
    %220 = arith.addf %212, %219 : vector<8x120xf32>
    %c0_143 = arith.constant 0 : index
    %c16 = arith.constant 16 : index
    %221 = vector.load %arg4[%c0_143, %c16] : memref<8x27xf32, #tpu.memory_space<vmem>>, vector<8x1xf32>
    %c0_144 = arith.constant 0 : index
    %c0_145 = arith.constant 0 : index
    %c8_146 = arith.constant 8 : index
    %222 = vector.load %arg2[%c0_144, %c0_145, %c8_146] : memref<1x8x128xf32, #tpu.memory_space<vmem>>, vector<1x8x120xf32>
    %223 = vector.shape_cast %222 : vector<1x8x120xf32> to vector<8x120xf32>
    %224 = vector.broadcast %221 : vector<8x1xf32> to vector<8x120xf32>
    %225 = arith.mulf %223, %224 : vector<8x120xf32>
    %226 = arith.addf %220, %225 : vector<8x120xf32>
    %c0_147 = arith.constant 0 : index
    %c25 = arith.constant 25 : index
    %227 = vector.load %arg4[%c0_147, %c25] : memref<8x27xf32, #tpu.memory_space<vmem>>, vector<8x1xf32>
    %228 = vector.broadcast %9 : f32 to vector<8x1xf32>
    %229 = arith.mulf %227, %228 : vector<8x1xf32>
    %c0_148 = arith.constant 0 : index
    %c0_149 = arith.constant 0 : index
    %c8_150 = arith.constant 8 : index
    %230 = vector.load %arg3[%c0_148, %c0_149, %c8_150] : memref<1x8x128xf32, #tpu.memory_space<vmem>>, vector<1x8x120xf32>
    %231 = vector.shape_cast %230 : vector<1x8x120xf32> to vector<8x120xf32>
    %232 = vector.broadcast %229 : vector<8x1xf32> to vector<8x120xf32>
    %233 = arith.mulf %231, %232 : vector<8x120xf32>
    %234 = arith.addf %226, %233 : vector<8x120xf32>
    %c7_151 = arith.constant 7 : index
    %c0_152 = arith.constant 0 : index
    %235 = vector.load %arg9[%c7_151, %c0_152] : memref<9x128xf32, #tpu.memory_space<vmem>>, vector<1x120xf32>
    %236 = vector.broadcast %235 : vector<1x120xf32> to vector<8x120xf32>
    %237 = arith.mulf %234, %236 : vector<8x120xf32>
    %c0_153 = arith.constant 0 : index
    %c0_154 = arith.constant 0 : index
    %238 = vector.load %arg11[%c0_153, %c0_154] : memref<8x128xf32, #tpu.memory_space<vmem>>, vector<8x120xf32>
    %239 = arith.addf %238, %237 : vector<8x120xf32>
    %c0_155 = arith.constant 0 : index
    %c0_156 = arith.constant 0 : index
    %240 = vector.load %arg11[%c0_155, %c0_156] : memref<8x128xf32, #tpu.memory_space<vmem>>, vector<8x120xf32>
    tpu.vector_store %arg11[%c0_155, %c0_156], %239 {strides = array<i32>} : memref<8x128xf32, #tpu.memory_space<vmem>>, vector<8x120xf32>,
    %cst_157 = arith.constant 0.000000e+00 : f32
    %241 = vector.broadcast %cst_157 : f32 to vector<8x119xf32>
    %c0_158 = arith.constant 0 : index
    %c8_159 = arith.constant 8 : index
    %242 = vector.load %arg4[%c0_158, %c8_159] : memref<8x27xf32, #tpu.memory_space<vmem>>, vector<8x1xf32>
    %243 = vector.broadcast %4 : f32 to vector<8x1xf32>
    %244 = arith.mulf %242, %243 : vector<8x1xf32>
    %c0_160 = arith.constant 0 : index
    %c0_161 = arith.constant 0 : index
    %c9_162 = arith.constant 9 : index
    %245 = vector.load %arg1[%c0_160, %c0_161, %c9_162] : memref<1x8x128xf32, #tpu.memory_space<vmem>>, vector<1x8x119xf32>
    %246 = vector.shape_cast %245 : vector<1x8x119xf32> to vector<8x119xf32>
    %247 = vector.broadcast %244 : vector<8x1xf32> to vector<8x119xf32>
    %248 = arith.mulf %246, %247 : vector<8x119xf32>
    %249 = arith.addf %241, %248 : vector<8x119xf32>
    %c0_163 = arith.constant 0 : index
    %c17 = arith.constant 17 : index
    %250 = vector.load %arg4[%c0_163, %c17] : memref<8x27xf32, #tpu.memory_space<vmem>>, vector<8x1xf32>
    %c0_164 = arith.constant 0 : index
    %c0_165 = arith.constant 0 : index
    %c9_166 = arith.constant 9 : index
    %251 = vector.load %arg2[%c0_164, %c0_165, %c9_166] : memref<1x8x128xf32, #tpu.memory_space<vmem>>, vector<1x8x119xf32>
    %252 = vector.shape_cast %251 : vector<1x8x119xf32> to vector<8x119xf32>
    %253 = vector.broadcast %250 : vector<8x1xf32> to vector<8x119xf32>
    %254 = arith.mulf %252, %253 : vector<8x119xf32>
    %255 = arith.addf %249, %254 : vector<8x119xf32>
    %c0_167 = arith.constant 0 : index
    %c26 = arith.constant 26 : index
    %256 = vector.load %arg4[%c0_167, %c26] : memref<8x27xf32, #tpu.memory_space<vmem>>, vector<8x1xf32>
    %257 = vector.broadcast %9 : f32 to vector<8x1xf32>
    %258 = arith.mulf %256, %257 : vector<8x1xf32>
    %c0_168 = arith.constant 0 : index
    %c0_169 = arith.constant 0 : index
    %c9_170 = arith.constant 9 : index
    %259 = vector.load %arg3[%c0_168, %c0_169, %c9_170] : memref<1x8x128xf32, #tpu.memory_space<vmem>>, vector<1x8x119xf32>
    %260 = vector.shape_cast %259 : vector<1x8x119xf32> to vector<8x119xf32>
    %261 = vector.broadcast %258 : vector<8x1xf32> to vector<8x119xf32>
    %262 = arith.mulf %260, %261 : vector<8x119xf32>
    %263 = arith.addf %255, %262 : vector<8x119xf32>
    %c8_171 = arith.constant 8 : index
    %c0_172 = arith.constant 0 : index
    %264 = vector.load %arg9[%c8_171, %c0_172] : memref<9x128xf32, #tpu.memory_space<vmem>>, vector<1x119xf32>
    %265 = vector.broadcast %264 : vector<1x119xf32> to vector<8x119xf32>
    %266 = arith.mulf %263, %265 : vector<8x119xf32>
    %c0_173 = arith.constant 0 : index
    %c0_174 = arith.constant 0 : index
    %267 = vector.load %arg11[%c0_173, %c0_174] : memref<8x128xf32, #tpu.memory_space<vmem>>, vector<8x119xf32>
    %268 = arith.addf %267, %266 : vector<8x119xf32>
    %c0_175 = arith.constant 0 : index
    %c0_176 = arith.constant 0 : index
    %269 = vector.load %arg11[%c0_175, %c0_176] : memref<8x128xf32, #tpu.memory_space<vmem>>, vector<8x119xf32>
    tpu.vector_store %arg11[%c0_175, %c0_176], %268 {strides = array<i32>} : memref<8x128xf32, #tpu.memory_space<vmem>>, vector<8x119xf32>,
    %c0_177 = arith.constant 0 : index
    %c0_178 = arith.constant 0 : index
    %270 = vector.load %arg11[%c0_177, %c0_178] : memref<8x128xf32, #tpu.memory_space<vmem>>, vector<8x128xf32>
    %c0_179 = arith.constant 0 : index
    %c0_180 = arith.constant 0 : index
    %271 = vector.load %arg5[%c0_179, %c0_180] : memref<8x1xf32, #tpu.memory_space<vmem>>, vector<8x1xf32>
    %272 = vector.broadcast %271 : vector<8x1xf32> to vector<8x128xf32>
    %273 = arith.mulf %270, %272 : vector<8x128xf32>
    %c0_181 = arith.constant 0 : index
    %c0_182 = arith.constant 0 : index
    %274 = vector.load %arg6[%c0_181, %c0_182] : memref<8x1xf32, #tpu.memory_space<vmem>>, vector<8x1xf32>
    %275 = vector.broadcast %274 : vector<8x1xf32> to vector<8x128xf32>
    %276 = arith.addf %273, %275 : vector<8x128xf32>
    %cst_183 = arith.constant 0.000000e+00 : f32
    %277 = vector.broadcast %cst_183 : f32 to vector<8x128xf32>
    %278 = arith.maximumf %276, %277 : vector<8x128xf32>
    %c0_184 = arith.constant 0 : index
    %c0_185 = arith.constant 0 : index
    %279 = vector.load %arg11[%c0_184, %c0_185] : memref<8x128xf32, #tpu.memory_space<vmem>>, vector<8x128xf32>
    tpu.vector_store %arg11[%c0_184, %c0_185], %278 {strides = array<i32>} : memref<8x128xf32, #tpu.memory_space<vmem>>, vector<8x128xf32>,
    %c0_186 = arith.constant 0 : index
    %c0_187 = arith.constant 0 : index
    %c0_188 = arith.constant 0 : index
    %280 = vector.load %arg2[%c0_186, %c0_187, %c0_188] : memref<1x8x128xf32, #tpu.memory_space<vmem>>, vector<1x8x128xf32>
    %281 = vector.shape_cast %280 : vector<1x8x128xf32> to vector<8x128xf32>
    %c0_189 = arith.constant 0 : index
    %c0_190 = arith.constant 0 : index
    %282 = vector.load %arg8[%c0_189, %c0_190] : memref<8x1xf32, #tpu.memory_space<vmem>>, vector<8x1xf32>
    %283 = vector.broadcast %282 : vector<8x1xf32> to vector<8x128xf32>
    %284 = arith.addf %281, %283 : vector<8x128xf32>
    %c0_191 = arith.constant 0 : index
    %c0_192 = arith.constant 0 : index
    %285 = vector.load %arg7[%c0_191, %c0_192] : memref<8x8xf32, #tpu.memory_space<vmem>>, vector<8x1xf32>
    %c0_193 = arith.constant 0 : index
    %c0_194 = arith.constant 0 : index
    %286 = vector.load %arg11[%c0_193, %c0_194] : memref<8x128xf32, #tpu.memory_space<vmem>>, vector<1x128xf32>
    %287 = vector.broadcast %285 : vector<8x1xf32> to vector<8x128xf32>
    %288 = vector.broadcast %286 : vector<1x128xf32> to vector<8x128xf32>
    %289 = arith.mulf %287, %288 : vector<8x128xf32>
    %290 = arith.addf %284, %289 : vector<8x128xf32>
    %c0_195 = arith.constant 0 : index
    %c1_196 = arith.constant 1 : index
    %291 = vector.load %arg7[%c0_195, %c1_196] : memref<8x8xf32, #tpu.memory_space<vmem>>, vector<8x1xf32>
    %c1_197 = arith.constant 1 : index
    %c0_198 = arith.constant 0 : index
    %292 = vector.load %arg11[%c1_197, %c0_198] : memref<8x128xf32, #tpu.memory_space<vmem>>, vector<1x128xf32>
    %293 = vector.broadcast %291 : vector<8x1xf32> to vector<8x128xf32>
    %294 = vector.broadcast %292 : vector<1x128xf32> to vector<8x128xf32>
    %295 = arith.mulf %293, %294 : vector<8x128xf32>
    %296 = arith.addf %290, %295 : vector<8x128xf32>
    %c0_199 = arith.constant 0 : index
    %c2_200 = arith.constant 2 : index
    %297 = vector.load %arg7[%c0_199, %c2_200] : memref<8x8xf32, #tpu.memory_space<vmem>>, vector<8x1xf32>
    %c2_201 = arith.constant 2 : index
    %c0_202 = arith.constant 0 : index
    %298 = vector.load %arg11[%c2_201, %c0_202] : memref<8x128xf32, #tpu.memory_space<vmem>>, vector<1x128xf32>
    %299 = vector.broadcast %297 : vector<8x1xf32> to vector<8x128xf32>
    %300 = vector.broadcast %298 : vector<1x128xf32> to vector<8x128xf32>
    %301 = arith.mulf %299, %300 : vector<8x128xf32>
    %302 = arith.addf %296, %301 : vector<8x128xf32>
    %c0_203 = arith.constant 0 : index
    %c3_204 = arith.constant 3 : index
    %303 = vector.load %arg7[%c0_203, %c3_204] : memref<8x8xf32, #tpu.memory_space<vmem>>, vector<8x1xf32>
    %c3_205 = arith.constant 3 : index
    %c0_206 = arith.constant 0 : index
    %304 = vector.load %arg11[%c3_205, %c0_206] : memref<8x128xf32, #tpu.memory_space<vmem>>, vector<1x128xf32>
    %305 = vector.broadcast %303 : vector<8x1xf32> to vector<8x128xf32>
    %306 = vector.broadcast %304 : vector<1x128xf32> to vector<8x128xf32>
    %307 = arith.mulf %305, %306 : vector<8x128xf32>
    %308 = arith.addf %302, %307 : vector<8x128xf32>
    %c0_207 = arith.constant 0 : index
    %c4_208 = arith.constant 4 : index
    %309 = vector.load %arg7[%c0_207, %c4_208] : memref<8x8xf32, #tpu.memory_space<vmem>>, vector<8x1xf32>
    %c4_209 = arith.constant 4 : index
    %c0_210 = arith.constant 0 : index
    %310 = vector.load %arg11[%c4_209, %c0_210] : memref<8x128xf32, #tpu.memory_space<vmem>>, vector<1x128xf32>
    %311 = vector.broadcast %309 : vector<8x1xf32> to vector<8x128xf32>
    %312 = vector.broadcast %310 : vector<1x128xf32> to vector<8x128xf32>
    %313 = arith.mulf %311, %312 : vector<8x128xf32>
    %314 = arith.addf %308, %313 : vector<8x128xf32>
    %c0_211 = arith.constant 0 : index
    %c5_212 = arith.constant 5 : index
    %315 = vector.load %arg7[%c0_211, %c5_212] : memref<8x8xf32, #tpu.memory_space<vmem>>, vector<8x1xf32>
    %c5_213 = arith.constant 5 : index
    %c0_214 = arith.constant 0 : index
    %316 = vector.load %arg11[%c5_213, %c0_214] : memref<8x128xf32, #tpu.memory_space<vmem>>, vector<1x128xf32>
    %317 = vector.broadcast %315 : vector<8x1xf32> to vector<8x128xf32>
    %318 = vector.broadcast %316 : vector<1x128xf32> to vector<8x128xf32>
    %319 = arith.mulf %317, %318 : vector<8x128xf32>
    %320 = arith.addf %314, %319 : vector<8x128xf32>
    %c0_215 = arith.constant 0 : index
    %c6_216 = arith.constant 6 : index
    %321 = vector.load %arg7[%c0_215, %c6_216] : memref<8x8xf32, #tpu.memory_space<vmem>>, vector<8x1xf32>
    %c6_217 = arith.constant 6 : index
    %c0_218 = arith.constant 0 : index
    %322 = vector.load %arg11[%c6_217, %c0_218] : memref<8x128xf32, #tpu.memory_space<vmem>>, vector<1x128xf32>
    %323 = vector.broadcast %321 : vector<8x1xf32> to vector<8x128xf32>
    %324 = vector.broadcast %322 : vector<1x128xf32> to vector<8x128xf32>
    %325 = arith.mulf %323, %324 : vector<8x128xf32>
    %326 = arith.addf %320, %325 : vector<8x128xf32>
    %c0_219 = arith.constant 0 : index
    %c7_220 = arith.constant 7 : index
    %327 = vector.load %arg7[%c0_219, %c7_220] : memref<8x8xf32, #tpu.memory_space<vmem>>, vector<8x1xf32>
    %c7_221 = arith.constant 7 : index
    %c0_222 = arith.constant 0 : index
    %328 = vector.load %arg11[%c7_221, %c0_222] : memref<8x128xf32, #tpu.memory_space<vmem>>, vector<1x128xf32>
    %329 = vector.broadcast %327 : vector<8x1xf32> to vector<8x128xf32>
    %330 = vector.broadcast %328 : vector<1x128xf32> to vector<8x128xf32>
    %331 = arith.mulf %329, %330 : vector<8x128xf32>
    %332 = arith.addf %326, %331 : vector<8x128xf32>
    %c0_223 = arith.constant 0 : index
    %c0_224 = arith.constant 0 : index
    %c0_225 = arith.constant 0 : index
    %333 = vector.load %arg10[%c0_223, %c0_224, %c0_225] : memref<1x8x128xf32, #tpu.memory_space<vmem>>, vector<1x8x128xf32>
    %334 = vector.shape_cast %333 : vector<1x8x128xf32> to vector<8x128xf32>
    %335 = vector.shape_cast %332 : vector<8x128xf32> to vector<1x8x128xf32>
    tpu.vector_store %arg10[%c0_223, %c0_224, %c0_225], %335 {strides = array<i32>} : memref<1x8x128xf32, #tpu.memory_space<vmem>>, vector<1x8x128xf32>,
    return
  }
  func.func @transform_0(%arg0: i32) -> (i32, i32, i32) {
    %c-4_i32 = arith.constant -4 : i32
    %0 = arith.addi %arg0, %c-4_i32 : i32
    %c0_i32 = arith.constant 0 : i32
    %c7_i32 = arith.constant 7 : i32
    %1 = arith.maxsi %c0_i32, %0 : i32
    %2 = arith.minsi %c7_i32, %1 : i32
    %c0_i32_0 = arith.constant 0 : i32
    %c0_i32_1 = arith.constant 0 : i32
    %c0_i32_2 = arith.constant 0 : i32
    return %2, %c0_i32_0, %c0_i32_1 : i32, i32, i32
  }
  func.func @transform_1(%arg0: i32) -> (i32, i32, i32) {
    %c0_i32 = arith.constant 0 : i32
    %0 = arith.addi %arg0, %c0_i32 : i32
    %c0_i32_0 = arith.constant 0 : i32
    %c7_i32 = arith.constant 7 : i32
    %1 = arith.maxsi %c0_i32_0, %0 : i32
    %2 = arith.minsi %c7_i32, %1 : i32
    %c0_i32_1 = arith.constant 0 : i32
    %c0_i32_2 = arith.constant 0 : i32
    %c0_i32_3 = arith.constant 0 : i32
    return %2, %c0_i32_1, %c0_i32_2 : i32, i32, i32
  }
  func.func @transform_2(%arg0: i32) -> (i32, i32, i32) {
    %c4_i32 = arith.constant 4 : i32
    %0 = arith.addi %arg0, %c4_i32 : i32
    %c0_i32 = arith.constant 0 : i32
    %c7_i32 = arith.constant 7 : i32
    %1 = arith.maxsi %c0_i32, %0 : i32
    %2 = arith.minsi %c7_i32, %1 : i32
    %c0_i32_0 = arith.constant 0 : i32
    %c0_i32_1 = arith.constant 0 : i32
    %c0_i32_2 = arith.constant 0 : i32
    return %2, %c0_i32_0, %c0_i32_1 : i32, i32, i32
  }
  func.func @transform_3(%arg0: i32) -> (i32, i32) {
    %c0_i32 = arith.constant 0 : i32
    %c0_i32_0 = arith.constant 0 : i32
    %c0_i32_1 = arith.constant 0 : i32
    return %c0_i32, %c0_i32_0 : i32, i32
  }
  func.func @transform_4(%arg0: i32) -> (i32, i32) {
    %c0_i32 = arith.constant 0 : i32
    %c0_i32_0 = arith.constant 0 : i32
    %c0_i32_1 = arith.constant 0 : i32
    return %c0_i32, %c0_i32_0 : i32, i32
  }
  func.func @transform_5(%arg0: i32) -> (i32, i32) {
    %c0_i32 = arith.constant 0 : i32
    %c0_i32_0 = arith.constant 0 : i32
    %c0_i32_1 = arith.constant 0 : i32
    return %c0_i32, %c0_i32_0 : i32, i32
  }
  func.func @transform_6(%arg0: i32) -> (i32, i32) {
    %c0_i32 = arith.constant 0 : i32
    %c0_i32_0 = arith.constant 0 : i32
    %c0_i32_1 = arith.constant 0 : i32
    return %c0_i32, %c0_i32_0 : i32, i32
  }
  func.func @transform_7(%arg0: i32) -> (i32, i32) {
    %c0_i32 = arith.constant 0 : i32
    %c0_i32_0 = arith.constant 0 : i32
    %c0_i32_1 = arith.constant 0 : i32
    return %c0_i32, %c0_i32_0 : i32, i32
  }
  func.func @transform_8(%arg0: i32) -> (i32, i32) {
    %c0_i32 = arith.constant 0 : i32
    %c0_i32_0 = arith.constant 0 : i32
    %c0_i32_1 = arith.constant 0 : i32
    return %c0_i32, %c0_i32_0 : i32, i32
  }
  func.func @transform_9(%arg0: i32) -> (i32, i32, i32) {
    %c0_i32 = arith.constant 0 : i32
    %c0_i32_0 = arith.constant 0 : i32
    %c0_i32_1 = arith.constant 0 : i32
    return %arg0, %c0_i32, %c0_i32_0 : i32, i32, i32
  }
}

module attributes {stable_mosaic.version = 11 : i64} {
  func.func @_pointwise_kernel(%arg0: i32, %arg1: memref<4x8x128xf32, #tpu.memory_space<vmem>>, %arg2: memref<6x8xf32, #tpu.memory_space<vmem>>, %arg3: memref<6x1xf32, #tpu.memory_space<vmem>>, %arg4: memref<4x6x128xf32, #tpu.memory_space<vmem>>) attributes {dimension_semantics = [#tpu.dimension_semantics<parallel>], iteration_bounds = array<i64: 2>, scalar_prefetch = 0 : i64, scratch_operands = 0 : i64, tpu.core_type = #tpu.core_type<tc>, window_params = [{transform_indices = @transform_0, window_bounds = array<i64: 4, 8, 128>}, {pipeline_mode = #tpu.pipeline_mode<synchronous>, transform_indices = @transform_1, window_bounds = array<i64: 6, 8>}, {pipeline_mode = #tpu.pipeline_mode<synchronous>, transform_indices = @transform_2, window_bounds = array<i64: 6, 1>}, {transform_indices = @transform_3, window_bounds = array<i64: 4, 6, 128>}]} {
    %c0 = arith.constant 0 : index
    %c0_0 = arith.constant 0 : index
    %0 = vector.load %arg3[%c0, %c0_0] : memref<6x1xf32, #tpu.memory_space<vmem>>, vector<6x1xf32>
    %cst = arith.constant 0.000000e+00 : f32
    %1 = vector.broadcast %cst : f32 to vector<6x128xf32>
    %c0_1 = arith.constant 0 : index
    %c0_2 = arith.constant 0 : index
    %2 = vector.load %arg2[%c0_1, %c0_2] : memref<6x8xf32, #tpu.memory_space<vmem>>, vector<6x1xf32>
    %c0_3 = arith.constant 0 : index
    %c0_4 = arith.constant 0 : index
    %c0_5 = arith.constant 0 : index
    %3 = vector.load %arg1[%c0_3, %c0_4, %c0_5] : memref<4x8x128xf32, #tpu.memory_space<vmem>>, vector<1x1x128xf32>
    %4 = vector.shape_cast %3 : vector<1x1x128xf32> to vector<1x128xf32>
    %5 = vector.broadcast %2 : vector<6x1xf32> to vector<6x128xf32>
    %6 = vector.broadcast %4 : vector<1x128xf32> to vector<6x128xf32>
    %7 = arith.mulf %5, %6 : vector<6x128xf32>
    %8 = arith.addf %1, %7 : vector<6x128xf32>
    %c0_6 = arith.constant 0 : index
    %c1 = arith.constant 1 : index
    %9 = vector.load %arg2[%c0_6, %c1] : memref<6x8xf32, #tpu.memory_space<vmem>>, vector<6x1xf32>
    %c0_7 = arith.constant 0 : index
    %c1_8 = arith.constant 1 : index
    %c0_9 = arith.constant 0 : index
    %10 = vector.load %arg1[%c0_7, %c1_8, %c0_9] : memref<4x8x128xf32, #tpu.memory_space<vmem>>, vector<1x1x128xf32>
    %11 = vector.shape_cast %10 : vector<1x1x128xf32> to vector<1x128xf32>
    %12 = vector.broadcast %9 : vector<6x1xf32> to vector<6x128xf32>
    %13 = vector.broadcast %11 : vector<1x128xf32> to vector<6x128xf32>
    %14 = arith.mulf %12, %13 : vector<6x128xf32>
    %15 = arith.addf %8, %14 : vector<6x128xf32>
    %c0_10 = arith.constant 0 : index
    %c2 = arith.constant 2 : index
    %16 = vector.load %arg2[%c0_10, %c2] : memref<6x8xf32, #tpu.memory_space<vmem>>, vector<6x1xf32>
    %c0_11 = arith.constant 0 : index
    %c2_12 = arith.constant 2 : index
    %c0_13 = arith.constant 0 : index
    %17 = vector.load %arg1[%c0_11, %c2_12, %c0_13] : memref<4x8x128xf32, #tpu.memory_space<vmem>>, vector<1x1x128xf32>
    %18 = vector.shape_cast %17 : vector<1x1x128xf32> to vector<1x128xf32>
    %19 = vector.broadcast %16 : vector<6x1xf32> to vector<6x128xf32>
    %20 = vector.broadcast %18 : vector<1x128xf32> to vector<6x128xf32>
    %21 = arith.mulf %19, %20 : vector<6x128xf32>
    %22 = arith.addf %15, %21 : vector<6x128xf32>
    %c0_14 = arith.constant 0 : index
    %c3 = arith.constant 3 : index
    %23 = vector.load %arg2[%c0_14, %c3] : memref<6x8xf32, #tpu.memory_space<vmem>>, vector<6x1xf32>
    %c0_15 = arith.constant 0 : index
    %c3_16 = arith.constant 3 : index
    %c0_17 = arith.constant 0 : index
    %24 = vector.load %arg1[%c0_15, %c3_16, %c0_17] : memref<4x8x128xf32, #tpu.memory_space<vmem>>, vector<1x1x128xf32>
    %25 = vector.shape_cast %24 : vector<1x1x128xf32> to vector<1x128xf32>
    %26 = vector.broadcast %23 : vector<6x1xf32> to vector<6x128xf32>
    %27 = vector.broadcast %25 : vector<1x128xf32> to vector<6x128xf32>
    %28 = arith.mulf %26, %27 : vector<6x128xf32>
    %29 = arith.addf %22, %28 : vector<6x128xf32>
    %c0_18 = arith.constant 0 : index
    %c4 = arith.constant 4 : index
    %30 = vector.load %arg2[%c0_18, %c4] : memref<6x8xf32, #tpu.memory_space<vmem>>, vector<6x1xf32>
    %c0_19 = arith.constant 0 : index
    %c4_20 = arith.constant 4 : index
    %c0_21 = arith.constant 0 : index
    %31 = vector.load %arg1[%c0_19, %c4_20, %c0_21] : memref<4x8x128xf32, #tpu.memory_space<vmem>>, vector<1x1x128xf32>
    %32 = vector.shape_cast %31 : vector<1x1x128xf32> to vector<1x128xf32>
    %33 = vector.broadcast %30 : vector<6x1xf32> to vector<6x128xf32>
    %34 = vector.broadcast %32 : vector<1x128xf32> to vector<6x128xf32>
    %35 = arith.mulf %33, %34 : vector<6x128xf32>
    %36 = arith.addf %29, %35 : vector<6x128xf32>
    %c0_22 = arith.constant 0 : index
    %c5 = arith.constant 5 : index
    %37 = vector.load %arg2[%c0_22, %c5] : memref<6x8xf32, #tpu.memory_space<vmem>>, vector<6x1xf32>
    %c0_23 = arith.constant 0 : index
    %c5_24 = arith.constant 5 : index
    %c0_25 = arith.constant 0 : index
    %38 = vector.load %arg1[%c0_23, %c5_24, %c0_25] : memref<4x8x128xf32, #tpu.memory_space<vmem>>, vector<1x1x128xf32>
    %39 = vector.shape_cast %38 : vector<1x1x128xf32> to vector<1x128xf32>
    %40 = vector.broadcast %37 : vector<6x1xf32> to vector<6x128xf32>
    %41 = vector.broadcast %39 : vector<1x128xf32> to vector<6x128xf32>
    %42 = arith.mulf %40, %41 : vector<6x128xf32>
    %43 = arith.addf %36, %42 : vector<6x128xf32>
    %c0_26 = arith.constant 0 : index
    %c6 = arith.constant 6 : index
    %44 = vector.load %arg2[%c0_26, %c6] : memref<6x8xf32, #tpu.memory_space<vmem>>, vector<6x1xf32>
    %c0_27 = arith.constant 0 : index
    %c6_28 = arith.constant 6 : index
    %c0_29 = arith.constant 0 : index
    %45 = vector.load %arg1[%c0_27, %c6_28, %c0_29] : memref<4x8x128xf32, #tpu.memory_space<vmem>>, vector<1x1x128xf32>
    %46 = vector.shape_cast %45 : vector<1x1x128xf32> to vector<1x128xf32>
    %47 = vector.broadcast %44 : vector<6x1xf32> to vector<6x128xf32>
    %48 = vector.broadcast %46 : vector<1x128xf32> to vector<6x128xf32>
    %49 = arith.mulf %47, %48 : vector<6x128xf32>
    %50 = arith.addf %43, %49 : vector<6x128xf32>
    %c0_30 = arith.constant 0 : index
    %c7 = arith.constant 7 : index
    %51 = vector.load %arg2[%c0_30, %c7] : memref<6x8xf32, #tpu.memory_space<vmem>>, vector<6x1xf32>
    %c0_31 = arith.constant 0 : index
    %c7_32 = arith.constant 7 : index
    %c0_33 = arith.constant 0 : index
    %52 = vector.load %arg1[%c0_31, %c7_32, %c0_33] : memref<4x8x128xf32, #tpu.memory_space<vmem>>, vector<1x1x128xf32>
    %53 = vector.shape_cast %52 : vector<1x1x128xf32> to vector<1x128xf32>
    %54 = vector.broadcast %51 : vector<6x1xf32> to vector<6x128xf32>
    %55 = vector.broadcast %53 : vector<1x128xf32> to vector<6x128xf32>
    %56 = arith.mulf %54, %55 : vector<6x128xf32>
    %57 = arith.addf %50, %56 : vector<6x128xf32>
    %58 = vector.broadcast %0 : vector<6x1xf32> to vector<6x128xf32>
    %59 = arith.addf %57, %58 : vector<6x128xf32>
    %c0_34 = arith.constant 0 : index
    %c0_35 = arith.constant 0 : index
    %c0_36 = arith.constant 0 : index
    %60 = vector.load %arg4[%c0_34, %c0_35, %c0_36] : memref<4x6x128xf32, #tpu.memory_space<vmem>>, vector<1x6x128xf32>
    %61 = vector.shape_cast %60 : vector<1x6x128xf32> to vector<6x128xf32>
    %62 = vector.shape_cast %59 : vector<6x128xf32> to vector<1x6x128xf32>
    tpu.vector_store %arg4[%c0_34, %c0_35, %c0_36], %62 {strides = array<i32>} : memref<4x6x128xf32, #tpu.memory_space<vmem>>, vector<1x6x128xf32>,
    %cst_37 = arith.constant 0.000000e+00 : f32
    %63 = vector.broadcast %cst_37 : f32 to vector<6x128xf32>
    %c0_38 = arith.constant 0 : index
    %c0_39 = arith.constant 0 : index
    %64 = vector.load %arg2[%c0_38, %c0_39] : memref<6x8xf32, #tpu.memory_space<vmem>>, vector<6x1xf32>
    %c1_40 = arith.constant 1 : index
    %c0_41 = arith.constant 0 : index
    %c0_42 = arith.constant 0 : index
    %65 = vector.load %arg1[%c1_40, %c0_41, %c0_42] : memref<4x8x128xf32, #tpu.memory_space<vmem>>, vector<1x1x128xf32>
    %66 = vector.shape_cast %65 : vector<1x1x128xf32> to vector<1x128xf32>
    %67 = vector.broadcast %64 : vector<6x1xf32> to vector<6x128xf32>
    %68 = vector.broadcast %66 : vector<1x128xf32> to vector<6x128xf32>
    %69 = arith.mulf %67, %68 : vector<6x128xf32>
    %70 = arith.addf %63, %69 : vector<6x128xf32>
    %c0_43 = arith.constant 0 : index
    %c1_44 = arith.constant 1 : index
    %71 = vector.load %arg2[%c0_43, %c1_44] : memref<6x8xf32, #tpu.memory_space<vmem>>, vector<6x1xf32>
    %c1_45 = arith.constant 1 : index
    %c1_46 = arith.constant 1 : index
    %c0_47 = arith.constant 0 : index
    %72 = vector.load %arg1[%c1_45, %c1_46, %c0_47] : memref<4x8x128xf32, #tpu.memory_space<vmem>>, vector<1x1x128xf32>
    %73 = vector.shape_cast %72 : vector<1x1x128xf32> to vector<1x128xf32>
    %74 = vector.broadcast %71 : vector<6x1xf32> to vector<6x128xf32>
    %75 = vector.broadcast %73 : vector<1x128xf32> to vector<6x128xf32>
    %76 = arith.mulf %74, %75 : vector<6x128xf32>
    %77 = arith.addf %70, %76 : vector<6x128xf32>
    %c0_48 = arith.constant 0 : index
    %c2_49 = arith.constant 2 : index
    %78 = vector.load %arg2[%c0_48, %c2_49] : memref<6x8xf32, #tpu.memory_space<vmem>>, vector<6x1xf32>
    %c1_50 = arith.constant 1 : index
    %c2_51 = arith.constant 2 : index
    %c0_52 = arith.constant 0 : index
    %79 = vector.load %arg1[%c1_50, %c2_51, %c0_52] : memref<4x8x128xf32, #tpu.memory_space<vmem>>, vector<1x1x128xf32>
    %80 = vector.shape_cast %79 : vector<1x1x128xf32> to vector<1x128xf32>
    %81 = vector.broadcast %78 : vector<6x1xf32> to vector<6x128xf32>
    %82 = vector.broadcast %80 : vector<1x128xf32> to vector<6x128xf32>
    %83 = arith.mulf %81, %82 : vector<6x128xf32>
    %84 = arith.addf %77, %83 : vector<6x128xf32>
    %c0_53 = arith.constant 0 : index
    %c3_54 = arith.constant 3 : index
    %85 = vector.load %arg2[%c0_53, %c3_54] : memref<6x8xf32, #tpu.memory_space<vmem>>, vector<6x1xf32>
    %c1_55 = arith.constant 1 : index
    %c3_56 = arith.constant 3 : index
    %c0_57 = arith.constant 0 : index
    %86 = vector.load %arg1[%c1_55, %c3_56, %c0_57] : memref<4x8x128xf32, #tpu.memory_space<vmem>>, vector<1x1x128xf32>
    %87 = vector.shape_cast %86 : vector<1x1x128xf32> to vector<1x128xf32>
    %88 = vector.broadcast %85 : vector<6x1xf32> to vector<6x128xf32>
    %89 = vector.broadcast %87 : vector<1x128xf32> to vector<6x128xf32>
    %90 = arith.mulf %88, %89 : vector<6x128xf32>
    %91 = arith.addf %84, %90 : vector<6x128xf32>
    %c0_58 = arith.constant 0 : index
    %c4_59 = arith.constant 4 : index
    %92 = vector.load %arg2[%c0_58, %c4_59] : memref<6x8xf32, #tpu.memory_space<vmem>>, vector<6x1xf32>
    %c1_60 = arith.constant 1 : index
    %c4_61 = arith.constant 4 : index
    %c0_62 = arith.constant 0 : index
    %93 = vector.load %arg1[%c1_60, %c4_61, %c0_62] : memref<4x8x128xf32, #tpu.memory_space<vmem>>, vector<1x1x128xf32>
    %94 = vector.shape_cast %93 : vector<1x1x128xf32> to vector<1x128xf32>
    %95 = vector.broadcast %92 : vector<6x1xf32> to vector<6x128xf32>
    %96 = vector.broadcast %94 : vector<1x128xf32> to vector<6x128xf32>
    %97 = arith.mulf %95, %96 : vector<6x128xf32>
    %98 = arith.addf %91, %97 : vector<6x128xf32>
    %c0_63 = arith.constant 0 : index
    %c5_64 = arith.constant 5 : index
    %99 = vector.load %arg2[%c0_63, %c5_64] : memref<6x8xf32, #tpu.memory_space<vmem>>, vector<6x1xf32>
    %c1_65 = arith.constant 1 : index
    %c5_66 = arith.constant 5 : index
    %c0_67 = arith.constant 0 : index
    %100 = vector.load %arg1[%c1_65, %c5_66, %c0_67] : memref<4x8x128xf32, #tpu.memory_space<vmem>>, vector<1x1x128xf32>
    %101 = vector.shape_cast %100 : vector<1x1x128xf32> to vector<1x128xf32>
    %102 = vector.broadcast %99 : vector<6x1xf32> to vector<6x128xf32>
    %103 = vector.broadcast %101 : vector<1x128xf32> to vector<6x128xf32>
    %104 = arith.mulf %102, %103 : vector<6x128xf32>
    %105 = arith.addf %98, %104 : vector<6x128xf32>
    %c0_68 = arith.constant 0 : index
    %c6_69 = arith.constant 6 : index
    %106 = vector.load %arg2[%c0_68, %c6_69] : memref<6x8xf32, #tpu.memory_space<vmem>>, vector<6x1xf32>
    %c1_70 = arith.constant 1 : index
    %c6_71 = arith.constant 6 : index
    %c0_72 = arith.constant 0 : index
    %107 = vector.load %arg1[%c1_70, %c6_71, %c0_72] : memref<4x8x128xf32, #tpu.memory_space<vmem>>, vector<1x1x128xf32>
    %108 = vector.shape_cast %107 : vector<1x1x128xf32> to vector<1x128xf32>
    %109 = vector.broadcast %106 : vector<6x1xf32> to vector<6x128xf32>
    %110 = vector.broadcast %108 : vector<1x128xf32> to vector<6x128xf32>
    %111 = arith.mulf %109, %110 : vector<6x128xf32>
    %112 = arith.addf %105, %111 : vector<6x128xf32>
    %c0_73 = arith.constant 0 : index
    %c7_74 = arith.constant 7 : index
    %113 = vector.load %arg2[%c0_73, %c7_74] : memref<6x8xf32, #tpu.memory_space<vmem>>, vector<6x1xf32>
    %c1_75 = arith.constant 1 : index
    %c7_76 = arith.constant 7 : index
    %c0_77 = arith.constant 0 : index
    %114 = vector.load %arg1[%c1_75, %c7_76, %c0_77] : memref<4x8x128xf32, #tpu.memory_space<vmem>>, vector<1x1x128xf32>
    %115 = vector.shape_cast %114 : vector<1x1x128xf32> to vector<1x128xf32>
    %116 = vector.broadcast %113 : vector<6x1xf32> to vector<6x128xf32>
    %117 = vector.broadcast %115 : vector<1x128xf32> to vector<6x128xf32>
    %118 = arith.mulf %116, %117 : vector<6x128xf32>
    %119 = arith.addf %112, %118 : vector<6x128xf32>
    %120 = vector.broadcast %0 : vector<6x1xf32> to vector<6x128xf32>
    %121 = arith.addf %119, %120 : vector<6x128xf32>
    %c1_78 = arith.constant 1 : index
    %c0_79 = arith.constant 0 : index
    %c0_80 = arith.constant 0 : index
    %122 = vector.load %arg4[%c1_78, %c0_79, %c0_80] : memref<4x6x128xf32, #tpu.memory_space<vmem>>, vector<1x6x128xf32>
    %123 = vector.shape_cast %122 : vector<1x6x128xf32> to vector<6x128xf32>
    %124 = vector.shape_cast %121 : vector<6x128xf32> to vector<1x6x128xf32>
    tpu.vector_store %arg4[%c1_78, %c0_79, %c0_80], %124 {strides = array<i32>} : memref<4x6x128xf32, #tpu.memory_space<vmem>>, vector<1x6x128xf32>,
    %cst_81 = arith.constant 0.000000e+00 : f32
    %125 = vector.broadcast %cst_81 : f32 to vector<6x128xf32>
    %c0_82 = arith.constant 0 : index
    %c0_83 = arith.constant 0 : index
    %126 = vector.load %arg2[%c0_82, %c0_83] : memref<6x8xf32, #tpu.memory_space<vmem>>, vector<6x1xf32>
    %c2_84 = arith.constant 2 : index
    %c0_85 = arith.constant 0 : index
    %c0_86 = arith.constant 0 : index
    %127 = vector.load %arg1[%c2_84, %c0_85, %c0_86] : memref<4x8x128xf32, #tpu.memory_space<vmem>>, vector<1x1x128xf32>
    %128 = vector.shape_cast %127 : vector<1x1x128xf32> to vector<1x128xf32>
    %129 = vector.broadcast %126 : vector<6x1xf32> to vector<6x128xf32>
    %130 = vector.broadcast %128 : vector<1x128xf32> to vector<6x128xf32>
    %131 = arith.mulf %129, %130 : vector<6x128xf32>
    %132 = arith.addf %125, %131 : vector<6x128xf32>
    %c0_87 = arith.constant 0 : index
    %c1_88 = arith.constant 1 : index
    %133 = vector.load %arg2[%c0_87, %c1_88] : memref<6x8xf32, #tpu.memory_space<vmem>>, vector<6x1xf32>
    %c2_89 = arith.constant 2 : index
    %c1_90 = arith.constant 1 : index
    %c0_91 = arith.constant 0 : index
    %134 = vector.load %arg1[%c2_89, %c1_90, %c0_91] : memref<4x8x128xf32, #tpu.memory_space<vmem>>, vector<1x1x128xf32>
    %135 = vector.shape_cast %134 : vector<1x1x128xf32> to vector<1x128xf32>
    %136 = vector.broadcast %133 : vector<6x1xf32> to vector<6x128xf32>
    %137 = vector.broadcast %135 : vector<1x128xf32> to vector<6x128xf32>
    %138 = arith.mulf %136, %137 : vector<6x128xf32>
    %139 = arith.addf %132, %138 : vector<6x128xf32>
    %c0_92 = arith.constant 0 : index
    %c2_93 = arith.constant 2 : index
    %140 = vector.load %arg2[%c0_92, %c2_93] : memref<6x8xf32, #tpu.memory_space<vmem>>, vector<6x1xf32>
    %c2_94 = arith.constant 2 : index
    %c2_95 = arith.constant 2 : index
    %c0_96 = arith.constant 0 : index
    %141 = vector.load %arg1[%c2_94, %c2_95, %c0_96] : memref<4x8x128xf32, #tpu.memory_space<vmem>>, vector<1x1x128xf32>
    %142 = vector.shape_cast %141 : vector<1x1x128xf32> to vector<1x128xf32>
    %143 = vector.broadcast %140 : vector<6x1xf32> to vector<6x128xf32>
    %144 = vector.broadcast %142 : vector<1x128xf32> to vector<6x128xf32>
    %145 = arith.mulf %143, %144 : vector<6x128xf32>
    %146 = arith.addf %139, %145 : vector<6x128xf32>
    %c0_97 = arith.constant 0 : index
    %c3_98 = arith.constant 3 : index
    %147 = vector.load %arg2[%c0_97, %c3_98] : memref<6x8xf32, #tpu.memory_space<vmem>>, vector<6x1xf32>
    %c2_99 = arith.constant 2 : index
    %c3_100 = arith.constant 3 : index
    %c0_101 = arith.constant 0 : index
    %148 = vector.load %arg1[%c2_99, %c3_100, %c0_101] : memref<4x8x128xf32, #tpu.memory_space<vmem>>, vector<1x1x128xf32>
    %149 = vector.shape_cast %148 : vector<1x1x128xf32> to vector<1x128xf32>
    %150 = vector.broadcast %147 : vector<6x1xf32> to vector<6x128xf32>
    %151 = vector.broadcast %149 : vector<1x128xf32> to vector<6x128xf32>
    %152 = arith.mulf %150, %151 : vector<6x128xf32>
    %153 = arith.addf %146, %152 : vector<6x128xf32>
    %c0_102 = arith.constant 0 : index
    %c4_103 = arith.constant 4 : index
    %154 = vector.load %arg2[%c0_102, %c4_103] : memref<6x8xf32, #tpu.memory_space<vmem>>, vector<6x1xf32>
    %c2_104 = arith.constant 2 : index
    %c4_105 = arith.constant 4 : index
    %c0_106 = arith.constant 0 : index
    %155 = vector.load %arg1[%c2_104, %c4_105, %c0_106] : memref<4x8x128xf32, #tpu.memory_space<vmem>>, vector<1x1x128xf32>
    %156 = vector.shape_cast %155 : vector<1x1x128xf32> to vector<1x128xf32>
    %157 = vector.broadcast %154 : vector<6x1xf32> to vector<6x128xf32>
    %158 = vector.broadcast %156 : vector<1x128xf32> to vector<6x128xf32>
    %159 = arith.mulf %157, %158 : vector<6x128xf32>
    %160 = arith.addf %153, %159 : vector<6x128xf32>
    %c0_107 = arith.constant 0 : index
    %c5_108 = arith.constant 5 : index
    %161 = vector.load %arg2[%c0_107, %c5_108] : memref<6x8xf32, #tpu.memory_space<vmem>>, vector<6x1xf32>
    %c2_109 = arith.constant 2 : index
    %c5_110 = arith.constant 5 : index
    %c0_111 = arith.constant 0 : index
    %162 = vector.load %arg1[%c2_109, %c5_110, %c0_111] : memref<4x8x128xf32, #tpu.memory_space<vmem>>, vector<1x1x128xf32>
    %163 = vector.shape_cast %162 : vector<1x1x128xf32> to vector<1x128xf32>
    %164 = vector.broadcast %161 : vector<6x1xf32> to vector<6x128xf32>
    %165 = vector.broadcast %163 : vector<1x128xf32> to vector<6x128xf32>
    %166 = arith.mulf %164, %165 : vector<6x128xf32>
    %167 = arith.addf %160, %166 : vector<6x128xf32>
    %c0_112 = arith.constant 0 : index
    %c6_113 = arith.constant 6 : index
    %168 = vector.load %arg2[%c0_112, %c6_113] : memref<6x8xf32, #tpu.memory_space<vmem>>, vector<6x1xf32>
    %c2_114 = arith.constant 2 : index
    %c6_115 = arith.constant 6 : index
    %c0_116 = arith.constant 0 : index
    %169 = vector.load %arg1[%c2_114, %c6_115, %c0_116] : memref<4x8x128xf32, #tpu.memory_space<vmem>>, vector<1x1x128xf32>
    %170 = vector.shape_cast %169 : vector<1x1x128xf32> to vector<1x128xf32>
    %171 = vector.broadcast %168 : vector<6x1xf32> to vector<6x128xf32>
    %172 = vector.broadcast %170 : vector<1x128xf32> to vector<6x128xf32>
    %173 = arith.mulf %171, %172 : vector<6x128xf32>
    %174 = arith.addf %167, %173 : vector<6x128xf32>
    %c0_117 = arith.constant 0 : index
    %c7_118 = arith.constant 7 : index
    %175 = vector.load %arg2[%c0_117, %c7_118] : memref<6x8xf32, #tpu.memory_space<vmem>>, vector<6x1xf32>
    %c2_119 = arith.constant 2 : index
    %c7_120 = arith.constant 7 : index
    %c0_121 = arith.constant 0 : index
    %176 = vector.load %arg1[%c2_119, %c7_120, %c0_121] : memref<4x8x128xf32, #tpu.memory_space<vmem>>, vector<1x1x128xf32>
    %177 = vector.shape_cast %176 : vector<1x1x128xf32> to vector<1x128xf32>
    %178 = vector.broadcast %175 : vector<6x1xf32> to vector<6x128xf32>
    %179 = vector.broadcast %177 : vector<1x128xf32> to vector<6x128xf32>
    %180 = arith.mulf %178, %179 : vector<6x128xf32>
    %181 = arith.addf %174, %180 : vector<6x128xf32>
    %182 = vector.broadcast %0 : vector<6x1xf32> to vector<6x128xf32>
    %183 = arith.addf %181, %182 : vector<6x128xf32>
    %c2_122 = arith.constant 2 : index
    %c0_123 = arith.constant 0 : index
    %c0_124 = arith.constant 0 : index
    %184 = vector.load %arg4[%c2_122, %c0_123, %c0_124] : memref<4x6x128xf32, #tpu.memory_space<vmem>>, vector<1x6x128xf32>
    %185 = vector.shape_cast %184 : vector<1x6x128xf32> to vector<6x128xf32>
    %186 = vector.shape_cast %183 : vector<6x128xf32> to vector<1x6x128xf32>
    tpu.vector_store %arg4[%c2_122, %c0_123, %c0_124], %186 {strides = array<i32>} : memref<4x6x128xf32, #tpu.memory_space<vmem>>, vector<1x6x128xf32>,
    %cst_125 = arith.constant 0.000000e+00 : f32
    %187 = vector.broadcast %cst_125 : f32 to vector<6x128xf32>
    %c0_126 = arith.constant 0 : index
    %c0_127 = arith.constant 0 : index
    %188 = vector.load %arg2[%c0_126, %c0_127] : memref<6x8xf32, #tpu.memory_space<vmem>>, vector<6x1xf32>
    %c3_128 = arith.constant 3 : index
    %c0_129 = arith.constant 0 : index
    %c0_130 = arith.constant 0 : index
    %189 = vector.load %arg1[%c3_128, %c0_129, %c0_130] : memref<4x8x128xf32, #tpu.memory_space<vmem>>, vector<1x1x128xf32>
    %190 = vector.shape_cast %189 : vector<1x1x128xf32> to vector<1x128xf32>
    %191 = vector.broadcast %188 : vector<6x1xf32> to vector<6x128xf32>
    %192 = vector.broadcast %190 : vector<1x128xf32> to vector<6x128xf32>
    %193 = arith.mulf %191, %192 : vector<6x128xf32>
    %194 = arith.addf %187, %193 : vector<6x128xf32>
    %c0_131 = arith.constant 0 : index
    %c1_132 = arith.constant 1 : index
    %195 = vector.load %arg2[%c0_131, %c1_132] : memref<6x8xf32, #tpu.memory_space<vmem>>, vector<6x1xf32>
    %c3_133 = arith.constant 3 : index
    %c1_134 = arith.constant 1 : index
    %c0_135 = arith.constant 0 : index
    %196 = vector.load %arg1[%c3_133, %c1_134, %c0_135] : memref<4x8x128xf32, #tpu.memory_space<vmem>>, vector<1x1x128xf32>
    %197 = vector.shape_cast %196 : vector<1x1x128xf32> to vector<1x128xf32>
    %198 = vector.broadcast %195 : vector<6x1xf32> to vector<6x128xf32>
    %199 = vector.broadcast %197 : vector<1x128xf32> to vector<6x128xf32>
    %200 = arith.mulf %198, %199 : vector<6x128xf32>
    %201 = arith.addf %194, %200 : vector<6x128xf32>
    %c0_136 = arith.constant 0 : index
    %c2_137 = arith.constant 2 : index
    %202 = vector.load %arg2[%c0_136, %c2_137] : memref<6x8xf32, #tpu.memory_space<vmem>>, vector<6x1xf32>
    %c3_138 = arith.constant 3 : index
    %c2_139 = arith.constant 2 : index
    %c0_140 = arith.constant 0 : index
    %203 = vector.load %arg1[%c3_138, %c2_139, %c0_140] : memref<4x8x128xf32, #tpu.memory_space<vmem>>, vector<1x1x128xf32>
    %204 = vector.shape_cast %203 : vector<1x1x128xf32> to vector<1x128xf32>
    %205 = vector.broadcast %202 : vector<6x1xf32> to vector<6x128xf32>
    %206 = vector.broadcast %204 : vector<1x128xf32> to vector<6x128xf32>
    %207 = arith.mulf %205, %206 : vector<6x128xf32>
    %208 = arith.addf %201, %207 : vector<6x128xf32>
    %c0_141 = arith.constant 0 : index
    %c3_142 = arith.constant 3 : index
    %209 = vector.load %arg2[%c0_141, %c3_142] : memref<6x8xf32, #tpu.memory_space<vmem>>, vector<6x1xf32>
    %c3_143 = arith.constant 3 : index
    %c3_144 = arith.constant 3 : index
    %c0_145 = arith.constant 0 : index
    %210 = vector.load %arg1[%c3_143, %c3_144, %c0_145] : memref<4x8x128xf32, #tpu.memory_space<vmem>>, vector<1x1x128xf32>
    %211 = vector.shape_cast %210 : vector<1x1x128xf32> to vector<1x128xf32>
    %212 = vector.broadcast %209 : vector<6x1xf32> to vector<6x128xf32>
    %213 = vector.broadcast %211 : vector<1x128xf32> to vector<6x128xf32>
    %214 = arith.mulf %212, %213 : vector<6x128xf32>
    %215 = arith.addf %208, %214 : vector<6x128xf32>
    %c0_146 = arith.constant 0 : index
    %c4_147 = arith.constant 4 : index
    %216 = vector.load %arg2[%c0_146, %c4_147] : memref<6x8xf32, #tpu.memory_space<vmem>>, vector<6x1xf32>
    %c3_148 = arith.constant 3 : index
    %c4_149 = arith.constant 4 : index
    %c0_150 = arith.constant 0 : index
    %217 = vector.load %arg1[%c3_148, %c4_149, %c0_150] : memref<4x8x128xf32, #tpu.memory_space<vmem>>, vector<1x1x128xf32>
    %218 = vector.shape_cast %217 : vector<1x1x128xf32> to vector<1x128xf32>
    %219 = vector.broadcast %216 : vector<6x1xf32> to vector<6x128xf32>
    %220 = vector.broadcast %218 : vector<1x128xf32> to vector<6x128xf32>
    %221 = arith.mulf %219, %220 : vector<6x128xf32>
    %222 = arith.addf %215, %221 : vector<6x128xf32>
    %c0_151 = arith.constant 0 : index
    %c5_152 = arith.constant 5 : index
    %223 = vector.load %arg2[%c0_151, %c5_152] : memref<6x8xf32, #tpu.memory_space<vmem>>, vector<6x1xf32>
    %c3_153 = arith.constant 3 : index
    %c5_154 = arith.constant 5 : index
    %c0_155 = arith.constant 0 : index
    %224 = vector.load %arg1[%c3_153, %c5_154, %c0_155] : memref<4x8x128xf32, #tpu.memory_space<vmem>>, vector<1x1x128xf32>
    %225 = vector.shape_cast %224 : vector<1x1x128xf32> to vector<1x128xf32>
    %226 = vector.broadcast %223 : vector<6x1xf32> to vector<6x128xf32>
    %227 = vector.broadcast %225 : vector<1x128xf32> to vector<6x128xf32>
    %228 = arith.mulf %226, %227 : vector<6x128xf32>
    %229 = arith.addf %222, %228 : vector<6x128xf32>
    %c0_156 = arith.constant 0 : index
    %c6_157 = arith.constant 6 : index
    %230 = vector.load %arg2[%c0_156, %c6_157] : memref<6x8xf32, #tpu.memory_space<vmem>>, vector<6x1xf32>
    %c3_158 = arith.constant 3 : index
    %c6_159 = arith.constant 6 : index
    %c0_160 = arith.constant 0 : index
    %231 = vector.load %arg1[%c3_158, %c6_159, %c0_160] : memref<4x8x128xf32, #tpu.memory_space<vmem>>, vector<1x1x128xf32>
    %232 = vector.shape_cast %231 : vector<1x1x128xf32> to vector<1x128xf32>
    %233 = vector.broadcast %230 : vector<6x1xf32> to vector<6x128xf32>
    %234 = vector.broadcast %232 : vector<1x128xf32> to vector<6x128xf32>
    %235 = arith.mulf %233, %234 : vector<6x128xf32>
    %236 = arith.addf %229, %235 : vector<6x128xf32>
    %c0_161 = arith.constant 0 : index
    %c7_162 = arith.constant 7 : index
    %237 = vector.load %arg2[%c0_161, %c7_162] : memref<6x8xf32, #tpu.memory_space<vmem>>, vector<6x1xf32>
    %c3_163 = arith.constant 3 : index
    %c7_164 = arith.constant 7 : index
    %c0_165 = arith.constant 0 : index
    %238 = vector.load %arg1[%c3_163, %c7_164, %c0_165] : memref<4x8x128xf32, #tpu.memory_space<vmem>>, vector<1x1x128xf32>
    %239 = vector.shape_cast %238 : vector<1x1x128xf32> to vector<1x128xf32>
    %240 = vector.broadcast %237 : vector<6x1xf32> to vector<6x128xf32>
    %241 = vector.broadcast %239 : vector<1x128xf32> to vector<6x128xf32>
    %242 = arith.mulf %240, %241 : vector<6x128xf32>
    %243 = arith.addf %236, %242 : vector<6x128xf32>
    %244 = vector.broadcast %0 : vector<6x1xf32> to vector<6x128xf32>
    %245 = arith.addf %243, %244 : vector<6x128xf32>
    %c3_166 = arith.constant 3 : index
    %c0_167 = arith.constant 0 : index
    %c0_168 = arith.constant 0 : index
    %246 = vector.load %arg4[%c3_166, %c0_167, %c0_168] : memref<4x6x128xf32, #tpu.memory_space<vmem>>, vector<1x6x128xf32>
    %247 = vector.shape_cast %246 : vector<1x6x128xf32> to vector<6x128xf32>
    %248 = vector.shape_cast %245 : vector<6x128xf32> to vector<1x6x128xf32>
    tpu.vector_store %arg4[%c3_166, %c0_167, %c0_168], %248 {strides = array<i32>} : memref<4x6x128xf32, #tpu.memory_space<vmem>>, vector<1x6x128xf32>,
    return
  }
  func.func @transform_0(%arg0: i32) -> (i32, i32, i32) {
    %c0_i32 = arith.constant 0 : i32
    %c0_i32_0 = arith.constant 0 : i32
    %c0_i32_1 = arith.constant 0 : i32
    return %arg0, %c0_i32, %c0_i32_0 : i32, i32, i32
  }
  func.func @transform_1(%arg0: i32) -> (i32, i32) {
    %c0_i32 = arith.constant 0 : i32
    %c0_i32_0 = arith.constant 0 : i32
    %c0_i32_1 = arith.constant 0 : i32
    return %c0_i32, %c0_i32_0 : i32, i32
  }
  func.func @transform_2(%arg0: i32) -> (i32, i32) {
    %c0_i32 = arith.constant 0 : i32
    %c0_i32_0 = arith.constant 0 : i32
    %c0_i32_1 = arith.constant 0 : i32
    return %c0_i32, %c0_i32_0 : i32, i32
  }
  func.func @transform_3(%arg0: i32) -> (i32, i32, i32) {
    %c0_i32 = arith.constant 0 : i32
    %c0_i32_0 = arith.constant 0 : i32
    %c0_i32_1 = arith.constant 0 : i32
    return %arg0, %c0_i32, %c0_i32_0 : i32, i32, i32
  }
}

</mosaic_0001>

<bundles_post_ra>
// kernel: single_stage_3d_forward.5
= control target key start
LH: loop header
LB: loop body
LE: loop exit
PB: predicated region body
PF: predicated region fallthrough
CT: control target
= control target key end

     0   :  { %s534_s12 = smov 0   ;;  %s583_s0 = inlined_call_operand.vmem [shape: f32[8,4,128], index: 0, kind: input, shape index: {}]   ;;  %s584_s1 = inlined_call_operand.vmem [shape: f32[8,4], index: 1, kind: input, shape index: {}]   ;;  %s585_s2 = inlined_call_operand.vmem [shape: f32[8,1], index: 2, kind: input, shape index: {}]   ;;  %s586_s3 = inlined_call_operand.vmem [shape: f32[8,8,128], index: 3, kind: output, shape index: {}]  }
   0x1 LB: > { %s434_s13 = sadd.s32 4294967295, %s508_s12   ;;  %p438_p0 = scmp.ge.s32.totalorder %s508_s12, 1  ;;  %s508_s12 = sphi %s534_s12, %s13_s12  }
   0x2   : > { %p138_p1 = scmp.lt.s32.totalorder %s508_s12, 3 }
   0x4   : > { %p139_p2 = pnand %p438_p0, %p138_p1 }
   0x5   : > { %v228_v0 = vld [vmem:[%s584_s1] sm:$0xff] (!%p139_p2)  ;;  %v510_v1 = vmov (!%p139_p2), 1   ;;  %v511_v2 = vmov (!%p139_p2), 0   ;;  %v512_v3 = vmov (!%p139_p2), 2   ;;  %v513_v4 = vmov (!%p139_p2), 3   ;;  %s439_s18 = sshll.u32 (!%p139_p2), %s434_s13, 2 }
   0x6   : > { %142 = sbr.rel (%p139_p2) target bundleno = 185 (0xb9), region = 32  ;;  %488 = vset.pattern.permute.xlu0 (!%p139_p2), %v510_v1  ;;  %490 = vset.pattern.permute.xlu1 (!%p139_p2), %v511_v2  ;;  %v174_v5 = vld [vmem:[%s585_s2] sm:$0xff] (!%p139_p2)  ;;  %p163_p3 = scmp.lt.s32.totalorder (!%p139_p2), %s439_s18, 7 }
   0x7   : > { %233 = vperm.xlu1 (!%p139_p2), %490, %v228_v0   ;;  %190 = vperm.xlu0 (!%p139_p2), %488, %v228_v0  }
   0xb   : > { %491 = vset.pattern.permute.xlu1 (!%p139_p2), %v510_v1  ;;  %489 = vset.pattern.permute.xlu0 (!%p139_p2), %v511_v2 }
   0xc   : > { %244 = vperm.xlu1 (!%p139_p2), %491, %v228_v0   ;;  %179 = vperm.xlu0 (!%p139_p2), %489, %v228_v0  }
   0xd   : > { %s588_s18 = smov (!%p163_p3, %s439_s18), 7 }
   0xe   : > { %s440_s19 = sshll.u32 %s588_s18, 2  ;;  %s442_s23 = sshll.u32 %s588_s18, 3 }
   0xf   : > { %s553_s22 = scalar_lea.vmem %s583_s0, %s440_s19  ;;  %s563_s26 = scalar_lea.vmem %s586_s3, %s442_s23 }
  0x10   : > { %492 = vset.pattern.permute.xlu1 %v512_v3  ;;  %283 = vperm.xlu0 %489, %v228_v0   ;;  %v444_v13 = vld [vmem:[%s553_s22 + $0x1] ss:$0 sm:$0xff]  ;;  %v443_v14 = vld [vmem:[%s553_s22] ss:$0 sm:$0xff]  ;;  %v445_v18 = vld [vmem:[%s553_s22 + $0x2] ss:$0 sm:$0xff] }
  0x11   : > { %201 = vperm.xlu1 %492, %v228_v0   ;;  %v446_v20 = vld [vmem:[%s553_s22 + $0x3] ss:$0 sm:$0xff]  ;;  %v450_v28 = vld [vmem:[%s553_s22 + $0x5] ss:$0 sm:$0xff]  ;;  %v448_v31 = vld [vmem:[%s553_s22 + $0x4] ss:$0 sm:$0xff] }
  0x12   : > { %v452_v32 = vld [vmem:[%s553_s22 + $0x6] ss:$0 sm:$0xff]  ;;  %v457_v36 = vld [vmem:[%s553_s22 + $0x8] ss:$0 sm:$0xff]  ;;  %v459_v37 = vld [vmem:[%s553_s22 + $0x9] ss:$0 sm:$0xff] }
  0x13   : > { %v468_v40 = vld [vmem:[%s553_s22 + $0xd] ss:$0 sm:$0xff]  ;;  %v461_v41 = vld [vmem:[%s553_s22 + $0xa] ss:$0 sm:$0xff]  ;;  %v454_v42 = vld [vmem:[%s553_s22 + $0x7] ss:$0 sm:$0xff] }
  0x14   : > { %333 = vperm.xlu0 %489, %v228_v0   ;;  %v466_v46 = vld [vmem:[%s553_s22 + $0xc] ss:$0 sm:$0xff]  ;;  %v470_v49 = vld [vmem:[%s553_s22 + $0xe] ss:$0 sm:$0xff]  ;;  %v463_v53 = vld [vmem:[%s553_s22 + $0xb] ss:$0 sm:$0xff] }
  0x15   : > { %493 = vset.pattern.permute.xlu1 %v510_v1  ;;  %v472_v63 = vld [vmem:[%s553_s22 + $0xf] ss:$0 sm:$0xff] }
  0x16   : > { %294 = vperm.xlu1 %493, %v228_v0  }
  0x18   : > { %496 = vset.pattern.permute.xlu0 %v513_v4 }
  0x19   : > { %212 = vperm.xlu0 %496, %v228_v0  }
  0x1a   : > { %494 = vset.pattern.permute.xlu1 %v512_v3 }
  0x1b   : > { %255 = vperm.xlu1 %494, %v228_v0  }
  0x1d   : > { %499 = vset.pattern.permute.xlu0 %v512_v3 }
  0x1e   : > { %355 = vperm.xlu0 %499, %v228_v0  }
  0x1f   : > { %495 = vset.pattern.permute.xlu1 %v510_v1 }
  0x20   : > { %344 = vperm.xlu1 %495, %v228_v0  }
  0x22   : > { %500 = vset.pattern.permute.xlu0 %v511_v2 }
  0x23   : > { %223 = vperm.xlu0 %500, %v174_v5  }
  0x24   : > { %497 = vset.pattern.permute.xlu1 %v512_v3 }
  0x25   : > { %305 = vperm.xlu1 %497, %v228_v0  }
  0x27   : > { %501 = vset.pattern.permute.xlu0 %v513_v4 }
  0x29   : > { %498 = vset.pattern.permute.xlu1 %v513_v4 }
  0x2a   : > { %266 = vperm.xlu1 %498, %v228_v0  }
  0x2e   : > { %316 = vperm.xlu1 %498, %v228_v0  }
  0x32   : > { %366 = vperm.xlu1 %498, %v228_v0  }
  0x86   : > { %v234_v6 = vpop.permute.xlu1 %233  ;;  %v191_v7 = vpop.permute.xlu0 %190 }
  0x87   : > { %v197_v16 = vmul.f32 %v444_v13, %v191_v7  ;;  %v240_v38 = vmul.f32 %v448_v31, %v234_v6 }
  0x8b   : > { %v245_v8 = vpop.permute.xlu1 %244  ;;  %v180_v9 = vpop.permute.xlu0 %179 }
  0x8c   : > { %v186_v17 = vmul.f32 %v443_v14, %v180_v9  ;;  %v251_v34 = vmul.f32 %v450_v28, %v245_v8 }
  0x8e   : > { %v198_v22 = vadd.f32 %v197_v16, %v186_v17  ;;  %v252_v43 = vadd.f32 %v251_v34, %v240_v38 }
  0x8f   : > { %v284_v10 = vpop.permute.xlu0 %283 }
  0x90   : > { %v202_v11 = vpop.permute.xlu1 %201  ;;  %v290_v44 = vmul.f32 %v457_v36, %v284_v10 }
  0x91   : > { %v208_v23 = vmul.f32 %v445_v18, %v202_v11 }
  0x93   : > { %v334_v12 = vpop.permute.xlu0 %333  ;;  %v209_v26 = vadd.f32 %v208_v23, %v198_v22 }
  0x94   : > { %v340_v54 = vmul.f32 %v466_v46, %v334_v12 }
  0x95   : > { %v295_v15 = vpop.permute.xlu1 %294 }
  0x96   : > { %v301_v45 = vmul.f32 %v459_v37, %v295_v15 }
  0x98   : > { %v213_v19 = vpop.permute.xlu0 %212  ;;  %v302_v55 = vadd.f32 %v301_v45, %v290_v44 }
  0x99   : > { %v219_v24 = vmul.f32 %v446_v20, %v213_v19 }
  0x9a   : > { %v256_v21 = vpop.permute.xlu1 %255 }
  0x9b   : > { %v220_v29 = vadd.f32 %v219_v24, %v209_v26  ;;  %v262_v39 = vmul.f32 %v452_v32, %v256_v21 }
  0x9d   : > { %v356_v25 = vpop.permute.xlu0 %355  ;;  %v263_v48 = vadd.f32 %v262_v39, %v252_v43 }
  0x9e   : > { %v362_v57 = vmul.f32 %v470_v49, %v356_v25 }
  0x9f   : > { %v345_v27 = vpop.permute.xlu1 %344 }
  0xa0   : > { %v351_v50 = vmul.f32 %v468_v40, %v345_v27 }
  0xa2   : > { %v224_v30 = vpop.permute.xlu0 %223  ;;  %v352_v59 = vadd.f32 %v351_v50, %v340_v54 }
  0xa3   : > { %v226_v33 = vadd.f32 %v224_v30, %v220_v29 }
  0xa4   : > { %v306_v35 = vpop.permute.xlu1 %305  ;;  %v363_v3 = vadd.f32 %v362_v57, %v352_v59 }
  0xa5   : > { %227 = vst [vmem:[%s563_s26] sm:$0xff] %v226_v33  ;;  %v312_v51 = vmul.f32 %v461_v41, %v306_v35 }
  0xa7   : > { %v313_v60 = vadd.f32 %v312_v51, %v302_v55 }
  0xa9   : > { %v267_v47 = vpop.permute.xlu1 %266 }
  0xaa   : > { %v273_v52 = vmul.f32 %v454_v42, %v267_v47 }
  0xac   : > { %v274_v56 = vadd.f32 %v273_v52, %v263_v48 }
  0xad   : > { %v317_v58 = vpop.permute.xlu1 %316 }
  0xae   : > { %v275_v61 = vadd.f32 %v274_v56, %v224_v30  ;;  %v323_v62 = vmul.f32 %v463_v53, %v317_v58 }
  0xb0   : > { %455 = vst [vmem:[%s563_s26 + $0x8] sm:$0xff] %v275_v61  ;;  %v324_v0 = vadd.f32 %v323_v62, %v313_v60 }
  0xb1   : > { %v367_v1 = vpop.permute.xlu1 %366 }
  0xb2   : > { %v325_v2 = vadd.f32 %v324_v0, %v224_v30  ;;  %v373_v4 = vmul.f32 %v472_v63, %v367_v1 }
  0xb4   : > { %464 = vst [vmem:[%s563_s26 + $0x10] sm:$0xff] %v325_v2  ;;  %v374_v5 = vadd.f32 %v373_v4, %v363_v3 }
  0xb6   : > { %v375_v6 = vadd.f32 %v374_v5, %v224_v30 }
  0xb8   : > { %473 = vst [vmem:[%s563_s26 + $0x18] sm:$0xff] %v375_v6 }
  0xb9 PF: > { %s13_s12 = sadd.s32 1, %s508_s12  }
  0xba   : > { %p10_p4 = scmp.ge.s32.totalorder %s13_s12, 4  }
  0xbc   :  { %12 = sbr.rel (!%p10_p4) target bundleno = 1 (0x1), region = 68 }

// kernel: single_stage_3d_forward.6
= control target key start
LH: loop header
LB: loop body
LE: loop exit
PB: predicated region body
PF: predicated region fallthrough
CT: control target
= control target key end

     0   :  { %s1325_s30 = smov 0   ;;  %s1526_s0 = inlined_call_operand.vmem [shape: f32[8,8,128], index: 0, kind: input, shape index: {}, may-alias: {0,1,2}]   ;;  %s1527_s1 = inlined_call_operand.vmem [shape: f32[8,8,128], index: 1, kind: input, shape index: {}, may-alias: {0,1,2}]   ;;  %s1528_s2 = inlined_call_operand.vmem [shape: f32[8,8,128], index: 2, kind: input, shape index: {}, may-alias: {0,1,2}]   ;;  %s1529_s3 = inlined_call_operand.vmem [shape: f32[8,27], index: 3, kind: input, shape index: {}]   ;;  %s1530_s4 = inlined_call_operand.vmem [shape: f32[8,1], index: 4, kind: input, shape index: {}]   ;;  %s1531_s5 = inlined_call_operand.vmem [shape: f32[8,1], index: 5, kind: input, shape index: {}]   ;;  %s1532_s6 = inlined_call_operand.vmem [shape: f32[8,8], index: 6, kind: input, shape index: {}]   ;;  %s1533_s7 = inlined_call_operand.vmem [shape: f32[8,1], index: 7, kind: input, shape index: {}]   ;;  %s1534_s8 = inlined_call_operand.vmem [shape: f32[9,128], index: 8, kind: input, shape index: {}]   ;;  %s1535_s9 = inlined_call_operand.vmem [shape: f32[8,8,128], index: 9, kind: output, shape index: {}]  }
   0x1 LB: > { %s1331_s10 = sadd.s32 4294967295, %s1237_s30   ;;  %p1092_p0 = scmp.ge.s32.totalorder %s1237_s30, 1  ;;  %s1237_s30 = sphi %s1325_s30, %s19_s30  }
   0x2   : > { %p360_p1 = scmp.lt.s32.totalorder %s1237_s30, 9 }
   0x4   : > { %p361_p2 = pnand %p1092_p0, %p360_p1 }
   0x5   : > { %s1336_s11 = sadd.s32 (!%p361_p2), 1, %s1331_s10  ;;  %s1339_s12 = sadd.s32 (!%p361_p2), 4294967295, %s1331_s10  ;;  %v1239_v0 = vmov (!%p361_p2), 18   ;;  %v1240_v1 = vmov (!%p361_p2), 0   ;;  %v1349_v2 = vld [vmem:[%s1529_s3] sm:$0xff] (!%p361_p2)  ;;  %v1241_v7 = vmov (!%p361_p2), 10  }
   0x6   : > { %364 = sbr.rel (%p361_p2) target bundleno = 471 (0x1d7), region = 56  ;;  %1196 = vset.pattern.permute.xlu1 (!%p361_p2), %v1239_v0  ;;  %1194 = vset.pattern.permute.xlu0 (!%p361_p2), %v1240_v1  ;;  %p467_p3 = scmp.ge.s32.totalorder (!%p361_p2), %s1336_s11, 0  ;;  %v1242_v8 = vmov (!%p361_p2), 9   ;;  %v1243_v9 = vmov (!%p361_p2), 1   ;;  %v1244_v10 = vmov (!%p361_p2), 19   ;;  %v1246_v12 = vmov (!%p361_p2), 2  }
   0x7   : > { %p468_p4 = scmp.le.s32.totalorder (!%p361_p2), %s1336_s11, 7  ;;  %p461_p5 = scmp.ge.s32.totalorder (!%p361_p2), %s1339_s12, 0  ;;  %v1114_v11 = vld [vmem:[%s1534_s8] ss:$0 sm:$0xff] (!%p361_p2)  ;;  %v1247_v13 = vmov (!%p361_p2), 11   ;;  %v1248_v14 = vmov (!%p361_p2), 3  }
   0x8   : > { %p462_p6 = scmp.le.s32.totalorder (!%p361_p2), %s1339_s12, 7  ;;  %s1536_s19 = smov (!%p361_p2), 119   ;;  %v1249_v15 = vmov (!%p361_p2), 20   ;;  %v1116_v16 = vld [vmem:[%s1534_s8 + $0x2] ss:$0 sm:$0xff] (!%p361_p2)  ;;  %v1251_v18 = vmov (!%p361_p2), 5  }
   0x9   : > { %p469_p7 = pnand (!%p361_p2), %p468_p4, %p467_p3  ;;  %v1115_v17 = vld [vmem:[%s1534_s8 + $0x1] ss:$0 sm:$0xff] (!%p361_p2)  ;;  %s1538_s24 = smov (!%p361_p2), 121   ;;  %v1253_v19 = vmov (!%p361_p2), 12   ;;  %v1254_v20 = vmov (!%p361_p2), 6   ;;  %v1255_v21 = vmov (!%p361_p2), 21  }
   0xa   : > { %p463_p8 = pnand (!%p361_p2), %p462_p6, %p461_p5  ;;  %s1537_s25 = smov (!%p361_p2), 120   ;;  %v1118_v22 = vld [vmem:[%s1534_s8 + $0x5] ss:$0 sm:$0xff] (!%p361_p2)  ;;  %v1117_v23 = vld [vmem:[%s1534_s8 + $0x3] ss:$0 sm:$0xff] (!%p361_p2)  ;;  %v1257_v24 = vmov (!%p361_p2), 16  }
   0xb   : > { %s1258_s14 = smov (!%p361_p2), 127   ;;  %v1259_v25 = vmov (!%p361_p2), 14   ;;  %v1119_v26 = vld [vmem:[%s1534_s8 + $0x6] ss:$0 sm:$0xff] (!%p361_p2)  ;;  %s1260_s17 = smov (!%p361_p2), 7   ;;  %v1261_v27 = vmov (!%p361_p2), 17  }
   0xc   : > { %v1262_v28 = vmov (!%p361_p2), 23   ;;  %v1120_v29 = vld [vmem:[%s1534_s8 + $0x7] ss:$0 sm:$0xff] (!%p361_p2)  ;;  %v1263_v30 = vmov (!%p361_p2), 15   ;;  %s1264_s21 = smov (!%p361_p2), 8   ;;  %v1265_v32 = vmov (!%p361_p2), 13  }
   0xd   : > { %s1113_s13 = scalar_select %p469_p7, 0.0, 1.0  ;;  %v1121_v31 = vld [vmem:[%s1534_s8 + $0x8] ss:$0 sm:$0xff]  ;;  %v1266_v33 = vmov 24   ;;  %v1268_v34 = vmov 7  }
   0xe   : > { %s1112_s16 = scalar_select %p463_p8, 0.0, 1.0  ;;  %v1269_v35 = vmov 25   ;;  %v1270_v36 = vmov 8   ;;  %v1271_v37 = vmov 0.0   ;;  %vm518_vm0 = vcmask 1047624  }
   0xf   : > { %v492_v3 = vstv %s1113_s13  ;;  %s1256_s13 = smov 1   ;;  %s1267_s26 = smov 9   ;;  %472 = vst [vmem:[#allocation2] sm:$0xff] %v1271_v37  ;;  %vm563_vm1 = vcmask 1047616   ;;  %vm608_vm2 = vcmask 1047608   ;;  %vm653_vm3 = vcmask 1047560  }
  0x10   : > { %v1352_v4 = vmul.f32 %v492_v3, %v1349_v2  ;;  %v474_v5 = vstv %s1112_s16  ;;  %p417_p9 = scmp.gt.s32.totalorder %s1339_s12, 0  ;;  %p430_p10 = scmp.gt.s32.totalorder %s1331_s10, 0  ;;  %v1272_v3 = vmov 26   ;;  %vm728_vm4 = vcmask 1039360  }
  0x11   : > { %v1355_v6 = vmul.f32 %v474_v5, %v1349_v2  ;;  %p443_p11 = scmp.gt.s32.totalorder %s1336_s11, 0  ;;  %p1093_p12 = scmp.lt.s32.totalorder %s1339_s12, 7  ;;  %vm773_vm5 = vcmask 990208   ;;  %vm818_vm6 = vcmask 982016   ;;  %vm863_vm7 = vcmask 973824  }
  0x12   : > { %497 = vperm.xlu1 %1196, %v1352_v4   ;;  %s418_s27 = scalar_select %p417_p9, %s1339_s12, 0 }
  0x13   : > { %479 = vperm.xlu0 %1194, %v1355_v6   ;;  %p1099_p13 = scmp.lt.s32.totalorder %s1331_s10, 7  ;;  %p1105_p0 = scmp.lt.s32.totalorder %s1336_s11, 7 }
  0x14   : > { %s431_s28 = scalar_select %p430_p10, %s1331_s10, 0 }
  0x15   : > { %s1543_s11 = smov (!%p443_p11, %s1336_s11), 0  ;;  %s1545_s27 = smov (!%p1093_p12, %s418_s27), 7 }
  0x16   : > { %1197 = vset.pattern.permute.xlu1 %v1241_v7  ;;  %s1547_s28 = smov (!%p1099_p13, %s431_s28), 7  ;;  %s1549_s11 = smov (!%p1105_p0, %s1543_s11), 7 }
  0x17   : > { %1195 = vset.pattern.permute.xlu0 %v1242_v8  ;;  %533 = vperm.xlu1 %1197, %v1349_v2   ;;  %p421_p1 = scmp.lt.s32.totalorder %s1545_s27, 7  ;;  %p434_p2 = scmp.lt.s32.totalorder %s1547_s28, 7 }
  0x18   : > { %487 = vperm.xlu0 %1195, %v1349_v2   ;;  %p447_p3 = scmp.lt.s32.totalorder %s1549_s11, 7  ;;  %s1557_s10 = smov (!%p1099_p13, %s1331_s10), 7 }
  0x19   : > { %s1551_s27 = smov (!%p421_p1, %s1545_s27), 7  ;;  %s1553_s28 = smov (!%p434_p2, %s1547_s28), 7 }
  0x1a   : > { %s1555_s11 = smov (!%p447_p3, %s1549_s11), 7  ;;  %s1098_s29 = sshll.u32 %s1551_s27, 3 }
  0x1b   : > { %1198 = vset.pattern.permute.xlu1 %v1243_v9  ;;  %s1104_s15 = sshll.u32 %s1553_s28, 3  ;;  %s424_s18 = scalar_lea.vmem %s1526_s0, %s1098_s29 }
  0x1c   : > { %525 = vperm.xlu1 %1198, %v1355_v6   ;;  %1199 = vset.pattern.permute.xlu0 %v1244_v10  ;;  %s437_s23 = scalar_lea.vmem %s1527_s1, %s1104_s15  ;;  %v1436_v40 = vld [vmem:[%s424_s18] sm:$0xff]  ;;  %s1111_s15 = sshll.u32 %s1557_s10, 3 }
  0x1d   : > { %542 = vperm.xlu0 %1199, %v1352_v4   ;;  %v1438_v41 = vld [vmem:[%s437_s23] sm:$0xff]  ;;  %s459_s18 = scalar_lea.vmem %s1535_s9, %s1111_s15 }
  0x20   : > { %508 = vrot.lane.b32.xlu1 %v1114_v11, %s1536_s19  ;;  %s1110_s19 = sshll.u32 %s1555_s11, 3  ;;  %s1539_s11 = smov 121  }
  0x21   : > { %1200 = vset.pattern.permute.xlu1 %v1246_v12  ;;  %1201 = vset.pattern.permute.xlu0 %v1247_v13  ;;  %s450_s27 = scalar_lea.vmem %s1528_s2, %s1110_s19  ;;  %s1540_s19 = smov 120  }
  0x22   : > { %578 = vperm.xlu0 %1201, %v1349_v2   ;;  %v1445_v46 = vld [vmem:[%s450_s27] sm:$0xff] }
  0x24   : > { %570 = vperm.xlu1 %1200, %v1355_v6  }
  0x26   : > { %1203 = vset.pattern.permute.xlu0 %v1248_v14 }
  0x27   : > { %615 = vperm.xlu0 %1203, %v1355_v6  }
  0x28   : > { %1202 = vset.pattern.permute.xlu1 %v1249_v15 }
  0x29   : > { %587 = vperm.xlu1 %1202, %v1352_v4  }
  0x2b   : > { %598 = vrot.lane.b32.xlu0 %v1116_v16, %s1538_s24  ;;  %v1273_v16 = vmov 4  }
  0x2c   : > { %1206 = vset.pattern.permute.xlu0 %v1251_v18 }
  0x2d   : > { %553 = vrot.lane.b32.xlu1 %v1115_v17, %s1537_s25 }
  0x2e   : > { %1204 = vset.pattern.permute.xlu1 %v1253_v19 }
  0x2f   : > { %690 = vperm.xlu0 %1206, %v1355_v6  }
  0x31   : > { %623 = vperm.xlu1 %1204, %v1349_v2  }
  0x33   : > { %1209 = vset.pattern.permute.xlu0 %v1254_v20 }
  0x34   : > { %735 = vperm.xlu0 %1209, %v1355_v6  }
  0x35   : > { %1205 = vset.pattern.permute.xlu1 %v1255_v21 }
  0x36   : > { %632 = vperm.xlu1 %1205, %v1352_v4  }
  0x38   : > { %718 = vrot.lane.b32.xlu0 %v1118_v22, %s1256_s13 }
  0x39   : > { %1213 = vset.pattern.permute.xlu0 %v1257_v24 }
  0x3a   : > { %643 = vrot.lane.b32.xlu1 %v1117_v23, %s1258_s14 }
  0x3b   : > { %1207 = vset.pattern.permute.xlu1 %v1259_v25 }
  0x3c   : > { %788 = vperm.xlu0 %1213, %v1349_v2  }
  0x3e   : > { %698 = vperm.xlu1 %1207, %v1349_v2  }
  0x40   : > { %763 = vrot.lane.b32.xlu0 %v1119_v26, %s1260_s17 }
  0x41   : > { %1216 = vset.pattern.permute.xlu0 %v1261_v27  ;;  %v1274_v27 = vmov 22  }
  0x42   : > { %1208 = vset.pattern.permute.xlu1 %v1262_v28 }
  0x43   : > { %707 = vperm.xlu1 %1208, %v1352_v4  }
  0x44   : > { %833 = vperm.xlu0 %1216, %v1349_v2  }
  0x47   : > { %1210 = vset.pattern.permute.xlu1 %v1263_v30 }
  0x48   : > { %743 = vperm.xlu1 %1210, %v1349_v2   ;;  %808 = vrot.lane.b32.xlu0 %v1120_v29, %s1264_s21 }
  0x49   : > { %1219 = vset.pattern.permute.xlu0 %v1265_v32 }
  0x4c   : > { %1211 = vset.pattern.permute.xlu1 %v1266_v33  ;;  %853 = vrot.lane.b32.xlu0 %v1121_v31, %s1267_s26 }
  0x4d   : > { %752 = vperm.xlu1 %1211, %v1352_v4  }
  0x50   : > { %668 = vperm.xlu0 %1219, %v1349_v2  }
  0x51   : > { %1212 = vset.pattern.permute.xlu1 %v1268_v34 }
  0x52   : > { %780 = vperm.xlu1 %1212, %v1355_v6  }
  0x54   : > { %1221 = vset.pattern.permute.xlu0 %v1240_v1 }
  0x56   : > { %1214 = vset.pattern.permute.xlu1 %v1269_v35 }
  0x57   : > { %797 = vperm.xlu1 %1214, %v1352_v4  }
  0x5b   : > { %1215 = vset.pattern.permute.xlu1 %v1270_v36 }
  0x91   : > { %v498_v38 = vpop.permute.xlu1 %497 }
  0x92   : > { %v480_v39 = vpop.permute.xlu0 %479  ;;  %v500_v49 = vmul.f32 %v498_v38, %v1445_v46 }
  0x93   : > { %v482_v44 = vmul.f32 %v480_v39, %v1436_v40 }
  0x96   : > { %v534_v42 = vpop.permute.xlu1 %533 }
  0x97   : > { %v488_v43 = vpop.permute.xlu0 %487  ;;  %v536_v59 = vmul.f32 %v534_v42, %v1438_v41 }
  0x98   : > { %v490_v45 = vmul.f32 %v1438_v41, %v488_v43 }
  0x9a   : > { %v491_v47 = vadd.f32 %v490_v45, %v482_v44 }
  0x9b   : > { %v526_v48 = vpop.permute.xlu1 %525 }
  0x9c   : > { %v543_v50 = vpop.permute.xlu0 %542  ;;  %v501_v51 = vadd.f32 %v500_v49, %v491_v47  ;;  %v528_v55 = vmul.f32 %v526_v48, %v1436_v40 }
  0x9d   : > { %v545_v62 = vmul.f32 %v543_v50, %v1445_v46 }
  0x9e   : > { %v537_v61 = vadd.f32 %v536_v59, %v528_v55 }
  0x9f   : > { %v509_v52 = vpop.permute.xlu1 %508 }
  0xa0   : > { %v511_v53 = vmul.f32 %v509_v52, %v501_v51  ;;  %v546_v5 = vadd.f32 %v545_v62, %v537_v61  ;;  %v1485_v61 = vld [vmem:[%s1532_s6] sm:$0xff] }
  0xa1   : > { %v579_v54 = vpop.permute.xlu0 %578 }
  0xa2   : > { %514 = vrot.lane.b32.xlu1 %v511_v53, %s1267_s26  ;;  %v581_v57 = vmul.f32 %v579_v54, %v1438_v41 }
  0xa3   : > { %v571_v56 = vpop.permute.xlu1 %570 }
  0xa4   : > { %v573_v58 = vmul.f32 %v571_v56, %v1436_v40 }
  0xa6   : > { %825 = vperm.xlu1 %1215, %v1355_v6   ;;  %v616_v60 = vpop.permute.xlu0 %615  ;;  %v582_v63 = vadd.f32 %v581_v57, %v573_v58 }
  0xa7   : > { %v618_v15 = vmul.f32 %v616_v60, %v1436_v40  ;;  %v866_v60 = vld [vmem:[%s1530_s4] sm:$0xff] }
  0xa8   : > { %v588_v0 = vpop.permute.xlu1 %587 }
  0xa9   : > { %v590_v2 = vmul.f32 %v588_v0, %v1445_v46 }
  0xaa   : > { %1217 = vset.pattern.permute.xlu1 %v1272_v3  ;;  %v599_v10 = vpop.permute.xlu0 %598 }
  0xab   : > { %842 = vperm.xlu1 %1217, %v1352_v4   ;;  %v591_v7 = vadd.f32 %v590_v2, %v582_v63 }
  0xac   : > { %v554_v8 = vpop.permute.xlu1 %553 }
  0xad   : > { %v556_v11 = vmul.f32 %v554_v8, %v546_v5  ;;  %v601_v13 = vmul.f32 %v599_v10, %v591_v7 }
  0xae   : > { %v691_v25 = vpop.permute.xlu0 %690 }
  0xaf   : > { %559 = vrot.lane.b32.xlu1 %v556_v11, %s1264_s21  ;;  %v693_v30 = vmul.f32 %v691_v25, %v1436_v40 }
  0xb0   : > { %1218 = vset.pattern.permute.xlu1 %v1273_v16  ;;  %v624_v17 = vpop.permute.xlu1 %623 }
  0xb1   : > { %v626_v19 = vmul.f32 %v624_v17, %v1438_v41 }
  0xb3   : > { %604 = vrot.lane.b32.xlu1 %v601_v13, %s1260_s17  ;;  %v627_v21 = vadd.f32 %v626_v19, %v618_v15  ;;  %v736_v32 = vpop.permute.xlu0 %735  ;;  %s1541_s17 = smov 119   ;;  %v873_v15 = vld [vmem:[%s1531_s5] sm:$0xff] }
  0xb4   : > { %v738_v38 = vmul.f32 %v736_v32, %v1436_v40  ;;  %v883_v19 = vld [vmem:[%s1533_s7] sm:$0xff] }
  0xb5   : > { %v633_v22 = vpop.permute.xlu1 %632 }
  0xb6   : > { %v635_v23 = vmul.f32 %v633_v22, %v1445_v46 }
  0xb7   : > { %660 = vperm.xlu1 %1218, %v1355_v6   ;;  %v719_v36 = vpop.permute.xlu0 %718 }
  0xb8   : > { %v636_v24 = vadd.f32 %v635_v23, %v627_v21 }
  0xb9   : > { %v644_v26 = vpop.permute.xlu1 %643 }
  0xba   : > { %v646_v28 = vmul.f32 %v644_v26, %v636_v24 }
  0xbb   : > { %1220 = vset.pattern.permute.xlu1 %v1274_v27  ;;  %v789_v43 = vpop.permute.xlu0 %788 }
  0xbc   : > { %677 = vperm.xlu1 %1220, %v1352_v4   ;;  %v791_v49 = vmul.f32 %v789_v43, %v1438_v41 }
  0xbd   : > { %v699_v29 = vpop.permute.xlu1 %698 }
  0xbe   : > { %v701_v31 = vmul.f32 %v699_v29, %v1438_v41 }
  0xbf   : > { %v764_v48 = vpop.permute.xlu0 %763 }
  0xc0   : > { %649 = vrot.lane.b32.xlu1 %v646_v28, %s1256_s13  ;;  %v702_v33 = vadd.f32 %v701_v31, %v693_v30 }
  0xc1   : > { %1222 = vset.pattern.permute.xlu1 %v1240_v1 }
  0xc2   : > { %v708_v6 = vpop.permute.xlu1 %707 }
  0xc3   : > { %v710_v35 = vmul.f32 %v708_v6, %v1445_v46  ;;  %v834_v53 = vpop.permute.xlu0 %833 }
  0xc4   : > { %v836_v0 = vmul.f32 %v834_v53, %v1438_v41 }
  0xc5   : > { %v711_v37 = vadd.f32 %v710_v35, %v702_v33 }
  0xc7   : > { %v721_v4 = vmul.f32 %v719_v36, %v711_v37  ;;  %v744_v39 = vpop.permute.xlu1 %743  ;;  %v809_v57 = vpop.permute.xlu0 %808 }
  0xc8   : > { %v746_v42 = vmul.f32 %v744_v39, %v1438_v41 }
  0xc9   : > { %724 = vrot.lane.b32.xlu0 %v721_v4, %s1258_s14 }
  0xca   : > { %v747_v44 = vadd.f32 %v746_v42, %v738_v38 }
  0xcb   : > { %v854_v7 = vpop.permute.xlu0 %853 }
  0xcc   : > { %v753_v45 = vpop.permute.xlu1 %752 }
  0xcd   : > { %v755_v47 = vmul.f32 %v753_v45, %v1445_v46 }
  0xcf   : > { %v756_v1 = vadd.f32 %v755_v47, %v747_v44  ;;  %v669_v25 = vpop.permute.xlu0 %668 }
  0xd0   : > { %v671_v28 = vmul.f32 %v669_v25, %v1438_v41 }
  0xd1   : > { %v766_v50 = vmul.f32 %v764_v48, %v756_v1  ;;  %v781_v51 = vpop.permute.xlu1 %780 }
  0xd2   : > { %v783_v52 = vmul.f32 %v781_v51, %v1436_v40 }
  0xd3   : > { %769 = vrot.lane.b32.xlu1 %v766_v50, %s1539_s11 }
  0xd4   : > { %v792_v54 = vadd.f32 %v791_v49, %v783_v52 }
  0xd6   : > { %v798_v55 = vpop.permute.xlu1 %797 }
  0xd7   : > { %v800_v56 = vmul.f32 %v798_v55, %v1445_v46 }
  0xd9   : > { %v801_v58 = vadd.f32 %v800_v56, %v792_v54 }
  0xdb   : > { %v811_v59 = vmul.f32 %v809_v57, %v801_v58 }
  0xdd   : > { %814 = vrot.lane.b32.xlu0 %v811_v59, %s1540_s19 }
  0xe1   : > { %869 = vperm.xlu0 %1221, %v866_v60  }
  0xe5   : > { %894 = vperm.xlu0 %1221, %v1485_v61  }
  0xe9   : > { %1224 = vset.pattern.permute.xlu0 %v1246_v12 }
  0xea   : > { %916 = vperm.xlu0 %1224, %v1485_v61  }
  0xee   : > { %1227 = vset.pattern.permute.xlu0 %v1251_v18 }
  0xef   : > { %949 = vperm.xlu0 %1227, %v1485_v61  }
  0xf3   : > { %1230 = vset.pattern.permute.xlu0 %v1268_v34 }
 0x114   : > { %v515_v62 = vpop.permute.xlu1 %514 }
 0x115   : > { %519 = vst.msk [vmem:[#allocation2] sm:$0xff] %vm518_vm0, %v515_v62 }
 0x11c   : > { %v557_v10 = vld [vmem:[#allocation2] sm:$0xff] }
 0x125   : > { %v826_v63 = vpop.permute.xlu1 %825 }
 0x126   : > { %v828_v2 = vmul.f32 %v826_v63, %v1436_v40 }
 0x128   : > { %v837_v5 = vadd.f32 %v836_v0, %v828_v2 }
 0x12a   : > { %v843_v3 = vpop.permute.xlu1 %842 }
 0x12b   : > { %v845_v12 = vmul.f32 %v843_v3, %v1445_v46 }
 0x12d   : > { %v846_v8 = vadd.f32 %v845_v12, %v837_v5 }
 0x12e   : > { %v560_v18 = vpop.permute.xlu1 %559 }
 0x12f   : > { %v856_v11 = vmul.f32 %v854_v7, %v846_v8  ;;  %v562_v13 = vadd.f32 %v560_v18, %v557_v10 }
 0x131   : > { %564 = vst.msk [vmem:[#allocation2] sm:$0xff] %vm563_vm1, %v562_v13  ;;  %859 = vrot.lane.b32.xlu1 %v856_v11, %s1541_s17 }
 0x132   : > { %v605_v17 = vpop.permute.xlu1 %604 }
 0x135   : > { %876 = vperm.xlu1 %1222, %v873_v15  }
 0x136   : > { %v661_v21 = vpop.permute.xlu1 %660 }
 0x137   : > { %v663_v27 = vmul.f32 %v661_v21, %v1436_v40 }
 0x138   : > { %v602_v22 = vld [vmem:[#allocation2] sm:$0xff] }
 0x139   : > { %v607_v23 = vadd.f32 %v605_v17, %v602_v22  ;;  %886 = vperm.xlu1 %1222, %v883_v19   ;;  %v672_v32 = vadd.f32 %v671_v28, %v663_v27 }
 0x13b   : > { %609 = vst.msk [vmem:[#allocation2] sm:$0xff] %vm608_vm2, %v607_v23  ;;  %v678_v24 = vpop.permute.xlu1 %677  ;;  %v725_v40 = vpop.permute.xlu0 %724 }
 0x13c   : > { %v680_v31 = vmul.f32 %v678_v24, %v1445_v46 }
 0x13d   : > { %1223 = vset.pattern.permute.xlu1 %v1243_v9 }
 0x13e   : > { %905 = vperm.xlu1 %1223, %v1485_v61   ;;  %v681_v9 = vadd.f32 %v680_v31, %v672_v32 }
 0x13f   : > { %v650_v26 = vpop.permute.xlu1 %649 }
 0x142   : > { %1225 = vset.pattern.permute.xlu1 %v1248_v14  ;;  %v647_v29 = vld [vmem:[#allocation2] sm:$0xff] }
 0x143   : > { %v652_v30 = vadd.f32 %v650_v26, %v647_v29  ;;  %927 = vperm.xlu1 %1225, %v1485_v61  }
 0x145   : > { %654 = vst.msk [vmem:[#allocation2] sm:$0xff] %vm653_vm3, %v652_v30  ;;  %v770_v46 = vpop.permute.xlu1 %769 }
 0x147   : > { %1226 = vset.pattern.permute.xlu1 %v1273_v16 }
 0x148   : > { %938 = vperm.xlu1 %1226, %v1485_v61  }
 0x14c   : > { %v682_v33 = vld [vmem:[#allocation2] sm:$0xff]  ;;  %1228 = vset.pattern.permute.xlu1 %v1254_v20 }
 0x14d   : > { %v683_v6 = vadd.f32 %v682_v33, %v681_v9  ;;  %960 = vperm.xlu1 %1228, %v1485_v61  }
 0x14f   : > { %684 = vst [vmem:[#allocation2] sm:$0xff] %v683_v6  ;;  %v727_v14 = vadd.f32 %v725_v40, %v683_v6  ;;  %v815_v36 = vpop.permute.xlu0 %814 }
 0x151   : > { %1229 = vset.pattern.permute.xlu1 %v1268_v34  ;;  %729 = vst.msk [vmem:[#allocation2] sm:$0xff] %vm728_vm4, %v727_v14 }
 0x152   : > { %971 = vperm.xlu1 %1229, %v1485_v61  }
 0x158   : > { %v767_v16 = vld [vmem:[#allocation2] sm:$0xff] }
 0x159   : > { %v772_v35 = vadd.f32 %v770_v46, %v767_v16 }
 0x15b   : > { %774 = vst.msk [vmem:[#allocation2] sm:$0xff] %vm773_vm5, %v772_v35 }
 0x160   : > { %v870_v42 = vpop.permute.xlu0 %869 }
 0x162   : > { %v812_v20 = vld [vmem:[#allocation2] sm:$0xff] }
 0x163   : > { %v817_v37 = vadd.f32 %v815_v36, %v812_v20 }
 0x164   : > { %v895_v49 = vpop.permute.xlu0 %894 }
 0x165   : > { %819 = vst.msk [vmem:[#allocation2] sm:$0xff] %vm818_vm6, %v817_v37 }
 0x169   : > { %v917_v57 = vpop.permute.xlu0 %916 }
 0x16c   : > { %v857_v38 = vld [vmem:[#allocation2] sm:$0xff] }
 0x16e   : > { %v950_v5 = vpop.permute.xlu0 %949 }
 0x1a3   : > { %v860_v4 = vpop.permute.xlu1 %859 }
 0x1a4   : > { %v862_v39 = vadd.f32 %v860_v4, %v857_v38 }
 0x1a6   : > { %864 = vst.msk [vmem:[#allocation2] sm:$0xff] %vm863_vm7, %v862_v39 }
 0x1ad   : > { %v865_v34 = vld [vmem:[#allocation2] sm:$0xff] }
 0x1ae   : > { %v872_v43 = vmul.f32 %v870_v42, %v865_v34 }
 0x1b4   : > { %v877_v44 = vpop.permute.xlu1 %876 }
 0x1b5   : > { %v879_v45 = vadd.f32 %v877_v44, %v872_v43 }
 0x1b7   : > { %v880_v47 = vmax.f32 %v879_v45, 0.0 }
 0x1b8   : > { %v887_v48 = vpop.permute.xlu1 %886 }
 0x1b9   : > { %881 = vst [vmem:[#allocation2] sm:$0xff] %v880_v47  ;;  %v889_v53 = vadd.f32 %v887_v48, %v1438_v41 }
 0x1bd   : > { %v906_v1 = vpop.permute.xlu1 %905 }
 0x1c0   : > { %v1122_v50 = vld [vmem:[#allocation2] ss:$0 sm:$0xff]  ;;  %v1123_v51 = vld [vmem:[#allocation2 + $0x1] ss:$0 sm:$0xff]  ;;  %v1124_v54 = vld [vmem:[#allocation2 + $0x2] ss:$0 sm:$0xff] }
 0x1c1   : > { %v901_v52 = vmul.f32 %v1122_v50, %v895_v49  ;;  %v912_v58 = vmul.f32 %v1123_v51, %v906_v1  ;;  %v923_v59 = vmul.f32 %v1124_v54, %v917_v57  ;;  %v1125_v61 = vld [vmem:[#allocation2 + $0x3] ss:$0 sm:$0xff]  ;;  %v1126_v0 = vld [vmem:[#allocation2 + $0x4] ss:$0 sm:$0xff]  ;;  %v1127_v12 = vld [vmem:[#allocation2 + $0x5] ss:$0 sm:$0xff] }
 0x1c2   : > { %v928_v55 = vpop.permute.xlu1 %927  ;;  %v956_v41 = vmul.f32 %v1127_v12, %v950_v5  ;;  %v1128_v18 = vld [vmem:[#allocation2 + $0x6] ss:$0 sm:$0xff]  ;;  %v1129_v15 = vld [vmem:[#allocation2 + $0x7] ss:$0 sm:$0xff] }
 0x1c3   : > { %v902_v56 = vadd.f32 %v901_v52, %v889_v53  ;;  %v934_v63 = vmul.f32 %v1125_v61, %v928_v55 }
 0x1c5   : > { %v913_v60 = vadd.f32 %v912_v58, %v902_v56 }
 0x1c7   : > { %v924_v62 = vadd.f32 %v923_v59, %v913_v60  ;;  %v939_v2 = vpop.permute.xlu1 %938 }
 0x1c8   : > { %v945_v3 = vmul.f32 %v1126_v0, %v939_v2 }
 0x1c9   : > { %v935_v7 = vadd.f32 %v934_v63, %v924_v62 }
 0x1cb   : > { %v946_v8 = vadd.f32 %v945_v3, %v935_v7 }
 0x1cc   : > { %v961_v10 = vpop.permute.xlu1 %960 }
 0x1cd   : > { %v957_v11 = vadd.f32 %v956_v41, %v946_v8  ;;  %v967_v13 = vmul.f32 %v1128_v18, %v961_v10 }
 0x1cf   : > { %v968_v19 = vadd.f32 %v967_v13, %v957_v11 }
 0x1d1   : > { %v972_v17 = vpop.permute.xlu1 %971 }
 0x1d2   : > { %v978_v21 = vmul.f32 %v1129_v15, %v972_v17 }
 0x1d4   : > { %v979_v22 = vadd.f32 %v978_v21, %v968_v19 }
 0x1d6   : > { %980 = vst [vmem:[%s459_s18] sm:$0xff] %v979_v22 }
 0x1d7 PF: > { %s19_s30 = sadd.s32 1, %s1237_s30  }
 0x1d8   : > { %p16_p4 = scmp.ge.s32.totalorder %s19_s30, 10  }
 0x1da   :  { %18 = sbr.rel (!%p16_p4) target bundleno = 1 (0x1), region = 92 }

// kernel: single_stage_3d_forward.7
= control target key start
LH: loop header
LB: loop body
LE: loop exit
PB: predicated region body
PF: predicated region fallthrough
CT: control target
= control target key end

     0   :  { %s1325_s30 = smov 0   ;;  %s1526_s0 = inlined_call_operand.vmem [shape: f32[8,8,128], index: 0, kind: input, shape index: {}, may-alias: {0,1,2}]   ;;  %s1527_s1 = inlined_call_operand.vmem [shape: f32[8,8,128], index: 1, kind: input, shape index: {}, may-alias: {0,1,2}]   ;;  %s1528_s2 = inlined_call_operand.vmem [shape: f32[8,8,128], index: 2, kind: input, shape index: {}, may-alias: {0,1,2}]   ;;  %s1529_s3 = inlined_call_operand.vmem [shape: f32[8,27], index: 3, kind: input, shape index: {}]   ;;  %s1530_s4 = inlined_call_operand.vmem [shape: f32[8,1], index: 4, kind: input, shape index: {}]   ;;  %s1531_s5 = inlined_call_operand.vmem [shape: f32[8,1], index: 5, kind: input, shape index: {}]   ;;  %s1532_s6 = inlined_call_operand.vmem [shape: f32[8,8], index: 6, kind: input, shape index: {}]   ;;  %s1533_s7 = inlined_call_operand.vmem [shape: f32[8,1], index: 7, kind: input, shape index: {}]   ;;  %s1534_s8 = inlined_call_operand.vmem [shape: f32[9,128], index: 8, kind: input, shape index: {}]   ;;  %s1535_s9 = inlined_call_operand.vmem [shape: f32[8,8,128], index: 9, kind: output, shape index: {}]  }
   0x1 LB: > { %s1331_s10 = sadd.s32 4294967295, %s1237_s30   ;;  %p1092_p0 = scmp.ge.s32.totalorder %s1237_s30, 1  ;;  %s1237_s30 = sphi %s1325_s30, %s19_s30  }
   0x2   : > { %p360_p1 = scmp.lt.s32.totalorder %s1237_s30, 9 }
   0x4   : > { %p361_p2 = pnand %p1092_p0, %p360_p1 }
   0x5   : > { %s1336_s11 = sadd.s32 (!%p361_p2), 2, %s1331_s10  ;;  %s1339_s12 = sadd.s32 (!%p361_p2), 4294967294, %s1331_s10  ;;  %v1239_v0 = vmov (!%p361_p2), 18   ;;  %v1240_v1 = vmov (!%p361_p2), 0   ;;  %v1349_v2 = vld [vmem:[%s1529_s3] sm:$0xff] (!%p361_p2)  ;;  %v1241_v7 = vmov (!%p361_p2), 10  }
   0x6   : > { %364 = sbr.rel (%p361_p2) target bundleno = 471 (0x1d7), region = 56  ;;  %1196 = vset.pattern.permute.xlu1 (!%p361_p2), %v1239_v0  ;;  %1194 = vset.pattern.permute.xlu0 (!%p361_p2), %v1240_v1  ;;  %p467_p3 = scmp.ge.s32.totalorder (!%p361_p2), %s1336_s11, 0  ;;  %v1242_v8 = vmov (!%p361_p2), 9   ;;  %v1243_v9 = vmov (!%p361_p2), 1   ;;  %v1244_v10 = vmov (!%p361_p2), 19   ;;  %v1246_v12 = vmov (!%p361_p2), 2  }
   0x7   : > { %p468_p4 = scmp.le.s32.totalorder (!%p361_p2), %s1336_s11, 7  ;;  %p461_p5 = scmp.ge.s32.totalorder (!%p361_p2), %s1339_s12, 0  ;;  %v1114_v11 = vld [vmem:[%s1534_s8] ss:$0 sm:$0xff] (!%p361_p2)  ;;  %v1247_v13 = vmov (!%p361_p2), 11   ;;  %v1248_v14 = vmov (!%p361_p2), 3  }
   0x8   : > { %p462_p6 = scmp.le.s32.totalorder (!%p361_p2), %s1339_s12, 7  ;;  %s1536_s19 = smov (!%p361_p2), 119   ;;  %v1249_v15 = vmov (!%p361_p2), 20   ;;  %v1116_v16 = vld [vmem:[%s1534_s8 + $0x2] ss:$0 sm:$0xff] (!%p361_p2)  ;;  %v1251_v18 = vmov (!%p361_p2), 5  }
   0x9   : > { %p469_p7 = pnand (!%p361_p2), %p468_p4, %p467_p3  ;;  %v1115_v17 = vld [vmem:[%s1534_s8 + $0x1] ss:$0 sm:$0xff] (!%p361_p2)  ;;  %s1538_s24 = smov (!%p361_p2), 121   ;;  %v1253_v19 = vmov (!%p361_p2), 12   ;;  %v1254_v20 = vmov (!%p361_p2), 6   ;;  %v1255_v21 = vmov (!%p361_p2), 21  }
   0xa   : > { %p463_p8 = pnand (!%p361_p2), %p462_p6, %p461_p5  ;;  %s1537_s25 = smov (!%p361_p2), 120   ;;  %v1118_v22 = vld [vmem:[%s1534_s8 + $0x5] ss:$0 sm:$0xff] (!%p361_p2)  ;;  %v1117_v23 = vld [vmem:[%s1534_s8 + $0x3] ss:$0 sm:$0xff] (!%p361_p2)  ;;  %v1257_v24 = vmov (!%p361_p2), 16  }
   0xb   : > { %s1258_s14 = smov (!%p361_p2), 127   ;;  %v1259_v25 = vmov (!%p361_p2), 14   ;;  %v1119_v26 = vld [vmem:[%s1534_s8 + $0x6] ss:$0 sm:$0xff] (!%p361_p2)  ;;  %s1260_s17 = smov (!%p361_p2), 7   ;;  %v1261_v27 = vmov (!%p361_p2), 17  }
   0xc   : > { %v1262_v28 = vmov (!%p361_p2), 23   ;;  %v1120_v29 = vld [vmem:[%s1534_s8 + $0x7] ss:$0 sm:$0xff] (!%p361_p2)  ;;  %v1263_v30 = vmov (!%p361_p2), 15   ;;  %s1264_s21 = smov (!%p361_p2), 8   ;;  %v1265_v32 = vmov (!%p361_p2), 13  }
   0xd   : > { %s1113_s13 = scalar_select %p469_p7, 0.0, 1.0  ;;  %v1121_v31 = vld [vmem:[%s1534_s8 + $0x8] ss:$0 sm:$0xff]  ;;  %v1266_v33 = vmov 24   ;;  %v1268_v34 = vmov 7  }
   0xe   : > { %s1112_s16 = scalar_select %p463_p8, 0.0, 1.0  ;;  %v1269_v35 = vmov 25   ;;  %v1270_v36 = vmov 8   ;;  %v1271_v37 = vmov 0.0   ;;  %vm518_vm0 = vcmask 1047624  }
   0xf   : > { %v492_v3 = vstv %s1113_s13  ;;  %s1256_s13 = smov 1   ;;  %s1267_s26 = smov 9   ;;  %472 = vst [vmem:[#allocation2] sm:$0xff] %v1271_v37  ;;  %vm563_vm1 = vcmask 1047616   ;;  %vm608_vm2 = vcmask 1047608   ;;  %vm653_vm3 = vcmask 1047560  }
  0x10   : > { %v1352_v4 = vmul.f32 %v492_v3, %v1349_v2  ;;  %v474_v5 = vstv %s1112_s16  ;;  %p417_p9 = scmp.gt.s32.totalorder %s1339_s12, 0  ;;  %p430_p10 = scmp.gt.s32.totalorder %s1331_s10, 0  ;;  %v1272_v3 = vmov 26   ;;  %vm728_vm4 = vcmask 1039360  }
  0x11   : > { %v1355_v6 = vmul.f32 %v474_v5, %v1349_v2  ;;  %p443_p11 = scmp.gt.s32.totalorder %s1336_s11, 0  ;;  %p1093_p12 = scmp.lt.s32.totalorder %s1339_s12, 7  ;;  %vm773_vm5 = vcmask 990208   ;;  %vm818_vm6 = vcmask 982016   ;;  %vm863_vm7 = vcmask 973824  }
  0x12   : > { %497 = vperm.xlu1 %1196, %v1352_v4   ;;  %s418_s27 = scalar_select %p417_p9, %s1339_s12, 0 }
  0x13   : > { %479 = vperm.xlu0 %1194, %v1355_v6   ;;  %p1099_p13 = scmp.lt.s32.totalorder %s1331_s10, 7  ;;  %p1105_p0 = scmp.lt.s32.totalorder %s1336_s11, 7 }
  0x14   : > { %s431_s28 = scalar_select %p430_p10, %s1331_s10, 0 }
  0x15   : > { %s1543_s11 = smov (!%p443_p11, %s1336_s11), 0  ;;  %s1545_s27 = smov (!%p1093_p12, %s418_s27), 7 }
  0x16   : > { %1197 = vset.pattern.permute.xlu1 %v1241_v7  ;;  %s1547_s28 = smov (!%p1099_p13, %s431_s28), 7  ;;  %s1549_s11 = smov (!%p1105_p0, %s1543_s11), 7 }
  0x17   : > { %1195 = vset.pattern.permute.xlu0 %v1242_v8  ;;  %533 = vperm.xlu1 %1197, %v1349_v2   ;;  %p421_p1 = scmp.lt.s32.totalorder %s1545_s27, 7  ;;  %p434_p2 = scmp.lt.s32.totalorder %s1547_s28, 7 }
  0x18   : > { %487 = vperm.xlu0 %1195, %v1349_v2   ;;  %p447_p3 = scmp.lt.s32.totalorder %s1549_s11, 7  ;;  %s1557_s10 = smov (!%p1099_p13, %s1331_s10), 7 }
  0x19   : > { %s1551_s27 = smov (!%p421_p1, %s1545_s27), 7  ;;  %s1553_s28 = smov (!%p434_p2, %s1547_s28), 7 }
  0x1a   : > { %s1555_s11 = smov (!%p447_p3, %s1549_s11), 7  ;;  %s1098_s29 = sshll.u32 %s1551_s27, 3 }
  0x1b   : > { %1198 = vset.pattern.permute.xlu1 %v1243_v9  ;;  %s1104_s15 = sshll.u32 %s1553_s28, 3  ;;  %s424_s18 = scalar_lea.vmem %s1526_s0, %s1098_s29 }
  0x1c   : > { %525 = vperm.xlu1 %1198, %v1355_v6   ;;  %1199 = vset.pattern.permute.xlu0 %v1244_v10  ;;  %s437_s23 = scalar_lea.vmem %s1527_s1, %s1104_s15  ;;  %v1436_v40 = vld [vmem:[%s424_s18] sm:$0xff]  ;;  %s1111_s15 = sshll.u32 %s1557_s10, 3 }
  0x1d   : > { %542 = vperm.xlu0 %1199, %v1352_v4   ;;  %v1438_v41 = vld [vmem:[%s437_s23] sm:$0xff]  ;;  %s459_s18 = scalar_lea.vmem %s1535_s9, %s1111_s15 }
  0x20   : > { %508 = vrot.lane.b32.xlu1 %v1114_v11, %s1536_s19  ;;  %s1110_s19 = sshll.u32 %s1555_s11, 3  ;;  %s1539_s11 = smov 121  }
  0x21   : > { %1200 = vset.pattern.permute.xlu1 %v1246_v12  ;;  %1201 = vset.pattern.permute.xlu0 %v1247_v13  ;;  %s450_s27 = scalar_lea.vmem %s1528_s2, %s1110_s19  ;;  %s1540_s19 = smov 120  }
  0x22   : > { %578 = vperm.xlu0 %1201, %v1349_v2   ;;  %v1445_v46 = vld [vmem:[%s450_s27] sm:$0xff] }
  0x24   : > { %570 = vperm.xlu1 %1200, %v1355_v6  }
  0x26   : > { %1203 = vset.pattern.permute.xlu0 %v1248_v14 }
  0x27   : > { %615 = vperm.xlu0 %1203, %v1355_v6  }
  0x28   : > { %1202 = vset.pattern.permute.xlu1 %v1249_v15 }
  0x29   : > { %587 = vperm.xlu1 %1202, %v1352_v4  }
  0x2b   : > { %598 = vrot.lane.b32.xlu0 %v1116_v16, %s1538_s24  ;;  %v1273_v16 = vmov 4  }
  0x2c   : > { %1206 = vset.pattern.permute.xlu0 %v1251_v18 }
  0x2d   : > { %553 = vrot.lane.b32.xlu1 %v1115_v17, %s1537_s25 }
  0x2e   : > { %1204 = vset.pattern.permute.xlu1 %v1253_v19 }
  0x2f   : > { %690 = vperm.xlu0 %1206, %v1355_v6  }
  0x31   : > { %623 = vperm.xlu1 %1204, %v1349_v2  }
  0x33   : > { %1209 = vset.pattern.permute.xlu0 %v1254_v20 }
  0x34   : > { %735 = vperm.xlu0 %1209, %v1355_v6  }
  0x35   : > { %1205 = vset.pattern.permute.xlu1 %v1255_v21 }
  0x36   : > { %632 = vperm.xlu1 %1205, %v1352_v4  }
  0x38   : > { %718 = vrot.lane.b32.xlu0 %v1118_v22, %s1256_s13 }
  0x39   : > { %1213 = vset.pattern.permute.xlu0 %v1257_v24 }
  0x3a   : > { %643 = vrot.lane.b32.xlu1 %v1117_v23, %s1258_s14 }
  0x3b   : > { %1207 = vset.pattern.permute.xlu1 %v1259_v25 }
  0x3c   : > { %788 = vperm.xlu0 %1213, %v1349_v2  }
  0x3e   : > { %698 = vperm.xlu1 %1207, %v1349_v2  }
  0x40   : > { %763 = vrot.lane.b32.xlu0 %v1119_v26, %s1260_s17 }
  0x41   : > { %1216 = vset.pattern.permute.xlu0 %v1261_v27  ;;  %v1274_v27 = vmov 22  }
  0x42   : > { %1208 = vset.pattern.permute.xlu1 %v1262_v28 }
  0x43   : > { %707 = vperm.xlu1 %1208, %v1352_v4  }
  0x44   : > { %833 = vperm.xlu0 %1216, %v1349_v2  }
  0x47   : > { %1210 = vset.pattern.permute.xlu1 %v1263_v30 }
  0x48   : > { %743 = vperm.xlu1 %1210, %v1349_v2   ;;  %808 = vrot.lane.b32.xlu0 %v1120_v29, %s1264_s21 }
  0x49   : > { %1219 = vset.pattern.permute.xlu0 %v1265_v32 }
  0x4c   : > { %1211 = vset.pattern.permute.xlu1 %v1266_v33  ;;  %853 = vrot.lane.b32.xlu0 %v1121_v31, %s1267_s26 }
  0x4d   : > { %752 = vperm.xlu1 %1211, %v1352_v4  }
  0x50   : > { %668 = vperm.xlu0 %1219, %v1349_v2  }
  0x51   : > { %1212 = vset.pattern.permute.xlu1 %v1268_v34 }
  0x52   : > { %780 = vperm.xlu1 %1212, %v1355_v6  }
  0x54   : > { %1221 = vset.pattern.permute.xlu0 %v1240_v1 }
  0x56   : > { %1214 = vset.pattern.permute.xlu1 %v1269_v35 }
  0x57   : > { %797 = vperm.xlu1 %1214, %v1352_v4  }
  0x5b   : > { %1215 = vset.pattern.permute.xlu1 %v1270_v36 }
  0x91   : > { %v498_v38 = vpop.permute.xlu1 %497 }
  0x92   : > { %v480_v39 = vpop.permute.xlu0 %479  ;;  %v500_v49 = vmul.f32 %v498_v38, %v1445_v46 }
  0x93   : > { %v482_v44 = vmul.f32 %v480_v39, %v1436_v40 }
  0x96   : > { %v534_v42 = vpop.permute.xlu1 %533 }
  0x97   : > { %v488_v43 = vpop.permute.xlu0 %487  ;;  %v536_v59 = vmul.f32 %v534_v42, %v1438_v41 }
  0x98   : > { %v490_v45 = vmul.f32 %v1438_v41, %v488_v43 }
  0x9a   : > { %v491_v47 = vadd.f32 %v490_v45, %v482_v44 }
  0x9b   : > { %v526_v48 = vpop.permute.xlu1 %525 }
  0x9c   : > { %v543_v50 = vpop.permute.xlu0 %542  ;;  %v501_v51 = vadd.f32 %v500_v49, %v491_v47  ;;  %v528_v55 = vmul.f32 %v526_v48, %v1436_v40 }
  0x9d   : > { %v545_v62 = vmul.f32 %v543_v50, %v1445_v46 }
  0x9e   : > { %v537_v61 = vadd.f32 %v536_v59, %v528_v55 }
  0x9f   : > { %v509_v52 = vpop.permute.xlu1 %508 }
  0xa0   : > { %v511_v53 = vmul.f32 %v509_v52, %v501_v51  ;;  %v546_v5 = vadd.f32 %v545_v62, %v537_v61  ;;  %v1485_v61 = vld [vmem:[%s1532_s6] sm:$0xff] }
  0xa1   : > { %v579_v54 = vpop.permute.xlu0 %578 }
  0xa2   : > { %514 = vrot.lane.b32.xlu1 %v511_v53, %s1267_s26  ;;  %v581_v57 = vmul.f32 %v579_v54, %v1438_v41 }
  0xa3   : > { %v571_v56 = vpop.permute.xlu1 %570 }
  0xa4   : > { %v573_v58 = vmul.f32 %v571_v56, %v1436_v40 }
  0xa6   : > { %825 = vperm.xlu1 %1215, %v1355_v6   ;;  %v616_v60 = vpop.permute.xlu0 %615  ;;  %v582_v63 = vadd.f32 %v581_v57, %v573_v58 }
  0xa7   : > { %v618_v15 = vmul.f32 %v616_v60, %v1436_v40  ;;  %v866_v60 = vld [vmem:[%s1530_s4] sm:$0xff] }
  0xa8   : > { %v588_v0 = vpop.permute.xlu1 %587 }
  0xa9   : > { %v590_v2 = vmul.f32 %v588_v0, %v1445_v46 }
  0xaa   : > { %1217 = vset.pattern.permute.xlu1 %v1272_v3  ;;  %v599_v10 = vpop.permute.xlu0 %598 }
  0xab   : > { %842 = vperm.xlu1 %1217, %v1352_v4   ;;  %v591_v7 = vadd.f32 %v590_v2, %v582_v63 }
  0xac   : > { %v554_v8 = vpop.permute.xlu1 %553 }
  0xad   : > { %v556_v11 = vmul.f32 %v554_v8, %v546_v5  ;;  %v601_v13 = vmul.f32 %v599_v10, %v591_v7 }
  0xae   : > { %v691_v25 = vpop.permute.xlu0 %690 }
  0xaf   : > { %559 = vrot.lane.b32.xlu1 %v556_v11, %s1264_s21  ;;  %v693_v30 = vmul.f32 %v691_v25, %v1436_v40 }
  0xb0   : > { %1218 = vset.pattern.permute.xlu1 %v1273_v16  ;;  %v624_v17 = vpop.permute.xlu1 %623 }
  0xb1   : > { %v626_v19 = vmul.f32 %v624_v17, %v1438_v41 }
  0xb3   : > { %604 = vrot.lane.b32.xlu1 %v601_v13, %s1260_s17  ;;  %v627_v21 = vadd.f32 %v626_v19, %v618_v15  ;;  %v736_v32 = vpop.permute.xlu0 %735  ;;  %s1541_s17 = smov 119   ;;  %v873_v15 = vld [vmem:[%s1531_s5] sm:$0xff] }
  0xb4   : > { %v738_v38 = vmul.f32 %v736_v32, %v1436_v40  ;;  %v883_v19 = vld [vmem:[%s1533_s7] sm:$0xff] }
  0xb5   : > { %v633_v22 = vpop.permute.xlu1 %632 }
  0xb6   : > { %v635_v23 = vmul.f32 %v633_v22, %v1445_v46 }
  0xb7   : > { %660 = vperm.xlu1 %1218, %v1355_v6   ;;  %v719_v36 = vpop.permute.xlu0 %718 }
  0xb8   : > { %v636_v24 = vadd.f32 %v635_v23, %v627_v21 }
  0xb9   : > { %v644_v26 = vpop.permute.xlu1 %643 }
  0xba   : > { %v646_v28 = vmul.f32 %v644_v26, %v636_v24 }
  0xbb   : > { %1220 = vset.pattern.permute.xlu1 %v1274_v27  ;;  %v789_v43 = vpop.permute.xlu0 %788 }
  0xbc   : > { %677 = vperm.xlu1 %1220, %v1352_v4   ;;  %v791_v49 = vmul.f32 %v789_v43, %v1438_v41 }
  0xbd   : > { %v699_v29 = vpop.permute.xlu1 %698 }
  0xbe   : > { %v701_v31 = vmul.f32 %v699_v29, %v1438_v41 }
  0xbf   : > { %v764_v48 = vpop.permute.xlu0 %763 }
  0xc0   : > { %649 = vrot.lane.b32.xlu1 %v646_v28, %s1256_s13  ;;  %v702_v33 = vadd.f32 %v701_v31, %v693_v30 }
  0xc1   : > { %1222 = vset.pattern.permute.xlu1 %v1240_v1 }
  0xc2   : > { %v708_v6 = vpop.permute.xlu1 %707 }
  0xc3   : > { %v710_v35 = vmul.f32 %v708_v6, %v1445_v46  ;;  %v834_v53 = vpop.permute.xlu0 %833 }
  0xc4   : > { %v836_v0 = vmul.f32 %v834_v53, %v1438_v41 }
  0xc5   : > { %v711_v37 = vadd.f32 %v710_v35, %v702_v33 }
  0xc7   : > { %v721_v4 = vmul.f32 %v719_v36, %v711_v37  ;;  %v744_v39 = vpop.permute.xlu1 %743  ;;  %v809_v57 = vpop.permute.xlu0 %808 }
  0xc8   : > { %v746_v42 = vmul.f32 %v744_v39, %v1438_v41 }
  0xc9   : > { %724 = vrot.lane.b32.xlu0 %v721_v4, %s1258_s14 }
  0xca   : > { %v747_v44 = vadd.f32 %v746_v42, %v738_v38 }
  0xcb   : > { %v854_v7 = vpop.permute.xlu0 %853 }
  0xcc   : > { %v753_v45 = vpop.permute.xlu1 %752 }
  0xcd   : > { %v755_v47 = vmul.f32 %v753_v45, %v1445_v46 }
  0xcf   : > { %v756_v1 = vadd.f32 %v755_v47, %v747_v44  ;;  %v669_v25 = vpop.permute.xlu0 %668 }
  0xd0   : > { %v671_v28 = vmul.f32 %v669_v25, %v1438_v41 }
  0xd1   : > { %v766_v50 = vmul.f32 %v764_v48, %v756_v1  ;;  %v781_v51 = vpop.permute.xlu1 %780 }
  0xd2   : > { %v783_v52 = vmul.f32 %v781_v51, %v1436_v40 }
  0xd3   : > { %769 = vrot.lane.b32.xlu1 %v766_v50, %s1539_s11 }
  0xd4   : > { %v792_v54 = vadd.f32 %v791_v49, %v783_v52 }
  0xd6   : > { %v798_v55 = vpop.permute.xlu1 %797 }
  0xd7   : > { %v800_v56 = vmul.f32 %v798_v55, %v1445_v46 }
  0xd9   : > { %v801_v58 = vadd.f32 %v800_v56, %v792_v54 }
  0xdb   : > { %v811_v59 = vmul.f32 %v809_v57, %v801_v58 }
  0xdd   : > { %814 = vrot.lane.b32.xlu0 %v811_v59, %s1540_s19 }
  0xe1   : > { %869 = vperm.xlu0 %1221, %v866_v60  }
  0xe5   : > { %894 = vperm.xlu0 %1221, %v1485_v61  }
  0xe9   : > { %1224 = vset.pattern.permute.xlu0 %v1246_v12 }
  0xea   : > { %916 = vperm.xlu0 %1224, %v1485_v61  }
  0xee   : > { %1227 = vset.pattern.permute.xlu0 %v1251_v18 }
  0xef   : > { %949 = vperm.xlu0 %1227, %v1485_v61  }
  0xf3   : > { %1230 = vset.pattern.permute.xlu0 %v1268_v34 }
 0x114   : > { %v515_v62 = vpop.permute.xlu1 %514 }
 0x115   : > { %519 = vst.msk [vmem:[#allocation2] sm:$0xff] %vm518_vm0, %v515_v62 }
 0x11c   : > { %v557_v10 = vld [vmem:[#allocation2] sm:$0xff] }
 0x125   : > { %v826_v63 = vpop.permute.xlu1 %825 }
 0x126   : > { %v828_v2 = vmul.f32 %v826_v63, %v1436_v40 }
 0x128   : > { %v837_v5 = vadd.f32 %v836_v0, %v828_v2 }
 0x12a   : > { %v843_v3 = vpop.permute.xlu1 %842 }
 0x12b   : > { %v845_v12 = vmul.f32 %v843_v3, %v1445_v46 }
 0x12d   : > { %v846_v8 = vadd.f32 %v845_v12, %v837_v5 }
 0x12e   : > { %v560_v18 = vpop.permute.xlu1 %559 }
 0x12f   : > { %v856_v11 = vmul.f32 %v854_v7, %v846_v8  ;;  %v562_v13 = vadd.f32 %v560_v18, %v557_v10 }
 0x131   : > { %564 = vst.msk [vmem:[#allocation2] sm:$0xff] %vm563_vm1, %v562_v13  ;;  %859 = vrot.lane.b32.xlu1 %v856_v11, %s1541_s17 }
 0x132   : > { %v605_v17 = vpop.permute.xlu1 %604 }
 0x135   : > { %876 = vperm.xlu1 %1222, %v873_v15  }
 0x136   : > { %v661_v21 = vpop.permute.xlu1 %660 }
 0x137   : > { %v663_v27 = vmul.f32 %v661_v21, %v1436_v40 }
 0x138   : > { %v602_v22 = vld [vmem:[#allocation2] sm:$0xff] }
 0x139   : > { %v607_v23 = vadd.f32 %v605_v17, %v602_v22  ;;  %886 = vperm.xlu1 %1222, %v883_v19   ;;  %v672_v32 = vadd.f32 %v671_v28, %v663_v27 }
 0x13b   : > { %609 = vst.msk [vmem:[#allocation2] sm:$0xff] %vm608_vm2, %v607_v23  ;;  %v678_v24 = vpop.permute.xlu1 %677  ;;  %v725_v40 = vpop.permute.xlu0 %724 }
 0x13c   : > { %v680_v31 = vmul.f32 %v678_v24, %v1445_v46 }
 0x13d   : > { %1223 = vset.pattern.permute.xlu1 %v1243_v9 }
 0x13e   : > { %905 = vperm.xlu1 %1223, %v1485_v61   ;;  %v681_v9 = vadd.f32 %v680_v31, %v672_v32 }
 0x13f   : > { %v650_v26 = vpop.permute.xlu1 %649 }
 0x142   : > { %1225 = vset.pattern.permute.xlu1 %v1248_v14  ;;  %v647_v29 = vld [vmem:[#allocation2] sm:$0xff] }
 0x143   : > { %v652_v30 = vadd.f32 %v650_v26, %v647_v29  ;;  %927 = vperm.xlu1 %1225, %v1485_v61  }
 0x145   : > { %654 = vst.msk [vmem:[#allocation2] sm:$0xff] %vm653_vm3, %v652_v30  ;;  %v770_v46 = vpop.permute.xlu1 %769 }
 0x147   : > { %1226 = vset.pattern.permute.xlu1 %v1273_v16 }
 0x148   : > { %938 = vperm.xlu1 %1226, %v1485_v61  }
 0x14c   : > { %v682_v33 = vld [vmem:[#allocation2] sm:$0xff]  ;;  %1228 = vset.pattern.permute.xlu1 %v1254_v20 }
 0x14d   : > { %v683_v6 = vadd.f32 %v682_v33, %v681_v9  ;;  %960 = vperm.xlu1 %1228, %v1485_v61  }
 0x14f   : > { %684 = vst [vmem:[#allocation2] sm:$0xff] %v683_v6  ;;  %v727_v14 = vadd.f32 %v725_v40, %v683_v6  ;;  %v815_v36 = vpop.permute.xlu0 %814 }
 0x151   : > { %1229 = vset.pattern.permute.xlu1 %v1268_v34  ;;  %729 = vst.msk [vmem:[#allocation2] sm:$0xff] %vm728_vm4, %v727_v14 }
 0x152   : > { %971 = vperm.xlu1 %1229, %v1485_v61  }
 0x158   : > { %v767_v16 = vld [vmem:[#allocation2] sm:$0xff] }
 0x159   : > { %v772_v35 = vadd.f32 %v770_v46, %v767_v16 }
 0x15b   : > { %774 = vst.msk [vmem:[#allocation2] sm:$0xff] %vm773_vm5, %v772_v35 }
 0x160   : > { %v870_v42 = vpop.permute.xlu0 %869 }
 0x162   : > { %v812_v20 = vld [vmem:[#allocation2] sm:$0xff] }
 0x163   : > { %v817_v37 = vadd.f32 %v815_v36, %v812_v20 }
 0x164   : > { %v895_v49 = vpop.permute.xlu0 %894 }
 0x165   : > { %819 = vst.msk [vmem:[#allocation2] sm:$0xff] %vm818_vm6, %v817_v37 }
 0x169   : > { %v917_v57 = vpop.permute.xlu0 %916 }
 0x16c   : > { %v857_v38 = vld [vmem:[#allocation2] sm:$0xff] }
 0x16e   : > { %v950_v5 = vpop.permute.xlu0 %949 }
 0x1a3   : > { %v860_v4 = vpop.permute.xlu1 %859 }
 0x1a4   : > { %v862_v39 = vadd.f32 %v860_v4, %v857_v38 }
 0x1a6   : > { %864 = vst.msk [vmem:[#allocation2] sm:$0xff] %vm863_vm7, %v862_v39 }
 0x1ad   : > { %v865_v34 = vld [vmem:[#allocation2] sm:$0xff] }
 0x1ae   : > { %v872_v43 = vmul.f32 %v870_v42, %v865_v34 }
 0x1b4   : > { %v877_v44 = vpop.permute.xlu1 %876 }
 0x1b5   : > { %v879_v45 = vadd.f32 %v877_v44, %v872_v43 }
 0x1b7   : > { %v880_v47 = vmax.f32 %v879_v45, 0.0 }
 0x1b8   : > { %v887_v48 = vpop.permute.xlu1 %886 }
 0x1b9   : > { %881 = vst [vmem:[#allocation2] sm:$0xff] %v880_v47  ;;  %v889_v53 = vadd.f32 %v887_v48, %v1438_v41 }
 0x1bd   : > { %v906_v1 = vpop.permute.xlu1 %905 }
 0x1c0   : > { %v1122_v50 = vld [vmem:[#allocation2] ss:$0 sm:$0xff]  ;;  %v1123_v51 = vld [vmem:[#allocation2 + $0x1] ss:$0 sm:$0xff]  ;;  %v1124_v54 = vld [vmem:[#allocation2 + $0x2] ss:$0 sm:$0xff] }
 0x1c1   : > { %v901_v52 = vmul.f32 %v1122_v50, %v895_v49  ;;  %v912_v58 = vmul.f32 %v1123_v51, %v906_v1  ;;  %v923_v59 = vmul.f32 %v1124_v54, %v917_v57  ;;  %v1125_v61 = vld [vmem:[#allocation2 + $0x3] ss:$0 sm:$0xff]  ;;  %v1126_v0 = vld [vmem:[#allocation2 + $0x4] ss:$0 sm:$0xff]  ;;  %v1127_v12 = vld [vmem:[#allocation2 + $0x5] ss:$0 sm:$0xff] }
 0x1c2   : > { %v928_v55 = vpop.permute.xlu1 %927  ;;  %v956_v41 = vmul.f32 %v1127_v12, %v950_v5  ;;  %v1128_v18 = vld [vmem:[#allocation2 + $0x6] ss:$0 sm:$0xff]  ;;  %v1129_v15 = vld [vmem:[#allocation2 + $0x7] ss:$0 sm:$0xff] }
 0x1c3   : > { %v902_v56 = vadd.f32 %v901_v52, %v889_v53  ;;  %v934_v63 = vmul.f32 %v1125_v61, %v928_v55 }
 0x1c5   : > { %v913_v60 = vadd.f32 %v912_v58, %v902_v56 }
 0x1c7   : > { %v924_v62 = vadd.f32 %v923_v59, %v913_v60  ;;  %v939_v2 = vpop.permute.xlu1 %938 }
 0x1c8   : > { %v945_v3 = vmul.f32 %v1126_v0, %v939_v2 }
 0x1c9   : > { %v935_v7 = vadd.f32 %v934_v63, %v924_v62 }
 0x1cb   : > { %v946_v8 = vadd.f32 %v945_v3, %v935_v7 }
 0x1cc   : > { %v961_v10 = vpop.permute.xlu1 %960 }
 0x1cd   : > { %v957_v11 = vadd.f32 %v956_v41, %v946_v8  ;;  %v967_v13 = vmul.f32 %v1128_v18, %v961_v10 }
 0x1cf   : > { %v968_v19 = vadd.f32 %v967_v13, %v957_v11 }
 0x1d1   : > { %v972_v17 = vpop.permute.xlu1 %971 }
 0x1d2   : > { %v978_v21 = vmul.f32 %v1129_v15, %v972_v17 }
 0x1d4   : > { %v979_v22 = vadd.f32 %v978_v21, %v968_v19 }
 0x1d6   : > { %980 = vst [vmem:[%s459_s18] sm:$0xff] %v979_v22 }
 0x1d7 PF: > { %s19_s30 = sadd.s32 1, %s1237_s30  }
 0x1d8   : > { %p16_p4 = scmp.ge.s32.totalorder %s19_s30, 10  }
 0x1da   :  { %18 = sbr.rel (!%p16_p4) target bundleno = 1 (0x1), region = 92 }

// kernel: single_stage_3d_forward.8
= control target key start
LH: loop header
LB: loop body
LE: loop exit
PB: predicated region body
PF: predicated region fallthrough
CT: control target
= control target key end

     0   :  { %s1325_s30 = smov 0   ;;  %s1526_s0 = inlined_call_operand.vmem [shape: f32[8,8,128], index: 0, kind: input, shape index: {}, may-alias: {0,1,2}]   ;;  %s1527_s1 = inlined_call_operand.vmem [shape: f32[8,8,128], index: 1, kind: input, shape index: {}, may-alias: {0,1,2}]   ;;  %s1528_s2 = inlined_call_operand.vmem [shape: f32[8,8,128], index: 2, kind: input, shape index: {}, may-alias: {0,1,2}]   ;;  %s1529_s3 = inlined_call_operand.vmem [shape: f32[8,27], index: 3, kind: input, shape index: {}]   ;;  %s1530_s4 = inlined_call_operand.vmem [shape: f32[8,1], index: 4, kind: input, shape index: {}]   ;;  %s1531_s5 = inlined_call_operand.vmem [shape: f32[8,1], index: 5, kind: input, shape index: {}]   ;;  %s1532_s6 = inlined_call_operand.vmem [shape: f32[8,8], index: 6, kind: input, shape index: {}]   ;;  %s1533_s7 = inlined_call_operand.vmem [shape: f32[8,1], index: 7, kind: input, shape index: {}]   ;;  %s1534_s8 = inlined_call_operand.vmem [shape: f32[9,128], index: 8, kind: input, shape index: {}]   ;;  %s1535_s9 = inlined_call_operand.vmem [shape: f32[8,8,128], index: 9, kind: output, shape index: {}]  }
   0x1 LB: > { %s1331_s10 = sadd.s32 4294967295, %s1237_s30   ;;  %p1092_p0 = scmp.ge.s32.totalorder %s1237_s30, 1  ;;  %s1237_s30 = sphi %s1325_s30, %s19_s30  }
   0x2   : > { %p360_p1 = scmp.lt.s32.totalorder %s1237_s30, 9 }
   0x4   : > { %p361_p2 = pnand %p1092_p0, %p360_p1 }
   0x5   : > { %s1336_s11 = sadd.s32 (!%p361_p2), 4, %s1331_s10  ;;  %s1339_s12 = sadd.s32 (!%p361_p2), 4294967292, %s1331_s10  ;;  %v1239_v0 = vmov (!%p361_p2), 18   ;;  %v1240_v1 = vmov (!%p361_p2), 0   ;;  %v1349_v2 = vld [vmem:[%s1529_s3] sm:$0xff] (!%p361_p2)  ;;  %v1241_v7 = vmov (!%p361_p2), 10  }
   0x6   : > { %364 = sbr.rel (%p361_p2) target bundleno = 471 (0x1d7), region = 56  ;;  %1196 = vset.pattern.permute.xlu1 (!%p361_p2), %v1239_v0  ;;  %1194 = vset.pattern.permute.xlu0 (!%p361_p2), %v1240_v1  ;;  %p467_p3 = scmp.ge.s32.totalorder (!%p361_p2), %s1336_s11, 0  ;;  %v1242_v8 = vmov (!%p361_p2), 9   ;;  %v1243_v9 = vmov (!%p361_p2), 1   ;;  %v1244_v10 = vmov (!%p361_p2), 19   ;;  %v1246_v12 = vmov (!%p361_p2), 2  }
   0x7   : > { %p468_p4 = scmp.le.s32.totalorder (!%p361_p2), %s1336_s11, 7  ;;  %p461_p5 = scmp.ge.s32.totalorder (!%p361_p2), %s1339_s12, 0  ;;  %v1114_v11 = vld [vmem:[%s1534_s8] ss:$0 sm:$0xff] (!%p361_p2)  ;;  %v1247_v13 = vmov (!%p361_p2), 11   ;;  %v1248_v14 = vmov (!%p361_p2), 3  }
   0x8   : > { %p462_p6 = scmp.le.s32.totalorder (!%p361_p2), %s1339_s12, 7  ;;  %s1536_s19 = smov (!%p361_p2), 119   ;;  %v1249_v15 = vmov (!%p361_p2), 20   ;;  %v1116_v16 = vld [vmem:[%s1534_s8 + $0x2] ss:$0 sm:$0xff] (!%p361_p2)  ;;  %v1251_v18 = vmov (!%p361_p2), 5  }
   0x9   : > { %p469_p7 = pnand (!%p361_p2), %p468_p4, %p467_p3  ;;  %v1115_v17 = vld [vmem:[%s1534_s8 + $0x1] ss:$0 sm:$0xff] (!%p361_p2)  ;;  %s1538_s24 = smov (!%p361_p2), 121   ;;  %v1253_v19 = vmov (!%p361_p2), 12   ;;  %v1254_v20 = vmov (!%p361_p2), 6   ;;  %v1255_v21 = vmov (!%p361_p2), 21  }
   0xa   : > { %p463_p8 = pnand (!%p361_p2), %p462_p6, %p461_p5  ;;  %s1537_s25 = smov (!%p361_p2), 120   ;;  %v1118_v22 = vld [vmem:[%s1534_s8 + $0x5] ss:$0 sm:$0xff] (!%p361_p2)  ;;  %v1117_v23 = vld [vmem:[%s1534_s8 + $0x3] ss:$0 sm:$0xff] (!%p361_p2)  ;;  %v1257_v24 = vmov (!%p361_p2), 16  }
   0xb   : > { %s1258_s14 = smov (!%p361_p2), 127   ;;  %v1259_v25 = vmov (!%p361_p2), 14   ;;  %v1119_v26 = vld [vmem:[%s1534_s8 + $0x6] ss:$0 sm:$0xff] (!%p361_p2)  ;;  %s1260_s17 = smov (!%p361_p2), 7   ;;  %v1261_v27 = vmov (!%p361_p2), 17  }
   0xc   : > { %v1262_v28 = vmov (!%p361_p2), 23   ;;  %v1120_v29 = vld [vmem:[%s1534_s8 + $0x7] ss:$0 sm:$0xff] (!%p361_p2)  ;;  %v1263_v30 = vmov (!%p361_p2), 15   ;;  %s1264_s21 = smov (!%p361_p2), 8   ;;  %v1265_v32 = vmov (!%p361_p2), 13  }
   0xd   : > { %s1113_s13 = scalar_select %p469_p7, 0.0, 1.0  ;;  %v1121_v31 = vld [vmem:[%s1534_s8 + $0x8] ss:$0 sm:$0xff]  ;;  %v1266_v33 = vmov 24   ;;  %v1268_v34 = vmov 7  }
   0xe   : > { %s1112_s16 = scalar_select %p463_p8, 0.0, 1.0  ;;  %v1269_v35 = vmov 25   ;;  %v1270_v36 = vmov 8   ;;  %v1271_v37 = vmov 0.0   ;;  %vm518_vm0 = vcmask 1047624  }
   0xf   : > { %v492_v3 = vstv %s1113_s13  ;;  %s1256_s13 = smov 1   ;;  %s1267_s26 = smov 9   ;;  %472 = vst [vmem:[#allocation2] sm:$0xff] %v1271_v37  ;;  %vm563_vm1 = vcmask 1047616   ;;  %vm608_vm2 = vcmask 1047608   ;;  %vm653_vm3 = vcmask 1047560  }
  0x10   : > { %v1352_v4 = vmul.f32 %v492_v3, %v1349_v2  ;;  %v474_v5 = vstv %s1112_s16  ;;  %p417_p9 = scmp.gt.s32.totalorder %s1339_s12, 0  ;;  %p430_p10 = scmp.gt.s32.totalorder %s1331_s10, 0  ;;  %v1272_v3 = vmov 26   ;;  %vm728_vm4 = vcmask 1039360  }
  0x11   : > { %v1355_v6 = vmul.f32 %v474_v5, %v1349_v2  ;;  %p443_p11 = scmp.gt.s32.totalorder %s1336_s11, 0  ;;  %p1093_p12 = scmp.lt.s32.totalorder %s1339_s12, 7  ;;  %vm773_vm5 = vcmask 990208   ;;  %vm818_vm6 = vcmask 982016   ;;  %vm863_vm7 = vcmask 973824  }
  0x12   : > { %497 = vperm.xlu1 %1196, %v1352_v4   ;;  %s418_s27 = scalar_select %p417_p9, %s1339_s12, 0 }
  0x13   : > { %479 = vperm.xlu0 %1194, %v1355_v6   ;;  %p1099_p13 = scmp.lt.s32.totalorder %s1331_s10, 7  ;;  %p1105_p0 = scmp.lt.s32.totalorder %s1336_s11, 7 }
  0x14   : > { %s431_s28 = scalar_select %p430_p10, %s1331_s10, 0 }
  0x15   : > { %s1543_s11 = smov (!%p443_p11, %s1336_s11), 0  ;;  %s1545_s27 = smov (!%p1093_p12, %s418_s27), 7 }
  0x16   : > { %1197 = vset.pattern.permute.xlu1 %v1241_v7  ;;  %s1547_s28 = smov (!%p1099_p13, %s431_s28), 7  ;;  %s1549_s11 = smov (!%p1105_p0, %s1543_s11), 7 }
  0x17   : > { %1195 = vset.pattern.permute.xlu0 %v1242_v8  ;;  %533 = vperm.xlu1 %1197, %v1349_v2   ;;  %p421_p1 = scmp.lt.s32.totalorder %s1545_s27, 7  ;;  %p434_p2 = scmp.lt.s32.totalorder %s1547_s28, 7 }
  0x18   : > { %487 = vperm.xlu0 %1195, %v1349_v2   ;;  %p447_p3 = scmp.lt.s32.totalorder %s1549_s11, 7  ;;  %s1557_s10 = smov (!%p1099_p13, %s1331_s10), 7 }
  0x19   : > { %s1551_s27 = smov (!%p421_p1, %s1545_s27), 7  ;;  %s1553_s28 = smov (!%p434_p2, %s1547_s28), 7 }
  0x1a   : > { %s1555_s11 = smov (!%p447_p3, %s1549_s11), 7  ;;  %s1098_s29 = sshll.u32 %s1551_s27, 3 }
  0x1b   : > { %1198 = vset.pattern.permute.xlu1 %v1243_v9  ;;  %s1104_s15 = sshll.u32 %s1553_s28, 3  ;;  %s424_s18 = scalar_lea.vmem %s1526_s0, %s1098_s29 }
  0x1c   : > { %525 = vperm.xlu1 %1198, %v1355_v6   ;;  %1199 = vset.pattern.permute.xlu0 %v1244_v10  ;;  %s437_s23 = scalar_lea.vmem %s1527_s1, %s1104_s15  ;;  %v1436_v40 = vld [vmem:[%s424_s18] sm:$0xff]  ;;  %s1111_s15 = sshll.u32 %s1557_s10, 3 }
  0x1d   : > { %542 = vperm.xlu0 %1199, %v1352_v4   ;;  %v1438_v41 = vld [vmem:[%s437_s23] sm:$0xff]  ;;  %s459_s18 = scalar_lea.vmem %s1535_s9, %s1111_s15 }
  0x20   : > { %508 = vrot.lane.b32.xlu1 %v1114_v11, %s1536_s19  ;;  %s1110_s19 = sshll.u32 %s1555_s11, 3  ;;  %s1539_s11 = smov 121  }
  0x21   : > { %1200 = vset.pattern.permute.xlu1 %v1246_v12  ;;  %1201 = vset.pattern.permute.xlu0 %v1247_v13  ;;  %s450_s27 = scalar_lea.vmem %s1528_s2, %s1110_s19  ;;  %s1540_s19 = smov 120  }
  0x22   : > { %578 = vperm.xlu0 %1201, %v1349_v2   ;;  %v1445_v46 = vld [vmem:[%s450_s27] sm:$0xff] }
  0x24   : > { %570 = vperm.xlu1 %1200, %v1355_v6  }
  0x26   : > { %1203 = vset.pattern.permute.xlu0 %v1248_v14 }
  0x27   : > { %615 = vperm.xlu0 %1203, %v1355_v6  }
  0x28   : > { %1202 = vset.pattern.permute.xlu1 %v1249_v15 }
  0x29   : > { %587 = vperm.xlu1 %1202, %v1352_v4  }
  0x2b   : > { %598 = vrot.lane.b32.xlu0 %v1116_v16, %s1538_s24  ;;  %v1273_v16 = vmov 4  }
  0x2c   : > { %1206 = vset.pattern.permute.xlu0 %v1251_v18 }
  0x2d   : > { %553 = vrot.lane.b32.xlu1 %v1115_v17, %s1537_s25 }
  0x2e   : > { %1204 = vset.pattern.permute.xlu1 %v1253_v19 }
  0x2f   : > { %690 = vperm.xlu0 %1206, %v1355_v6  }
  0x31   : > { %623 = vperm.xlu1 %1204, %v1349_v2  }
  0x33   : > { %1209 = vset.pattern.permute.xlu0 %v1254_v20 }
  0x34   : > { %735 = vperm.xlu0 %1209, %v1355_v6  }
  0x35   : > { %1205 = vset.pattern.permute.xlu1 %v1255_v21 }
  0x36   : > { %632 = vperm.xlu1 %1205, %v1352_v4  }
  0x38   : > { %718 = vrot.lane.b32.xlu0 %v1118_v22, %s1256_s13 }
  0x39   : > { %1213 = vset.pattern.permute.xlu0 %v1257_v24 }
  0x3a   : > { %643 = vrot.lane.b32.xlu1 %v1117_v23, %s1258_s14 }
  0x3b   : > { %1207 = vset.pattern.permute.xlu1 %v1259_v25 }
  0x3c   : > { %788 = vperm.xlu0 %1213, %v1349_v2  }
  0x3e   : > { %698 = vperm.xlu1 %1207, %v1349_v2  }
  0x40   : > { %763 = vrot.lane.b32.xlu0 %v1119_v26, %s1260_s17 }
  0x41   : > { %1216 = vset.pattern.permute.xlu0 %v1261_v27  ;;  %v1274_v27 = vmov 22  }
  0x42   : > { %1208 = vset.pattern.permute.xlu1 %v1262_v28 }
  0x43   : > { %707 = vperm.xlu1 %1208, %v1352_v4  }
  0x44   : > { %833 = vperm.xlu0 %1216, %v1349_v2  }
  0x47   : > { %1210 = vset.pattern.permute.xlu1 %v1263_v30 }
  0x48   : > { %743 = vperm.xlu1 %1210, %v1349_v2   ;;  %808 = vrot.lane.b32.xlu0 %v1120_v29, %s1264_s21 }
  0x49   : > { %1219 = vset.pattern.permute.xlu0 %v1265_v32 }
  0x4c   : > { %1211 = vset.pattern.permute.xlu1 %v1266_v33  ;;  %853 = vrot.lane.b32.xlu0 %v1121_v31, %s1267_s26 }
  0x4d   : > { %752 = vperm.xlu1 %1211, %v1352_v4  }
  0x50   : > { %668 = vperm.xlu0 %1219, %v1349_v2  }
  0x51   : > { %1212 = vset.pattern.permute.xlu1 %v1268_v34 }
  0x52   : > { %780 = vperm.xlu1 %1212, %v1355_v6  }
  0x54   : > { %1221 = vset.pattern.permute.xlu0 %v1240_v1 }
  0x56   : > { %1214 = vset.pattern.permute.xlu1 %v1269_v35 }
  0x57   : > { %797 = vperm.xlu1 %1214, %v1352_v4  }
  0x5b   : > { %1215 = vset.pattern.permute.xlu1 %v1270_v36 }
  0x91   : > { %v498_v38 = vpop.permute.xlu1 %497 }
  0x92   : > { %v480_v39 = vpop.permute.xlu0 %479  ;;  %v500_v49 = vmul.f32 %v498_v38, %v1445_v46 }
  0x93   : > { %v482_v44 = vmul.f32 %v480_v39, %v1436_v40 }
  0x96   : > { %v534_v42 = vpop.permute.xlu1 %533 }
  0x97   : > { %v488_v43 = vpop.permute.xlu0 %487  ;;  %v536_v59 = vmul.f32 %v534_v42, %v1438_v41 }
  0x98   : > { %v490_v45 = vmul.f32 %v1438_v41, %v488_v43 }
  0x9a   : > { %v491_v47 = vadd.f32 %v490_v45, %v482_v44 }
  0x9b   : > { %v526_v48 = vpop.permute.xlu1 %525 }
  0x9c   : > { %v543_v50 = vpop.permute.xlu0 %542  ;;  %v501_v51 = vadd.f32 %v500_v49, %v491_v47  ;;  %v528_v55 = vmul.f32 %v526_v48, %v1436_v40 }
  0x9d   : > { %v545_v62 = vmul.f32 %v543_v50, %v1445_v46 }
  0x9e   : > { %v537_v61 = vadd.f32 %v536_v59, %v528_v55 }
  0x9f   : > { %v509_v52 = vpop.permute.xlu1 %508 }
  0xa0   : > { %v511_v53 = vmul.f32 %v509_v52, %v501_v51  ;;  %v546_v5 = vadd.f32 %v545_v62, %v537_v61  ;;  %v1485_v61 = vld [vmem:[%s1532_s6] sm:$0xff] }
  0xa1   : > { %v579_v54 = vpop.permute.xlu0 %578 }
  0xa2   : > { %514 = vrot.lane.b32.xlu1 %v511_v53, %s1267_s26  ;;  %v581_v57 = vmul.f32 %v579_v54, %v1438_v41 }
  0xa3   : > { %v571_v56 = vpop.permute.xlu1 %570 }
  0xa4   : > { %v573_v58 = vmul.f32 %v571_v56, %v1436_v40 }
  0xa6   : > { %825 = vperm.xlu1 %1215, %v1355_v6   ;;  %v616_v60 = vpop.permute.xlu0 %615  ;;  %v582_v63 = vadd.f32 %v581_v57, %v573_v58 }
  0xa7   : > { %v618_v15 = vmul.f32 %v616_v60, %v1436_v40  ;;  %v866_v60 = vld [vmem:[%s1530_s4] sm:$0xff] }
  0xa8   : > { %v588_v0 = vpop.permute.xlu1 %587 }
  0xa9   : > { %v590_v2 = vmul.f32 %v588_v0, %v1445_v46 }
  0xaa   : > { %1217 = vset.pattern.permute.xlu1 %v1272_v3  ;;  %v599_v10 = vpop.permute.xlu0 %598 }
  0xab   : > { %842 = vperm.xlu1 %1217, %v1352_v4   ;;  %v591_v7 = vadd.f32 %v590_v2, %v582_v63 }
  0xac   : > { %v554_v8 = vpop.permute.xlu1 %553 }
  0xad   : > { %v556_v11 = vmul.f32 %v554_v8, %v546_v5  ;;  %v601_v13 = vmul.f32 %v599_v10, %v591_v7 }
  0xae   : > { %v691_v25 = vpop.permute.xlu0 %690 }
  0xaf   : > { %559 = vrot.lane.b32.xlu1 %v556_v11, %s1264_s21  ;;  %v693_v30 = vmul.f32 %v691_v25, %v1436_v40 }
  0xb0   : > { %1218 = vset.pattern.permute.xlu1 %v1273_v16  ;;  %v624_v17 = vpop.permute.xlu1 %623 }
  0xb1   : > { %v626_v19 = vmul.f32 %v624_v17, %v1438_v41 }
  0xb3   : > { %604 = vrot.lane.b32.xlu1 %v601_v13, %s1260_s17  ;;  %v627_v21 = vadd.f32 %v626_v19, %v618_v15  ;;  %v736_v32 = vpop.permute.xlu0 %735  ;;  %s1541_s17 = smov 119   ;;  %v873_v15 = vld [vmem:[%s1531_s5] sm:$0xff] }
  0xb4   : > { %v738_v38 = vmul.f32 %v736_v32, %v1436_v40  ;;  %v883_v19 = vld [vmem:[%s1533_s7] sm:$0xff] }
  0xb5   : > { %v633_v22 = vpop.permute.xlu1 %632 }
  0xb6   : > { %v635_v23 = vmul.f32 %v633_v22, %v1445_v46 }
  0xb7   : > { %660 = vperm.xlu1 %1218, %v1355_v6   ;;  %v719_v36 = vpop.permute.xlu0 %718 }
  0xb8   : > { %v636_v24 = vadd.f32 %v635_v23, %v627_v21 }
  0xb9   : > { %v644_v26 = vpop.permute.xlu1 %643 }
  0xba   : > { %v646_v28 = vmul.f32 %v644_v26, %v636_v24 }
  0xbb   : > { %1220 = vset.pattern.permute.xlu1 %v1274_v27  ;;  %v789_v43 = vpop.permute.xlu0 %788 }
  0xbc   : > { %677 = vperm.xlu1 %1220, %v1352_v4   ;;  %v791_v49 = vmul.f32 %v789_v43, %v1438_v41 }
  0xbd   : > { %v699_v29 = vpop.permute.xlu1 %698 }
  0xbe   : > { %v701_v31 = vmul.f32 %v699_v29, %v1438_v41 }
  0xbf   : > { %v764_v48 = vpop.permute.xlu0 %763 }
  0xc0   : > { %649 = vrot.lane.b32.xlu1 %v646_v28, %s1256_s13  ;;  %v702_v33 = vadd.f32 %v701_v31, %v693_v30 }
  0xc1   : > { %1222 = vset.pattern.permute.xlu1 %v1240_v1 }
  0xc2   : > { %v708_v6 = vpop.permute.xlu1 %707 }
  0xc3   : > { %v710_v35 = vmul.f32 %v708_v6, %v1445_v46  ;;  %v834_v53 = vpop.permute.xlu0 %833 }
  0xc4   : > { %v836_v0 = vmul.f32 %v834_v53, %v1438_v41 }
  0xc5   : > { %v711_v37 = vadd.f32 %v710_v35, %v702_v33 }
  0xc7   : > { %v721_v4 = vmul.f32 %v719_v36, %v711_v37  ;;  %v744_v39 = vpop.permute.xlu1 %743  ;;  %v809_v57 = vpop.permute.xlu0 %808 }
  0xc8   : > { %v746_v42 = vmul.f32 %v744_v39, %v1438_v41 }
  0xc9   : > { %724 = vrot.lane.b32.xlu0 %v721_v4, %s1258_s14 }
  0xca   : > { %v747_v44 = vadd.f32 %v746_v42, %v738_v38 }
  0xcb   : > { %v854_v7 = vpop.permute.xlu0 %853 }
  0xcc   : > { %v753_v45 = vpop.permute.xlu1 %752 }
  0xcd   : > { %v755_v47 = vmul.f32 %v753_v45, %v1445_v46 }
  0xcf   : > { %v756_v1 = vadd.f32 %v755_v47, %v747_v44  ;;  %v669_v25 = vpop.permute.xlu0 %668 }
  0xd0   : > { %v671_v28 = vmul.f32 %v669_v25, %v1438_v41 }
  0xd1   : > { %v766_v50 = vmul.f32 %v764_v48, %v756_v1  ;;  %v781_v51 = vpop.permute.xlu1 %780 }
  0xd2   : > { %v783_v52 = vmul.f32 %v781_v51, %v1436_v40 }
  0xd3   : > { %769 = vrot.lane.b32.xlu1 %v766_v50, %s1539_s11 }
  0xd4   : > { %v792_v54 = vadd.f32 %v791_v49, %v783_v52 }
  0xd6   : > { %v798_v55 = vpop.permute.xlu1 %797 }
  0xd7   : > { %v800_v56 = vmul.f32 %v798_v55, %v1445_v46 }
  0xd9   : > { %v801_v58 = vadd.f32 %v800_v56, %v792_v54 }
  0xdb   : > { %v811_v59 = vmul.f32 %v809_v57, %v801_v58 }
  0xdd   : > { %814 = vrot.lane.b32.xlu0 %v811_v59, %s1540_s19 }
  0xe1   : > { %869 = vperm.xlu0 %1221, %v866_v60  }
  0xe5   : > { %894 = vperm.xlu0 %1221, %v1485_v61  }
  0xe9   : > { %1224 = vset.pattern.permute.xlu0 %v1246_v12 }
  0xea   : > { %916 = vperm.xlu0 %1224, %v1485_v61  }
  0xee   : > { %1227 = vset.pattern.permute.xlu0 %v1251_v18 }
  0xef   : > { %949 = vperm.xlu0 %1227, %v1485_v61  }
  0xf3   : > { %1230 = vset.pattern.permute.xlu0 %v1268_v34 }
 0x114   : > { %v515_v62 = vpop.permute.xlu1 %514 }
 0x115   : > { %519 = vst.msk [vmem:[#allocation2] sm:$0xff] %vm518_vm0, %v515_v62 }
 0x11c   : > { %v557_v10 = vld [vmem:[#allocation2] sm:$0xff] }
 0x125   : > { %v826_v63 = vpop.permute.xlu1 %825 }
 0x126   : > { %v828_v2 = vmul.f32 %v826_v63, %v1436_v40 }
 0x128   : > { %v837_v5 = vadd.f32 %v836_v0, %v828_v2 }
 0x12a   : > { %v843_v3 = vpop.permute.xlu1 %842 }
 0x12b   : > { %v845_v12 = vmul.f32 %v843_v3, %v1445_v46 }
 0x12d   : > { %v846_v8 = vadd.f32 %v845_v12, %v837_v5 }
 0x12e   : > { %v560_v18 = vpop.permute.xlu1 %559 }
 0x12f   : > { %v856_v11 = vmul.f32 %v854_v7, %v846_v8  ;;  %v562_v13 = vadd.f32 %v560_v18, %v557_v10 }
 0x131   : > { %564 = vst.msk [vmem:[#allocation2] sm:$0xff] %vm563_vm1, %v562_v13  ;;  %859 = vrot.lane.b32.xlu1 %v856_v11, %s1541_s17 }
 0x132   : > { %v605_v17 = vpop.permute.xlu1 %604 }
 0x135   : > { %876 = vperm.xlu1 %1222, %v873_v15  }
 0x136   : > { %v661_v21 = vpop.permute.xlu1 %660 }
 0x137   : > { %v663_v27 = vmul.f32 %v661_v21, %v1436_v40 }
 0x138   : > { %v602_v22 = vld [vmem:[#allocation2] sm:$0xff] }
 0x139   : > { %v607_v23 = vadd.f32 %v605_v17, %v602_v22  ;;  %886 = vperm.xlu1 %1222, %v883_v19   ;;  %v672_v32 = vadd.f32 %v671_v28, %v663_v27 }
 0x13b   : > { %609 = vst.msk [vmem:[#allocation2] sm:$0xff] %vm608_vm2, %v607_v23  ;;  %v678_v24 = vpop.permute.xlu1 %677  ;;  %v725_v40 = vpop.permute.xlu0 %724 }
 0x13c   : > { %v680_v31 = vmul.f32 %v678_v24, %v1445_v46 }
 0x13d   : > { %1223 = vset.pattern.permute.xlu1 %v1243_v9 }
 0x13e   : > { %905 = vperm.xlu1 %1223, %v1485_v61   ;;  %v681_v9 = vadd.f32 %v680_v31, %v672_v32 }
 0x13f   : > { %v650_v26 = vpop.permute.xlu1 %649 }
 0x142   : > { %1225 = vset.pattern.permute.xlu1 %v1248_v14  ;;  %v647_v29 = vld [vmem:[#allocation2] sm:$0xff] }
 0x143   : > { %v652_v30 = vadd.f32 %v650_v26, %v647_v29  ;;  %927 = vperm.xlu1 %1225, %v1485_v61  }
 0x145   : > { %654 = vst.msk [vmem:[#allocation2] sm:$0xff] %vm653_vm3, %v652_v30  ;;  %v770_v46 = vpop.permute.xlu1 %769 }
 0x147   : > { %1226 = vset.pattern.permute.xlu1 %v1273_v16 }
 0x148   : > { %938 = vperm.xlu1 %1226, %v1485_v61  }
 0x14c   : > { %v682_v33 = vld [vmem:[#allocation2] sm:$0xff]  ;;  %1228 = vset.pattern.permute.xlu1 %v1254_v20 }
 0x14d   : > { %v683_v6 = vadd.f32 %v682_v33, %v681_v9  ;;  %960 = vperm.xlu1 %1228, %v1485_v61  }
 0x14f   : > { %684 = vst [vmem:[#allocation2] sm:$0xff] %v683_v6  ;;  %v727_v14 = vadd.f32 %v725_v40, %v683_v6  ;;  %v815_v36 = vpop.permute.xlu0 %814 }
 0x151   : > { %1229 = vset.pattern.permute.xlu1 %v1268_v34  ;;  %729 = vst.msk [vmem:[#allocation2] sm:$0xff] %vm728_vm4, %v727_v14 }
 0x152   : > { %971 = vperm.xlu1 %1229, %v1485_v61  }
 0x158   : > { %v767_v16 = vld [vmem:[#allocation2] sm:$0xff] }
 0x159   : > { %v772_v35 = vadd.f32 %v770_v46, %v767_v16 }
 0x15b   : > { %774 = vst.msk [vmem:[#allocation2] sm:$0xff] %vm773_vm5, %v772_v35 }
 0x160   : > { %v870_v42 = vpop.permute.xlu0 %869 }
 0x162   : > { %v812_v20 = vld [vmem:[#allocation2] sm:$0xff] }
 0x163   : > { %v817_v37 = vadd.f32 %v815_v36, %v812_v20 }
 0x164   : > { %v895_v49 = vpop.permute.xlu0 %894 }
 0x165   : > { %819 = vst.msk [vmem:[#allocation2] sm:$0xff] %vm818_vm6, %v817_v37 }
 0x169   : > { %v917_v57 = vpop.permute.xlu0 %916 }
 0x16c   : > { %v857_v38 = vld [vmem:[#allocation2] sm:$0xff] }
 0x16e   : > { %v950_v5 = vpop.permute.xlu0 %949 }
 0x1a3   : > { %v860_v4 = vpop.permute.xlu1 %859 }
 0x1a4   : > { %v862_v39 = vadd.f32 %v860_v4, %v857_v38 }
 0x1a6   : > { %864 = vst.msk [vmem:[#allocation2] sm:$0xff] %vm863_vm7, %v862_v39 }
 0x1ad   : > { %v865_v34 = vld [vmem:[#allocation2] sm:$0xff] }
 0x1ae   : > { %v872_v43 = vmul.f32 %v870_v42, %v865_v34 }
 0x1b4   : > { %v877_v44 = vpop.permute.xlu1 %876 }
 0x1b5   : > { %v879_v45 = vadd.f32 %v877_v44, %v872_v43 }
 0x1b7   : > { %v880_v47 = vmax.f32 %v879_v45, 0.0 }
 0x1b8   : > { %v887_v48 = vpop.permute.xlu1 %886 }
 0x1b9   : > { %881 = vst [vmem:[#allocation2] sm:$0xff] %v880_v47  ;;  %v889_v53 = vadd.f32 %v887_v48, %v1438_v41 }
 0x1bd   : > { %v906_v1 = vpop.permute.xlu1 %905 }
 0x1c0   : > { %v1122_v50 = vld [vmem:[#allocation2] ss:$0 sm:$0xff]  ;;  %v1123_v51 = vld [vmem:[#allocation2 + $0x1] ss:$0 sm:$0xff]  ;;  %v1124_v54 = vld [vmem:[#allocation2 + $0x2] ss:$0 sm:$0xff] }
 0x1c1   : > { %v901_v52 = vmul.f32 %v1122_v50, %v895_v49  ;;  %v912_v58 = vmul.f32 %v1123_v51, %v906_v1  ;;  %v923_v59 = vmul.f32 %v1124_v54, %v917_v57  ;;  %v1125_v61 = vld [vmem:[#allocation2 + $0x3] ss:$0 sm:$0xff]  ;;  %v1126_v0 = vld [vmem:[#allocation2 + $0x4] ss:$0 sm:$0xff]  ;;  %v1127_v12 = vld [vmem:[#allocation2 + $0x5] ss:$0 sm:$0xff] }
 0x1c2   : > { %v928_v55 = vpop.permute.xlu1 %927  ;;  %v956_v41 = vmul.f32 %v1127_v12, %v950_v5  ;;  %v1128_v18 = vld [vmem:[#allocation2 + $0x6] ss:$0 sm:$0xff]  ;;  %v1129_v15 = vld [vmem:[#allocation2 + $0x7] ss:$0 sm:$0xff] }
 0x1c3   : > { %v902_v56 = vadd.f32 %v901_v52, %v889_v53  ;;  %v934_v63 = vmul.f32 %v1125_v61, %v928_v55 }
 0x1c5   : > { %v913_v60 = vadd.f32 %v912_v58, %v902_v56 }
 0x1c7   : > { %v924_v62 = vadd.f32 %v923_v59, %v913_v60  ;;  %v939_v2 = vpop.permute.xlu1 %938 }
 0x1c8   : > { %v945_v3 = vmul.f32 %v1126_v0, %v939_v2 }
 0x1c9   : > { %v935_v7 = vadd.f32 %v934_v63, %v924_v62 }
 0x1cb   : > { %v946_v8 = vadd.f32 %v945_v3, %v935_v7 }
 0x1cc   : > { %v961_v10 = vpop.permute.xlu1 %960 }
 0x1cd   : > { %v957_v11 = vadd.f32 %v956_v41, %v946_v8  ;;  %v967_v13 = vmul.f32 %v1128_v18, %v961_v10 }
 0x1cf   : > { %v968_v19 = vadd.f32 %v967_v13, %v957_v11 }
 0x1d1   : > { %v972_v17 = vpop.permute.xlu1 %971 }
 0x1d2   : > { %v978_v21 = vmul.f32 %v1129_v15, %v972_v17 }
 0x1d4   : > { %v979_v22 = vadd.f32 %v978_v21, %v968_v19 }
 0x1d6   : > { %980 = vst [vmem:[%s459_s18] sm:$0xff] %v979_v22 }
 0x1d7 PF: > { %s19_s30 = sadd.s32 1, %s1237_s30  }
 0x1d8   : > { %p16_p4 = scmp.ge.s32.totalorder %s19_s30, 10  }
 0x1da   :  { %18 = sbr.rel (!%p16_p4) target bundleno = 1 (0x1), region = 92 }

// kernel: single_stage_3d_forward.9
= control target key start
LH: loop header
LB: loop body
LE: loop exit
PB: predicated region body
PF: predicated region fallthrough
CT: control target
= control target key end

     0   :  { %s755_s12 = smov 0   ;;  %s845_s0 = inlined_call_operand.vmem [shape: f32[8,8,128], index: 0, kind: input, shape index: {}]   ;;  %s846_s1 = inlined_call_operand.vmem [shape: f32[6,8], index: 1, kind: input, shape index: {}]   ;;  %s847_s2 = inlined_call_operand.vmem [shape: f32[6,1], index: 2, kind: input, shape index: {}]   ;;  %s848_s3 = inlined_call_operand.vmem [shape: f32[8,6,128], index: 3, kind: output, shape index: {}]  }
   0x1 LB: > { %s610_s13 = sadd.s32 4294967295, %s725_s12   ;;  %p614_p0 = scmp.ge.s32.totalorder %s725_s12, 1  ;;  %s725_s12 = sphi %s755_s12, %s13_s12  }
   0x2   : > { %p138_p1 = scmp.lt.s32.totalorder %s725_s12, 3 }
   0x4   : > { %p139_p2 = pnand %p614_p0, %p138_p1 }
   0x5   : > { %v175_v0 = vld [vmem:[%s846_s1] sm:$0x3f] (!%p139_p2)  ;;  %v727_v1 = vmov (!%p139_p2), 2   ;;  %v728_v2 = vmov (!%p139_p2), 1   ;;  %v729_v4 = vmov (!%p139_p2), 3   ;;  %v730_v5 = vmov (!%p139_p2), 4  }
   0x6   : > { %142 = sbr.rel (%p139_p2) target bundleno = 236 (0xec), region = 32  ;;  %697 = vset.pattern.permute.xlu1 (!%p139_p2), %v727_v1  ;;  %696 = vset.pattern.permute.xlu0 (!%p139_p2), %v728_v2  ;;  %v272_v3 = vld [vmem:[%s846_s1] sm:$0x3f] (!%p139_p2)  ;;  %v731_v6 = vmov (!%p139_p2), 0   ;;  %v732_v8 = vmov (!%p139_p2), 6   ;;  %v733_v10 = vmov (!%p139_p2), 7  }
   0x7   : > { %201 = vperm.xlu1 (!%p139_p2), %697, %v175_v0   ;;  %190 = vperm.xlu0 (!%p139_p2), %696, %v175_v0   ;;  %v174_v7 = vld [vmem:[%s847_s2] sm:$0x3f] (!%p139_p2)  ;;  %v734_v11 = vmov (!%p139_p2), 5   ;;  %s615_s24 = sshll.u32 (!%p139_p2), %s610_s13, 2 }
   0x8   : > { %v460_v9 = vld [vmem:[%s846_s1] sm:$0x3f] (!%p139_p2)  ;;  %p163_p3 = scmp.lt.s32.totalorder (!%p139_p2), %s615_s24, 7 }
   0x9   : > { %v366_v12 = vld [vmem:[%s846_s1] sm:$0x3f] (!%p139_p2) }
   0xb   : > { %698 = vset.pattern.permute.xlu1 (!%p139_p2), %v729_v4  ;;  %704 = vset.pattern.permute.xlu0 (!%p139_p2), %v727_v1 }
   0xc   : > { %212 = vperm.xlu1 (!%p139_p2), %698, %v175_v0   ;;  %299 = vperm.xlu0 (!%p139_p2), %704, %v272_v3  }
   0xd   : > { %s850_s24 = smov (!%p163_p3, %s615_s24), 7 }
   0xe   : > { %s616_s25 = sshll.u32 %s850_s24, 3 }
   0xf   : > { %s788_s28 = scalar_lea.vmem %s845_s0, %s616_s25  ;;  %s813_s4 = scalar_lea.vmem %s848_s3, %s616_s25 }
  0x10   : > { %699 = vset.pattern.permute.xlu1 %v730_v5  ;;  %705 = vset.pattern.permute.xlu0 %v731_v6  ;;  %v620_v20 = vld [vmem:[%s788_s28 + $0x1] ss:$0 sm:$0xff]  ;;  %v619_v21 = vld [vmem:[%s788_s28] ss:$0 sm:$0xff]  ;;  %v621_v27 = vld [vmem:[%s788_s28 + $0x2] ss:$0 sm:$0xff] }
  0x11   : > { %223 = vperm.xlu1 %699, %v175_v0   ;;  %179 = vperm.xlu0 %705, %v175_v0   ;;  %v622_v31 = vld [vmem:[%s788_s28 + $0x3] ss:$0 sm:$0xff]  ;;  %v632_v35 = vld [vmem:[%s788_s28 + $0xa] ss:$0 sm:$0xff]  ;;  %v628_v36 = vld [vmem:[%s788_s28 + $0x8] ss:$0 sm:$0xff] }
  0x12   : > { %v630_v38 = vld [vmem:[%s788_s28 + $0x9] ss:$0 sm:$0xff]  ;;  %v623_v39 = vld [vmem:[%s788_s28 + $0x4] ss:$0 sm:$0xff]  ;;  %v634_v44 = vld [vmem:[%s788_s28 + $0xb] ss:$0 sm:$0xff] }
  0x13   : > { %v624_v46 = vld [vmem:[%s788_s28 + $0x5] ss:$0 sm:$0xff]  ;;  %v625_v48 = vld [vmem:[%s788_s28 + $0x6] ss:$0 sm:$0xff]  ;;  %v626_v54 = vld [vmem:[%s788_s28 + $0x7] ss:$0 sm:$0xff] }
  0x14   : > { %v636_v55 = vld [vmem:[%s788_s28 + $0xc] ss:$0 sm:$0xff] }
  0x15   : > { %700 = vset.pattern.permute.xlu1 %v732_v8  ;;  %267 = vperm.xlu0 %705, %v174_v7  }
  0x16   : > { %245 = vperm.xlu1 %700, %v175_v0  }
  0x19   : > { %465 = vperm.xlu0 %705, %v460_v9  }
  0x1a   : > { %701 = vset.pattern.permute.xlu1 %v733_v10 }
  0x1b   : > { %256 = vperm.xlu1 %701, %v175_v0  }
  0x1d   : > { %709 = vset.pattern.permute.xlu0 %v729_v4 }
  0x1e   : > { %310 = vperm.xlu0 %709, %v272_v3  }
  0x1f   : > { %702 = vset.pattern.permute.xlu1 %v731_v6 }
  0x20   : > { %277 = vperm.xlu1 %702, %v272_v3  }
  0x22   : > { %711 = vset.pattern.permute.xlu0 %v730_v5 }
  0x23   : > { %321 = vperm.xlu0 %711, %v272_v3  }
  0x24   : > { %703 = vset.pattern.permute.xlu1 %v728_v2 }
  0x25   : > { %288 = vperm.xlu1 %703, %v272_v3  }
  0x27   : > { %712 = vset.pattern.permute.xlu0 %v734_v11 }
  0x28   : > { %234 = vperm.xlu0 %712, %v175_v0  }
  0x29   : > { %706 = vset.pattern.permute.xlu1 %v731_v6 }
  0x2a   : > { %371 = vperm.xlu1 %706, %v366_v12  }
  0x2c   : > { %332 = vperm.xlu0 %712, %v272_v3  }
  0x2e   : > { %707 = vset.pattern.permute.xlu1 %v728_v2 }
  0x2f   : > { %382 = vperm.xlu1 %707, %v366_v12  }
  0x30   : > { %715 = vset.pattern.permute.xlu0 %v732_v8 }
  0x31   : > { %343 = vperm.xlu0 %715, %v272_v3  }
  0x33   : > { %476 = vperm.xlu1 %707, %v460_v9  }
  0x35   : > { %717 = vset.pattern.permute.xlu0 %v733_v10 }
  0x36   : > { %354 = vperm.xlu0 %717, %v272_v3  }
  0x37   : > { %708 = vset.pattern.permute.xlu1 %v727_v1  ;;  %v638_v1 = vld [vmem:[%s788_s28 + $0xd] ss:$0 sm:$0xff] }
  0x38   : > { %393 = vperm.xlu1 %708, %v366_v12  }
  0x3a   : > { %542 = vperm.xlu0 %717, %v460_v9  }
  0x3c   : > { %487 = vperm.xlu1 %708, %v460_v9  }
  0x40   : > { %710 = vset.pattern.permute.xlu1 %v729_v4  ;;  %v640_v4 = vld [vmem:[%s788_s28 + $0xe] ss:$0 sm:$0xff] }
  0x41   : > { %404 = vperm.xlu1 %710, %v366_v12  }
  0x45   : > { %498 = vperm.xlu1 %710, %v460_v9  }
  0x49   : > { %713 = vset.pattern.permute.xlu1 %v730_v5 }
  0x4a   : > { %415 = vperm.xlu1 %713, %v366_v12  }
  0x4e   : > { %509 = vperm.xlu1 %713, %v460_v9  }
  0x52   : > { %714 = vset.pattern.permute.xlu1 %v734_v11  ;;  %v642_v11 = vld [vmem:[%s788_s28 + $0xf] ss:$0 sm:$0xff] }
  0x53   : > { %426 = vperm.xlu1 %714, %v366_v12  }
  0x57   : > { %520 = vperm.xlu1 %714, %v460_v9  }
  0x5b   : > { %716 = vset.pattern.permute.xlu1 %v732_v8 }
  0x5c   : > { %437 = vperm.xlu1 %716, %v366_v12  }
  0x60   : > { %531 = vperm.xlu1 %716, %v460_v9  }
  0x64   : > { %718 = vset.pattern.permute.xlu1 %v733_v10 }
  0x65   : > { %448 = vperm.xlu1 %718, %v366_v12  }
  0x86   : > { %v202_v13 = vpop.permute.xlu1 %201  ;;  %v191_v14 = vpop.permute.xlu0 %190 }
  0x87   : > { %v197_v23 = vmul.f32 %v620_v20, %v191_v14  ;;  %v208_v30 = vmul.f32 %v621_v27, %v202_v13  ;;  %v664_v27 = vld [vmem:[%s788_s28 + $0x19] ss:$0 sm:$0xff] }
  0x8b   : > { %v213_v15 = vpop.permute.xlu1 %212  ;;  %v300_v16 = vpop.permute.xlu0 %299 }
  0x8c   : > { %v219_v34 = vmul.f32 %v622_v31, %v213_v15  ;;  %v306_v42 = vmul.f32 %v632_v35, %v300_v16  ;;  %v647_v31 = vld [vmem:[%s788_s28 + $0x11] ss:$0 sm:$0xff]  ;;  %v649_v35 = vld [vmem:[%s788_s28 + $0x12] ss:$0 sm:$0xff] }
  0x90   : > { %v224_v17 = vpop.permute.xlu1 %223  ;;  %v180_v18 = vpop.permute.xlu0 %179 }
  0x91   : > { %v186_v24 = vmul.f32 %v619_v21, %v180_v18  ;;  %v230_v47 = vmul.f32 %v623_v39, %v224_v17  ;;  %v670_v39 = vld [vmem:[%s788_s28 + $0x1c] ss:$0 sm:$0xff] }
  0x93   : > { %v198_v28 = vadd.f32 %v197_v23, %v186_v24 }
  0x94   : > { %v790_v19 = vpop.permute.xlu0 %267 }
  0x95   : > { %v246_v22 = vpop.permute.xlu1 %245  ;;  %v209_v33 = vadd.f32 %v208_v30, %v198_v28 }
  0x96   : > { %v252_v58 = vmul.f32 %v625_v48, %v246_v22 }
  0x97   : > { %v220_v41 = vadd.f32 %v219_v34, %v209_v33  ;;  %v668_v33 = vld [vmem:[%s788_s28 + $0x1b] ss:$0 sm:$0xff]  ;;  %v645_v34 = vld [vmem:[%s788_s28 + $0x10] ss:$0 sm:$0xff] }
  0x98   : > { %v794_v25 = vpop.permute.xlu0 %465 }
  0x99   : > { %v231_v52 = vadd.f32 %v230_v47, %v220_v41  ;;  %v651_v41 = vld [vmem:[%s788_s28 + $0x13] ss:$0 sm:$0xff] }
  0x9a   : > { %v257_v26 = vpop.permute.xlu1 %256 }
  0x9b   : > { %v263_v61 = vmul.f32 %v626_v54, %v257_v26  ;;  %v662_v26 = vld [vmem:[%s788_s28 + $0x18] ss:$0 sm:$0xff] }
  0x9c   : > { %v472_v30 = vmul.f32 %v662_v26, %v794_v25 }
  0x9d   : > { %v311_v29 = vpop.permute.xlu0 %310 }
  0x9e   : > { %v317_v51 = vmul.f32 %v634_v44, %v311_v29  ;;  %v666_v29 = vld [vmem:[%s788_s28 + $0x1a] ss:$0 sm:$0xff] }
  0x9f   : > { %v278_v32 = vpop.permute.xlu1 %277 }
  0xa0   : > { %v284_v43 = vmul.f32 %v628_v36, %v278_v32 }
  0xa2   : > { %v322_v37 = vpop.permute.xlu0 %321 }
  0xa3   : > { %v328_v62 = vmul.f32 %v636_v55, %v322_v37 }
  0xa4   : > { %v289_v40 = vpop.permute.xlu1 %288 }
  0xa5   : > { %v295_v45 = vmul.f32 %v630_v38, %v289_v40 }
  0xa7   : > { %v296_v49 = vadd.f32 %v295_v45, %v284_v43  ;;  %v235_v50 = vpop.permute.xlu0 %234  ;;  %v672_v45 = vld [vmem:[%s788_s28 + $0x1d] ss:$0 sm:$0xff] }
  0xa8   : > { %v241_v53 = vmul.f32 %v624_v46, %v235_v50  ;;  %v653_v46 = vld [vmem:[%s788_s28 + $0x14] ss:$0 sm:$0xff] }
  0xa9   : > { %v307_v56 = vadd.f32 %v306_v42, %v296_v49  ;;  %v372_v57 = vpop.permute.xlu1 %371 }
  0xaa   : > { %v242_v59 = vadd.f32 %v241_v53, %v231_v52  ;;  %v378_v43 = vmul.f32 %v645_v34, %v372_v57  ;;  %v655_v52 = vld [vmem:[%s788_s28 + $0x15] ss:$0 sm:$0xff] }
  0xab   : > { %v333_v60 = vpop.permute.xlu0 %332  ;;  %v318_v0 = vadd.f32 %v317_v51, %v307_v56  ;;  %v674_v56 = vld [vmem:[%s788_s28 + $0x1e] ss:$0 sm:$0xff] }
  0xac   : > { %v253_v63 = vadd.f32 %v252_v58, %v242_v59  ;;  %v339_v7 = vmul.f32 %v638_v1, %v333_v60  ;;  %v657_v59 = vld [vmem:[%s788_s28 + $0x16] ss:$0 sm:$0xff] }
  0xad   : > { %v329_v6 = vadd.f32 %v328_v62, %v318_v0 }
  0xae   : > { %v264_v2 = vadd.f32 %v263_v61, %v253_v63  ;;  %v383_v3 = vpop.permute.xlu1 %382  ;;  %v676_v63 = vld [vmem:[%s788_s28 + $0x1f] ss:$0 sm:$0xff] }
  0xaf   : > { %v340_v12 = vadd.f32 %v339_v7, %v329_v6  ;;  %v389_v38 = vmul.f32 %v647_v31, %v383_v3  ;;  %v659_v6 = vld [vmem:[%s788_s28 + $0x17] ss:$0 sm:$0xff] }
  0xb0   : > { %v270_v5 = vadd.f32 %v790_v19, %v264_v2  ;;  %v344_v8 = vpop.permute.xlu0 %343 }
  0xb1   : > { %v350_v9 = vmul.f32 %v640_v4, %v344_v8  ;;  %v390_v48 = vadd.f32 %v389_v38, %v378_v43 }
  0xb2   : > { %271 = vst [vmem:[%s813_s4] sm:$0x3f] %v270_v5  ;;  %v477_v10 = vpop.permute.xlu1 %476 }
  0xb3   : > { %v351_v14 = vadd.f32 %v350_v9, %v340_v12  ;;  %v483_v32 = vmul.f32 %v664_v27, %v477_v10 }
  0xb5   : > { %v355_v13 = vpop.permute.xlu0 %354  ;;  %v484_v40 = vadd.f32 %v483_v32, %v472_v30 }
  0xb6   : > { %v361_v15 = vmul.f32 %v642_v11, %v355_v13 }
  0xb7   : > { %v394_v16 = vpop.permute.xlu1 %393 }
  0xb8   : > { %v362_v17 = vadd.f32 %v361_v15, %v351_v14  ;;  %v400_v44 = vmul.f32 %v649_v35, %v394_v16 }
  0xb9   : > { %v543_v62 = vpop.permute.xlu0 %542 }
  0xba   : > { %v363_v18 = vadd.f32 %v362_v17, %v790_v19  ;;  %v401_v54 = vadd.f32 %v400_v44, %v390_v48  ;;  %v549_v5 = vmul.f32 %v676_v63, %v543_v62 }
  0xbb   : > { %v488_v20 = vpop.permute.xlu1 %487 }
  0xbc   : > { %643 = vst [vmem:[%s813_s4 + $0x8] sm:$0x3f] %v363_v18  ;;  %v494_v36 = vmul.f32 %v666_v29, %v488_v20 }
  0xbe   : > { %v495_v25 = vadd.f32 %v494_v36, %v484_v40 }
  0xc0   : > { %v405_v21 = vpop.permute.xlu1 %404 }
  0xc1   : > { %v411_v49 = vmul.f32 %v651_v41, %v405_v21 }
  0xc3   : > { %v412_v57 = vadd.f32 %v411_v49, %v401_v54 }
  0xc4   : > { %v499_v22 = vpop.permute.xlu1 %498 }
  0xc5   : > { %v505_v42 = vmul.f32 %v668_v33, %v499_v22 }
  0xc7   : > { %v506_v51 = vadd.f32 %v505_v42, %v495_v25 }
  0xc9   : > { %v416_v23 = vpop.permute.xlu1 %415 }
  0xca   : > { %v422_v55 = vmul.f32 %v653_v46, %v416_v23 }
  0xcc   : > { %v423_v2 = vadd.f32 %v422_v55, %v412_v57 }
  0xcd   : > { %v510_v24 = vpop.permute.xlu1 %509 }
  0xce   : > { %v516_v47 = vmul.f32 %v670_v39, %v510_v24 }
  0xd0   : > { %v517_v58 = vadd.f32 %v516_v47, %v506_v51 }
  0xd2   : > { %v427_v28 = vpop.permute.xlu1 %426 }
  0xd3   : > { %v433_v60 = vmul.f32 %v655_v52, %v427_v28 }
  0xd5   : > { %v434_v7 = vadd.f32 %v433_v60, %v423_v2 }
  0xd6   : > { %v521_v37 = vpop.permute.xlu1 %520 }
  0xd7   : > { %v527_v53 = vmul.f32 %v672_v45, %v521_v37 }
  0xd9   : > { %v528_v0 = vadd.f32 %v527_v53, %v517_v58 }
  0xdb   : > { %v438_v50 = vpop.permute.xlu1 %437 }
  0xdc   : > { %v444_v3 = vmul.f32 %v657_v59, %v438_v50 }
  0xde   : > { %v445_v9 = vadd.f32 %v444_v3, %v434_v7 }
  0xdf   : > { %v532_v61 = vpop.permute.xlu1 %531 }
  0xe0   : > { %v538_v1 = vmul.f32 %v674_v56, %v532_v61 }
  0xe2   : > { %v539_v4 = vadd.f32 %v538_v1, %v528_v0 }
  0xe4   : > { %v449_v8 = vpop.permute.xlu1 %448  ;;  %v550_v11 = vadd.f32 %v549_v5, %v539_v4 }
  0xe5   : > { %v455_v10 = vmul.f32 %v659_v6, %v449_v8 }
  0xe6   : > { %v551_v14 = vadd.f32 %v550_v11, %v790_v19 }
  0xe7   : > { %v456_v12 = vadd.f32 %v455_v10, %v445_v9 }
  0xe8   : > { %677 = vst [vmem:[%s813_s4 + $0x18] sm:$0x3f] %v551_v14 }
  0xe9   : > { %v457_v13 = vadd.f32 %v456_v12, %v790_v19 }
  0xeb   : > { %660 = vst [vmem:[%s813_s4 + $0x10] sm:$0x3f] %v457_v13 }
  0xec PF: > { %s13_s12 = sadd.s32 1, %s725_s12  }
  0xed   : > { %p10_p4 = scmp.ge.s32.totalorder %s13_s12, 4  }
  0xef   :  { %12 = sbr.rel (!%p10_p4) target bundleno = 1 (0x1), region = 68 }

</bundles_post_ra>
